<compile_context>
chip_gen: v6e
topology: v6e:2x2x1
jax: 0.10.0
libtpu: 0.0.40
codegen_flags: <defaults>
</compile_context>

<pallas_src>
import functools

import jax
import jax.numpy as jnp
from jax import lax
from jax.experimental import pallas as pl
from jax.experimental.pallas import tpu as pltpu


# =============================================================================
# Fused kernel: layer-0 projection (per chunk) + 3-layer LSTM recurrence +
# MLP head.  grid = (ceil(T/chunk),), sequential ("arbitrary").
# =============================================================================
def _fused_lstm_kernel(x_ref, wih0_ref, b0_ref, whh0_ref,
                       w1_ref, b1_ref, w2_ref, b2_ref,
                       wfc1_ref, bfc1_ref, wfc2_ref, bfc2_ref,
                       out_ref,
                       gx_s, h0, c0, h1, c1, h2, c2,
                       *, hidden_size, chunk, batch, seq_len):
    step = pl.program_id(0)
    H = hidden_size
    B = batch

    @pl.when(step == 0)
    def _init():
        h0[...] = jnp.zeros_like(h0)
        h1[...] = jnp.zeros_like(h1)
        h2[...] = jnp.zeros_like(h2)
        c0[...] = jnp.zeros_like(c0)
        c1[...] = jnp.zeros_like(c1)
        c2[...] = jnp.zeros_like(c2)

    # ---- layer-0 input projection for the whole chunk (one big matmul,
    #      M = chunk*B rows, hidden behind the serial recurrence) ----
    gx_s[...] = (jnp.dot(x_ref[...], wih0_ref[...],
                         preferred_element_type=jnp.float32)
                 + b0_ref[...])

    # ---- hoisted per-grid-step constants (JAX does not CSE broadcasts) ----
    b1 = jnp.broadcast_to(b1_ref[...], (B, 4 * H))
    b2 = jnp.broadcast_to(b2_ref[...], (B, 4 * H))
    # lane-wise prescale for the tanh-based sigmoid: 0.5 on (i,f,o), 1.0 on g
    half = jnp.concatenate(
        [jnp.full((1, 3 * H), 0.5, jnp.float32),
         jnp.ones((1, H), jnp.float32)], axis=1)

    needs_mask = (seq_len % chunk) != 0

    def cell(gates, c_prev):
        # sigmoid(x) = 0.5*tanh(0.5*x) + 0.5 : one tanh pass over (B, 4H)
        t = jnp.tanh(gates * half)
        i_g = t[:, 0 * H:1 * H] * 0.5 + 0.5
        f_g = t[:, 1 * H:2 * H] * 0.5 + 0.5
        o_g = t[:, 2 * H:3 * H] * 0.5 + 0.5
        g_g = t[:, 3 * H:4 * H]
        c_new = f_g * c_prev + i_g * g_g
        h_new = o_g * jnp.tanh(c_new)
        return h_new, c_new

    def body(t, carry):
        row = pl.multiple_of(t * B, B)
        # ---- layer 0: x-projection precomputed for the chunk ----
        g0 = gx_s[pl.ds(row, B), :] + jnp.dot(
            h0[...], whh0_ref[...], preferred_element_type=jnp.float32)
        hn0, cn0 = cell(g0, c0[...])
        hn0_b = hn0.astype(jnp.bfloat16)
        # ---- layer 1: single matmul on merged [W_ih ; W_hh] ----
        hcat1 = jnp.concatenate([hn0_b, h1[...]], axis=1)
        g1 = b1 + jnp.dot(hcat1, w1_ref[...],
                          preferred_element_type=jnp.float32)
        hn1, cn1 = cell(g1, c1[...])
        hn1_b = hn1.astype(jnp.bfloat16)
        # ---- layer 2 ----
        hcat2 = jnp.concatenate([hn1_b, h2[...]], axis=1)
        g2 = b2 + jnp.dot(hcat2, w2_ref[...],
                          preferred_element_type=jnp.float32)
        hn2, cn2 = cell(g2, c2[...])
        hn2_b = hn2.astype(jnp.bfloat16)

        if needs_mask:
            valid = (step * chunk + t) < seq_len
            hn0_b = jnp.where(valid, hn0_b, h0[...])
            hn1_b = jnp.where(valid, hn1_b, h1[...])
            hn2_b = jnp.where(valid, hn2_b, h2[...])
            cn0 = jnp.where(valid, cn0, c0[...])
            cn1 = jnp.where(valid, cn1, c1[...])
            cn2 = jnp.where(valid, cn2, c2[...])

        h0[...] = hn0_b
        c0[...] = cn0
        h1[...] = hn1_b
        c1[...] = cn1
        h2[...] = hn2_b
        c2[...] = cn2
        return carry

    lax.fori_loop(0, chunk, body, 0, unroll=True)

    # ---- MLP head fused into the last grid step: relu -> fc1 -> relu -> fc ----
    @pl.when(step == pl.num_programs(0) - 1)
    def _head():
        z = jnp.maximum(h2[...], 0.0)                       # bf16 relu
        z = jnp.dot(z, wfc1_ref[...],
                    preferred_element_type=jnp.float32) + bfc1_ref[...]
        z = jnp.maximum(z, 0.0)
        out_ref[...] = (jnp.dot(z.astype(jnp.bfloat16), wfc2_ref[...],
                                preferred_element_type=jnp.float32)
                        + bfc2_ref[...])


# =============================================================================
# Forward pass (mirrors LSTM1.forward)
# =============================================================================
def lstm1_forward(x_btd, params, *, hidden_size, chunk_cap=32):
    B, T, Din = x_btd.shape
    H = hidden_size
    F1 = params["fc1_w"].shape[1]
    C = params["fc_w"].shape[1]

    # Batch padded to a sublane multiple (8); timesteps padded up to a chunk
    # multiple (padded steps are masked inside the kernel).
    B_pad = max(8, ((B + 7) // 8) * 8)
    chunk = min(chunk_cap, T)
    n_steps = pl.cdiv(T, chunk)
    T_pad = n_steps * chunk

    x_tbd = jnp.transpose(x_btd, (1, 0, 2)).astype(jnp.bfloat16)  # (T,B,Din)
    x_tbd = jnp.pad(x_tbd, ((0, T_pad - T), (0, B_pad - B), (0, 0)))
    x_flat = x_tbd.reshape(T_pad * B_pad, Din)

    # merged (2H, 4H) recurrent weights: one matmul per layer per timestep
    w1 = jnp.concatenate([params["lstm1_wih"], params["lstm1_whh"]], axis=0)
    w2 = jnp.concatenate([params["lstm2_wih"], params["lstm2_whh"]], axis=0)

    kernel = functools.partial(_fused_lstm_kernel, hidden_size=H,
                               chunk=chunk, batch=B_pad, seq_len=T)
    const2 = lambda s: (0, 0)
    out = pl.pallas_call(
        kernel,
        out_shape=jax.ShapeDtypeStruct((B_pad, C), jnp.float32),
        grid_spec=pltpu.PrefetchScalarGridSpec(
            num_scalar_prefetch=0,
            grid=(n_steps,),
            in_specs=[
                pl.BlockSpec((chunk * B_pad, Din), lambda s: (s, 0)),  # x rows
                pl.BlockSpec((Din, 4 * H), const2),      # W_ih0
                pl.BlockSpec((1, 4 * H), const2),        # b0
                pl.BlockSpec((H, 4 * H), const2),        # W_hh0
                pl.BlockSpec((2 * H, 4 * H), const2),    # [W_ih1;W_hh1]
                pl.BlockSpec((1, 4 * H), const2),        # b1
                pl.BlockSpec((2 * H, 4 * H), const2),    # [W_ih2;W_hh2]
                pl.BlockSpec((1, 4 * H), const2),        # b2
                pl.BlockSpec((H, F1), const2),           # fc1 w
                pl.BlockSpec((1, F1), const2),           # fc1 b
                pl.BlockSpec((F1, C), const2),           # fc w
                pl.BlockSpec((1, C), const2),            # fc b
            ],
            out_specs=pl.BlockSpec((B_pad, C), const2),
            scratch_shapes=[
                pltpu.VMEM((chunk * B_pad, 4 * H), jnp.float32),  # gx chunk
                pltpu.VMEM((B_pad, H), jnp.bfloat16),             # h0
                pltpu.VMEM((B_pad, H), jnp.float32),              # c0
                pltpu.VMEM((B_pad, H), jnp.bfloat16),             # h1
                pltpu.VMEM((B_pad, H), jnp.float32),              # c1
                pltpu.VMEM((B_pad, H), jnp.bfloat16),             # h2
                pltpu.VMEM((B_pad, H), jnp.float32),              # c2
            ]),
        compiler_params=pltpu.CompilerParams(
            dimension_semantics=("arbitrary",),          # true recurrence
            vmem_limit_bytes=32 * 1024 * 1024),
    )(x_flat, params["lstm0_wih"], params["lstm0_b"], params["lstm0_whh"],
      w1, params["lstm1_b"], w2, params["lstm2_b"],
      params["fc1_w"], params["fc1_b"], params["fc_w"], params["fc_b"])

    return out[:B]


# =============================================================================
# Params (gate columns packed (i, f, o, g); weights stored transposed vs torch
# and cast to bf16; biases = b_ih + b_hh kept in f32).
# To load real torch.nn.LSTM weights, transpose (4H, Din)->(Din, 4H) and
# permute the torch (i, f, g, o) column groups to (i, f, o, g).
# =============================================================================
def init_params(key, *, input_size, hidden_size, fc1_dim, num_classes):
    H = hidden_size

    def uni(k, shape, bound):
        return jax.random.uniform(k, shape, jnp.float32, -bound, bound)

    bound = 1.0 / float(H) ** 0.5
    params = {}
    for layer in range(3):
        din = input_size if layer == 0 else H
        key, k1, k2, k3, k4 = jax.random.split(key, 5)
        params[f"lstm{layer}_wih"] = uni(k1, (din, 4 * H), bound).astype(jnp.bfloat16)
        params[f"lstm{layer}_whh"] = uni(k2, (H, 4 * H), bound).astype(jnp.bfloat16)
        b = uni(k3, (4 * H,), bound) + uni(k4, (4 * H,), bound)
        params[f"lstm{layer}_b"] = b[None, :]
    key, k1, k2, k3, k4 = jax.random.split(key, 5)
    b1 = 1.0 / float(H) ** 0.5
    params["fc1_w"] = uni(k1, (H, fc1_dim), b1).astype(jnp.bfloat16)
    params["fc1_b"] = uni(k2, (1, fc1_dim), b1)
    b2 = 1.0 / float(fc1_dim) ** 0.5
    params["fc_w"] = uni(k3, (fc1_dim, num_classes), b2).astype(jnp.bfloat16)
    params["fc_b"] = uni(k4, (1, num_classes), b2)
    return params


# Pure-JAX reference (same bf16-operand / f32-accumulate convention).
def lstm1_reference(x_btd, params, *, hidden_size):
    H = hidden_size
    B, T, _ = x_btd.shape

    def bdot(a, w):
        return jnp.dot(a.astype(jnp.bfloat16), w, preferred_element_type=jnp.float32)

    def cell(gates, c):
        i = jax.nn.sigmoid(gates[:, 0 * H:1 * H])
        f = jax.nn.sigmoid(gates[:, 1 * H:2 * H])
        o = jax.nn.sigmoid(gates[:, 2 * H:3 * H])
        g = jnp.tanh(gates[:, 3 * H:4 * H])
        c_new = f * c + i * g
        return o * jnp.tanh(c_new), c_new

    seq = jnp.transpose(x_btd.astype(jnp.float32), (1, 0, 2))   # (T, B, Din)
    for layer in range(3):
        wih = params[f"lstm{layer}_wih"]
        whh = params[f"lstm{layer}_whh"]
        b = params[f"lstm{layer}_b"]
        h = jnp.zeros((B, H), jnp.float32)
        c = jnp.zeros((B, H), jnp.float32)
        outs = []
        for t in range(T):
            gates = bdot(seq[t], wih) + bdot(h, whh) + b
            h, c = cell(gates, c)
            outs.append(h)
        seq = jnp.stack(outs, axis=0)
    z = jnp.maximum(seq[-1], 0.0)
    z = jnp.maximum(bdot(z, params["fc1_w"]) + params["fc1_b"], 0.0)
    return bdot(z, params["fc_w"]) + params["fc_b"]


if __name__ == "__main__":
    # Small shapes consistent with the module (input_size=18, 3 layers,
    # fc1=128, num_classes=1; hidden shrunk to 32 for the smoke test).
    B, T = 4, 8
    INPUT_SIZE, HIDDEN, FC1, CLASSES = 18, 32, 128, 1

    key = jax.random.PRNGKey(0)
    kx, kp = jax.random.split(key)
    x = jax.random.normal(kx, (B, T, INPUT_SIZE), dtype=jnp.float32)
    params = init_params(kp, input_size=INPUT_SIZE, hidden_size=HIDDEN,
                         fc1_dim=FC1, num_classes=CLASSES)

    out = jax.block_until_ready(lstm1_forward(x, params, hidden_size=HIDDEN))
    assert out.shape == (B, CLASSES)
    assert bool(jnp.all(jnp.isfinite(out)))

    ref = jax.block_until_ready(lstm1_reference(x, params, hidden_size=HIDDEN))
    assert bool(jnp.allclose(out, ref, atol=2e-2, rtol=2e-2)), (out, ref)

    print("KERNEL_OK")
</pallas_src>

<mosaic_0001>
module attributes {stable_mosaic.version = 11 : i64} {
  func.func @_fused_lstm_kernel(%arg0: i32, %arg1: memref<64x18xbf16, #tpu.memory_space<vmem>>, %arg2: memref<18x128xbf16, #tpu.memory_space<vmem>>, %arg3: memref<1x128xf32, #tpu.memory_space<vmem>>, %arg4: memref<32x128xbf16, #tpu.memory_space<vmem>>, %arg5: memref<64x128xbf16, #tpu.memory_space<vmem>>, %arg6: memref<1x128xf32, #tpu.memory_space<vmem>>, %arg7: memref<64x128xbf16, #tpu.memory_space<vmem>>, %arg8: memref<1x128xf32, #tpu.memory_space<vmem>>, %arg9: memref<32x128xbf16, #tpu.memory_space<vmem>>, %arg10: memref<1x128xf32, #tpu.memory_space<vmem>>, %arg11: memref<128x1xbf16, #tpu.memory_space<vmem>>, %arg12: memref<1x1xf32, #tpu.memory_space<vmem>>, %arg13: memref<8x1xf32, #tpu.memory_space<vmem>>, %arg14: memref<64x128xf32, #tpu.memory_space<vmem>>, %arg15: memref<8x32xbf16, #tpu.memory_space<vmem>>, %arg16: memref<8x32xf32, #tpu.memory_space<vmem>>, %arg17: memref<8x32xbf16, #tpu.memory_space<vmem>>, %arg18: memref<8x32xf32, #tpu.memory_space<vmem>>, %arg19: memref<8x32xbf16, #tpu.memory_space<vmem>>, %arg20: memref<8x32xf32, #tpu.memory_space<vmem>>) attributes {dimension_semantics = [#tpu.dimension_semantics<arbitrary>], iteration_bounds = array<i64: 1>, scalar_prefetch = 0 : i64, scratch_operands = 7 : i64, tpu.core_type = #tpu.core_type<tc>, window_params = [{transform_indices = @transform_0, window_bounds = array<i64: 64, 18>}, {pipeline_mode = #tpu.pipeline_mode<synchronous>, transform_indices = @transform_1, window_bounds = array<i64: 18, 128>}, {pipeline_mode = #tpu.pipeline_mode<synchronous>, transform_indices = @transform_2, window_bounds = array<i64: 1, 128>}, {pipeline_mode = #tpu.pipeline_mode<synchronous>, transform_indices = @transform_3, window_bounds = array<i64: 32, 128>}, {pipeline_mode = #tpu.pipeline_mode<synchronous>, transform_indices = @transform_4, window_bounds = array<i64: 64, 128>}, {pipeline_mode = #tpu.pipeline_mode<synchronous>, transform_indices = @transform_5, window_bounds = array<i64: 1, 128>}, {pipeline_mode = #tpu.pipeline_mode<synchronous>, transform_indices = @transform_6, window_bounds = array<i64: 64, 128>}, {pipeline_mode = #tpu.pipeline_mode<synchronous>, transform_indices = @transform_7, window_bounds = array<i64: 1, 128>}, {pipeline_mode = #tpu.pipeline_mode<synchronous>, transform_indices = @transform_8, window_bounds = array<i64: 32, 128>}, {pipeline_mode = #tpu.pipeline_mode<synchronous>, transform_indices = @transform_9, window_bounds = array<i64: 1, 128>}, {pipeline_mode = #tpu.pipeline_mode<synchronous>, transform_indices = @transform_10, window_bounds = array<i64: 128, 1>}, {pipeline_mode = #tpu.pipeline_mode<synchronous>, transform_indices = @transform_11, window_bounds = array<i64: 1, 1>}, {pipeline_mode = #tpu.pipeline_mode<synchronous>, transform_indices = @transform_12, window_bounds = array<i64: 8, 1>}]} {
    %c0_i32 = arith.constant 0 : i32
    %0 = arith.cmpi eq, %arg0, %c0_i32 : i32
    %1 = arith.extui %0 : i1 to i32
    %c0_i32_0 = arith.constant 0 : i32
    %2 = arith.cmpi ne, %1, %c0_i32_0 : i32
    scf.if %2 {
      %cst_441 = arith.constant 0.000000e+00 : bf16
      %838 = vector.broadcast %cst_441 : bf16 to vector<8x32xbf16>
      %c0_442 = arith.constant 0 : index
      %c0_443 = arith.constant 0 : index
      %839 = vector.load %arg15[%c0_442, %c0_443] : memref<8x32xbf16, #tpu.memory_space<vmem>>, vector<8x32xbf16>
      tpu.vector_store %arg15[%c0_442, %c0_443], %838 {strides = array<i32>} : memref<8x32xbf16, #tpu.memory_space<vmem>>, vector<8x32xbf16>,
      %cst_444 = arith.constant 0.000000e+00 : bf16
      %840 = vector.broadcast %cst_444 : bf16 to vector<8x32xbf16>
      %c0_445 = arith.constant 0 : index
      %c0_446 = arith.constant 0 : index
      %841 = vector.load %arg17[%c0_445, %c0_446] : memref<8x32xbf16, #tpu.memory_space<vmem>>, vector<8x32xbf16>
      tpu.vector_store %arg17[%c0_445, %c0_446], %840 {strides = array<i32>} : memref<8x32xbf16, #tpu.memory_space<vmem>>, vector<8x32xbf16>,
      %cst_447 = arith.constant 0.000000e+00 : bf16
      %842 = vector.broadcast %cst_447 : bf16 to vector<8x32xbf16>
      %c0_448 = arith.constant 0 : index
      %c0_449 = arith.constant 0 : index
      %843 = vector.load %arg19[%c0_448, %c0_449] : memref<8x32xbf16, #tpu.memory_space<vmem>>, vector<8x32xbf16>
      tpu.vector_store %arg19[%c0_448, %c0_449], %842 {strides = array<i32>} : memref<8x32xbf16, #tpu.memory_space<vmem>>, vector<8x32xbf16>,
      %cst_450 = arith.constant 0.000000e+00 : f32
      %844 = vector.broadcast %cst_450 : f32 to vector<8x32xf32>
      %c0_451 = arith.constant 0 : index
      %c0_452 = arith.constant 0 : index
      %845 = vector.load %arg16[%c0_451, %c0_452] : memref<8x32xf32, #tpu.memory_space<vmem>>, vector<8x32xf32>
      tpu.vector_store %arg16[%c0_451, %c0_452], %844 {strides = array<i32>} : memref<8x32xf32, #tpu.memory_space<vmem>>, vector<8x32xf32>,
      %cst_453 = arith.constant 0.000000e+00 : f32
      %846 = vector.broadcast %cst_453 : f32 to vector<8x32xf32>
      %c0_454 = arith.constant 0 : index
      %c0_455 = arith.constant 0 : index
      %847 = vector.load %arg18[%c0_454, %c0_455] : memref<8x32xf32, #tpu.memory_space<vmem>>, vector<8x32xf32>
      tpu.vector_store %arg18[%c0_454, %c0_455], %846 {strides = array<i32>} : memref<8x32xf32, #tpu.memory_space<vmem>>, vector<8x32xf32>,
      %cst_456 = arith.constant 0.000000e+00 : f32
      %848 = vector.broadcast %cst_456 : f32 to vector<8x32xf32>
      %c0_457 = arith.constant 0 : index
      %c0_458 = arith.constant 0 : index
      %849 = vector.load %arg20[%c0_457, %c0_458] : memref<8x32xf32, #tpu.memory_space<vmem>>, vector<8x32xf32>
      tpu.vector_store %arg20[%c0_457, %c0_458], %848 {strides = array<i32>} : memref<8x32xf32, #tpu.memory_space<vmem>>, vector<8x32xf32>,
    } else {
    }
    %c0 = arith.constant 0 : index
    %c0_1 = arith.constant 0 : index
    %3 = vector.load %arg1[%c0, %c0_1] : memref<64x18xbf16, #tpu.memory_space<vmem>>, vector<64x18xbf16>
    %c0_2 = arith.constant 0 : index
    %c0_3 = arith.constant 0 : index
    %4 = vector.load %arg2[%c0_2, %c0_3] : memref<18x128xbf16, #tpu.memory_space<vmem>>, vector<18x128xbf16>
    %cst = arith.constant dense<0.000000e+00> : vector<64x128xf32>
    %5 = tpu.matmul %3, %4, %cst {dimension_numbers = #tpu.dot_dimension_numbers<[1], [0], [0], [1], [0, 0, 1, 1], [], []>} : vector<64x18xbf16>, vector<18x128xbf16>, vector<64x128xf32> -> vector<64x128xf32>
    %c0_4 = arith.constant 0 : index
    %c0_5 = arith.constant 0 : index
    %6 = vector.load %arg3[%c0_4, %c0_5] : memref<1x128xf32, #tpu.memory_space<vmem>>, vector<1x128xf32>
    %7 = vector.broadcast %6 : vector<1x128xf32> to vector<64x128xf32>
    %8 = arith.addf %5, %7 : vector<64x128xf32>
    %c0_6 = arith.constant 0 : index
    %c0_7 = arith.constant 0 : index
    %9 = vector.load %arg14[%c0_6, %c0_7] : memref<64x128xf32, #tpu.memory_space<vmem>>, vector<64x128xf32>
    tpu.vector_store %arg14[%c0_6, %c0_7], %8 {strides = array<i32>} : memref<64x128xf32, #tpu.memory_space<vmem>>, vector<64x128xf32>,
    %c0_8 = arith.constant 0 : index
    %c0_9 = arith.constant 0 : index
    %10 = vector.load %arg6[%c0_8, %c0_9] : memref<1x128xf32, #tpu.memory_space<vmem>>, vector<1x128xf32>
    %11 = vector.shape_cast %10 : vector<1x128xf32> to vector<1x128xf32>
    %12 = vector.broadcast %11 : vector<1x128xf32> to vector<8x128xf32>
    %c0_10 = arith.constant 0 : index
    %c0_11 = arith.constant 0 : index
    %13 = vector.load %arg8[%c0_10, %c0_11] : memref<1x128xf32, #tpu.memory_space<vmem>>, vector<1x128xf32>
    %14 = vector.shape_cast %13 : vector<1x128xf32> to vector<1x128xf32>
    %15 = vector.broadcast %14 : vector<1x128xf32> to vector<8x128xf32>
    %cst_12 = arith.constant 5.000000e-01 : f32
    %16 = vector.broadcast %cst_12 : f32 to vector<1x96xf32>
    %cst_13 = arith.constant 1.000000e+00 : f32
    %17 = vector.broadcast %cst_13 : f32 to vector<1x32xf32>
    %18 = tpu.concatenate %16, %17 in 1 : vector<1x96xf32>, vector<1x32xf32> -> vector<1x128xf32>
    %c0_i32_14 = arith.constant 0 : i32
    %c8_i32 = arith.constant 8 : i32
    %19 = arith.muli %c0_i32_14, %c8_i32 : i32
    %20 = tpu.assume_multiple %19, 8 : i32
    %21 = arith.index_cast %20 : i32 to index
    %c0_15 = arith.constant 0 : index
    %22 = vector.load %arg14[%21, %c0_15] : memref<64x128xf32, #tpu.memory_space<vmem>>, vector<8x128xf32>
    %c0_16 = arith.constant 0 : index
    %c0_17 = arith.constant 0 : index
    %23 = vector.load %arg15[%c0_16, %c0_17] : memref<8x32xbf16, #tpu.memory_space<vmem>>, vector<8x32xbf16>
    %c0_18 = arith.constant 0 : index
    %c0_19 = arith.constant 0 : index
    %24 = vector.load %arg4[%c0_18, %c0_19] : memref<32x128xbf16, #tpu.memory_space<vmem>>, vector<32x128xbf16>
    %cst_20 = arith.constant dense<0.000000e+00> : vector<8x128xf32>
    %25 = tpu.matmul %23, %24, %cst_20 {dimension_numbers = #tpu.dot_dimension_numbers<[1], [0], [0], [1], [0, 0, 1, 1], [], []>} : vector<8x32xbf16>, vector<32x128xbf16>, vector<8x128xf32> -> vector<8x128xf32>
    %26 = arith.addf %22, %25 : vector<8x128xf32>
    %c0_21 = arith.constant 0 : index
    %c0_22 = arith.constant 0 : index
    %27 = vector.load %arg16[%c0_21, %c0_22] : memref<8x32xf32, #tpu.memory_space<vmem>>, vector<8x32xf32>
    %28 = vector.broadcast %18 : vector<1x128xf32> to vector<8x128xf32>
    %29 = arith.mulf %26, %28 : vector<8x128xf32>
    %30 = math.tanh %29 : vector<8x128xf32>
    %31 = vector.extract_strided_slice %30 {offsets = [0, 0], sizes = [8, 32], strides = [1, 1]} : vector<8x128xf32> to vector<8x32xf32>
    %cst_23 = arith.constant 5.000000e-01 : f32
    %32 = vector.broadcast %cst_23 : f32 to vector<8x32xf32>
    %33 = arith.mulf %31, %32 : vector<8x32xf32>
    %cst_24 = arith.constant 5.000000e-01 : f32
    %34 = vector.broadcast %cst_24 : f32 to vector<8x32xf32>
    %35 = arith.addf %33, %34 : vector<8x32xf32>
    %36 = vector.extract_strided_slice %30 {offsets = [0, 32], sizes = [8, 32], strides = [1, 1]} : vector<8x128xf32> to vector<8x32xf32>
    %cst_25 = arith.constant 5.000000e-01 : f32
    %37 = vector.broadcast %cst_25 : f32 to vector<8x32xf32>
    %38 = arith.mulf %36, %37 : vector<8x32xf32>
    %cst_26 = arith.constant 5.000000e-01 : f32
    %39 = vector.broadcast %cst_26 : f32 to vector<8x32xf32>
    %40 = arith.addf %38, %39 : vector<8x32xf32>
    %41 = vector.extract_strided_slice %30 {offsets = [0, 64], sizes = [8, 32], strides = [1, 1]} : vector<8x128xf32> to vector<8x32xf32>
    %cst_27 = arith.constant 5.000000e-01 : f32
    %42 = vector.broadcast %cst_27 : f32 to vector<8x32xf32>
    %43 = arith.mulf %41, %42 : vector<8x32xf32>
    %cst_28 = arith.constant 5.000000e-01 : f32
    %44 = vector.broadcast %cst_28 : f32 to vector<8x32xf32>
    %45 = arith.addf %43, %44 : vector<8x32xf32>
    %46 = vector.extract_strided_slice %30 {offsets = [0, 96], sizes = [8, 32], strides = [1, 1]} : vector<8x128xf32> to vector<8x32xf32>
    %47 = arith.mulf %40, %27 : vector<8x32xf32>
    %48 = arith.mulf %35, %46 : vector<8x32xf32>
    %49 = arith.addf %47, %48 : vector<8x32xf32>
    %50 = math.tanh %49 : vector<8x32xf32>
    %51 = arith.mulf %45, %50 : vector<8x32xf32>
    %52 = arith.truncf %51 : vector<8x32xf32> to vector<8x32xbf16>
    %c0_29 = arith.constant 0 : index
    %c0_30 = arith.constant 0 : index
    %53 = vector.load %arg17[%c0_29, %c0_30] : memref<8x32xbf16, #tpu.memory_space<vmem>>, vector<8x32xbf16>
    %54 = tpu.concatenate %52, %53 in 1 : vector<8x32xbf16>, vector<8x32xbf16> -> vector<8x64xbf16>
    %c0_31 = arith.constant 0 : index
    %c0_32 = arith.constant 0 : index
    %55 = vector.load %arg5[%c0_31, %c0_32] : memref<64x128xbf16, #tpu.memory_space<vmem>>, vector<64x128xbf16>
    %cst_33 = arith.constant dense<0.000000e+00> : vector<8x128xf32>
    %56 = tpu.matmul %54, %55, %cst_33 {dimension_numbers = #tpu.dot_dimension_numbers<[1], [0], [0], [1], [0, 0, 1, 1], [], []>} : vector<8x64xbf16>, vector<64x128xbf16>, vector<8x128xf32> -> vector<8x128xf32>
    %57 = arith.addf %12, %56 : vector<8x128xf32>
    %c0_34 = arith.constant 0 : index
    %c0_35 = arith.constant 0 : index
    %58 = vector.load %arg18[%c0_34, %c0_35] : memref<8x32xf32, #tpu.memory_space<vmem>>, vector<8x32xf32>
    %59 = vector.broadcast %18 : vector<1x128xf32> to vector<8x128xf32>
    %60 = arith.mulf %57, %59 : vector<8x128xf32>
    %61 = math.tanh %60 : vector<8x128xf32>
    %62 = vector.extract_strided_slice %61 {offsets = [0, 0], sizes = [8, 32], strides = [1, 1]} : vector<8x128xf32> to vector<8x32xf32>
    %cst_36 = arith.constant 5.000000e-01 : f32
    %63 = vector.broadcast %cst_36 : f32 to vector<8x32xf32>
    %64 = arith.mulf %62, %63 : vector<8x32xf32>
    %cst_37 = arith.constant 5.000000e-01 : f32
    %65 = vector.broadcast %cst_37 : f32 to vector<8x32xf32>
    %66 = arith.addf %64, %65 : vector<8x32xf32>
    %67 = vector.extract_strided_slice %61 {offsets = [0, 32], sizes = [8, 32], strides = [1, 1]} : vector<8x128xf32> to vector<8x32xf32>
    %cst_38 = arith.constant 5.000000e-01 : f32
    %68 = vector.broadcast %cst_38 : f32 to vector<8x32xf32>
    %69 = arith.mulf %67, %68 : vector<8x32xf32>
    %cst_39 = arith.constant 5.000000e-01 : f32
    %70 = vector.broadcast %cst_39 : f32 to vector<8x32xf32>
    %71 = arith.addf %69, %70 : vector<8x32xf32>
    %72 = vector.extract_strided_slice %61 {offsets = [0, 64], sizes = [8, 32], strides = [1, 1]} : vector<8x128xf32> to vector<8x32xf32>
    %cst_40 = arith.constant 5.000000e-01 : f32
    %73 = vector.broadcast %cst_40 : f32 to vector<8x32xf32>
    %74 = arith.mulf %72, %73 : vector<8x32xf32>
    %cst_41 = arith.constant 5.000000e-01 : f32
    %75 = vector.broadcast %cst_41 : f32 to vector<8x32xf32>
    %76 = arith.addf %74, %75 : vector<8x32xf32>
    %77 = vector.extract_strided_slice %61 {offsets = [0, 96], sizes = [8, 32], strides = [1, 1]} : vector<8x128xf32> to vector<8x32xf32>
    %78 = arith.mulf %71, %58 : vector<8x32xf32>
    %79 = arith.mulf %66, %77 : vector<8x32xf32>
    %80 = arith.addf %78, %79 : vector<8x32xf32>
    %81 = math.tanh %80 : vector<8x32xf32>
    %82 = arith.mulf %76, %81 : vector<8x32xf32>
    %83 = arith.truncf %82 : vector<8x32xf32> to vector<8x32xbf16>
    %c0_42 = arith.constant 0 : index
    %c0_43 = arith.constant 0 : index
    %84 = vector.load %arg19[%c0_42, %c0_43] : memref<8x32xbf16, #tpu.memory_space<vmem>>, vector<8x32xbf16>
    %85 = tpu.concatenate %83, %84 in 1 : vector<8x32xbf16>, vector<8x32xbf16> -> vector<8x64xbf16>
    %c0_44 = arith.constant 0 : index
    %c0_45 = arith.constant 0 : index
    %86 = vector.load %arg7[%c0_44, %c0_45] : memref<64x128xbf16, #tpu.memory_space<vmem>>, vector<64x128xbf16>
    %cst_46 = arith.constant dense<0.000000e+00> : vector<8x128xf32>
    %87 = tpu.matmul %85, %86, %cst_46 {dimension_numbers = #tpu.dot_dimension_numbers<[1], [0], [0], [1], [0, 0, 1, 1], [], []>} : vector<8x64xbf16>, vector<64x128xbf16>, vector<8x128xf32> -> vector<8x128xf32>
    %88 = arith.addf %15, %87 : vector<8x128xf32>
    %c0_47 = arith.constant 0 : index
    %c0_48 = arith.constant 0 : index
    %89 = vector.load %arg20[%c0_47, %c0_48] : memref<8x32xf32, #tpu.memory_space<vmem>>, vector<8x32xf32>
    %90 = vector.broadcast %18 : vector<1x128xf32> to vector<8x128xf32>
    %91 = arith.mulf %88, %90 : vector<8x128xf32>
    %92 = math.tanh %91 : vector<8x128xf32>
    %93 = vector.extract_strided_slice %92 {offsets = [0, 0], sizes = [8, 32], strides = [1, 1]} : vector<8x128xf32> to vector<8x32xf32>
    %cst_49 = arith.constant 5.000000e-01 : f32
    %94 = vector.broadcast %cst_49 : f32 to vector<8x32xf32>
    %95 = arith.mulf %93, %94 : vector<8x32xf32>
    %cst_50 = arith.constant 5.000000e-01 : f32
    %96 = vector.broadcast %cst_50 : f32 to vector<8x32xf32>
    %97 = arith.addf %95, %96 : vector<8x32xf32>
    %98 = vector.extract_strided_slice %92 {offsets = [0, 32], sizes = [8, 32], strides = [1, 1]} : vector<8x128xf32> to vector<8x32xf32>
    %cst_51 = arith.constant 5.000000e-01 : f32
    %99 = vector.broadcast %cst_51 : f32 to vector<8x32xf32>
    %100 = arith.mulf %98, %99 : vector<8x32xf32>
    %cst_52 = arith.constant 5.000000e-01 : f32
    %101 = vector.broadcast %cst_52 : f32 to vector<8x32xf32>
    %102 = arith.addf %100, %101 : vector<8x32xf32>
    %103 = vector.extract_strided_slice %92 {offsets = [0, 64], sizes = [8, 32], strides = [1, 1]} : vector<8x128xf32> to vector<8x32xf32>
    %cst_53 = arith.constant 5.000000e-01 : f32
    %104 = vector.broadcast %cst_53 : f32 to vector<8x32xf32>
    %105 = arith.mulf %103, %104 : vector<8x32xf32>
    %cst_54 = arith.constant 5.000000e-01 : f32
    %106 = vector.broadcast %cst_54 : f32 to vector<8x32xf32>
    %107 = arith.addf %105, %106 : vector<8x32xf32>
    %108 = vector.extract_strided_slice %92 {offsets = [0, 96], sizes = [8, 32], strides = [1, 1]} : vector<8x128xf32> to vector<8x32xf32>
    %109 = arith.mulf %102, %89 : vector<8x32xf32>
    %110 = arith.mulf %97, %108 : vector<8x32xf32>
    %111 = arith.addf %109, %110 : vector<8x32xf32>
    %112 = math.tanh %111 : vector<8x32xf32>
    %113 = arith.mulf %107, %112 : vector<8x32xf32>
    %114 = arith.truncf %113 : vector<8x32xf32> to vector<8x32xbf16>
    %c0_55 = arith.constant 0 : index
    %c0_56 = arith.constant 0 : index
    %115 = vector.load %arg15[%c0_55, %c0_56] : memref<8x32xbf16, #tpu.memory_space<vmem>>, vector<8x32xbf16>
    tpu.vector_store %arg15[%c0_55, %c0_56], %52 {strides = array<i32>} : memref<8x32xbf16, #tpu.memory_space<vmem>>, vector<8x32xbf16>,
    %c0_57 = arith.constant 0 : index
    %c0_58 = arith.constant 0 : index
    %116 = vector.load %arg16[%c0_57, %c0_58] : memref<8x32xf32, #tpu.memory_space<vmem>>, vector<8x32xf32>
    tpu.vector_store %arg16[%c0_57, %c0_58], %49 {strides = array<i32>} : memref<8x32xf32, #tpu.memory_space<vmem>>, vector<8x32xf32>,
    %c0_59 = arith.constant 0 : index
    %c0_60 = arith.constant 0 : index
    %117 = vector.load %arg17[%c0_59, %c0_60] : memref<8x32xbf16, #tpu.memory_space<vmem>>, vector<8x32xbf16>
    tpu.vector_store %arg17[%c0_59, %c0_60], %83 {strides = array<i32>} : memref<8x32xbf16, #tpu.memory_space<vmem>>, vector<8x32xbf16>,
    %c0_61 = arith.constant 0 : index
    %c0_62 = arith.constant 0 : index
    %118 = vector.load %arg18[%c0_61, %c0_62] : memref<8x32xf32, #tpu.memory_space<vmem>>, vector<8x32xf32>
    tpu.vector_store %arg18[%c0_61, %c0_62], %80 {strides = array<i32>} : memref<8x32xf32, #tpu.memory_space<vmem>>, vector<8x32xf32>,
    %c0_63 = arith.constant 0 : index
    %c0_64 = arith.constant 0 : index
    %119 = vector.load %arg19[%c0_63, %c0_64] : memref<8x32xbf16, #tpu.memory_space<vmem>>, vector<8x32xbf16>
    tpu.vector_store %arg19[%c0_63, %c0_64], %114 {strides = array<i32>} : memref<8x32xbf16, #tpu.memory_space<vmem>>, vector<8x32xbf16>,
    %c0_65 = arith.constant 0 : index
    %c0_66 = arith.constant 0 : index
    %120 = vector.load %arg20[%c0_65, %c0_66] : memref<8x32xf32, #tpu.memory_space<vmem>>, vector<8x32xf32>
    tpu.vector_store %arg20[%c0_65, %c0_66], %111 {strides = array<i32>} : memref<8x32xf32, #tpu.memory_space<vmem>>, vector<8x32xf32>,
    %c1_i32 = arith.constant 1 : i32
    %c8_i32_67 = arith.constant 8 : i32
    %121 = arith.muli %c1_i32, %c8_i32_67 : i32
    %122 = tpu.assume_multiple %121, 8 : i32
    %123 = arith.index_cast %122 : i32 to index
    %c0_68 = arith.constant 0 : index
    %124 = vector.load %arg14[%123, %c0_68] : memref<64x128xf32, #tpu.memory_space<vmem>>, vector<8x128xf32>
    %c0_69 = arith.constant 0 : index
    %c0_70 = arith.constant 0 : index
    %125 = vector.load %arg15[%c0_69, %c0_70] : memref<8x32xbf16, #tpu.memory_space<vmem>>, vector<8x32xbf16>
    %c0_71 = arith.constant 0 : index
    %c0_72 = arith.constant 0 : index
    %126 = vector.load %arg4[%c0_71, %c0_72] : memref<32x128xbf16, #tpu.memory_space<vmem>>, vector<32x128xbf16>
    %cst_73 = arith.constant dense<0.000000e+00> : vector<8x128xf32>
    %127 = tpu.matmul %125, %126, %cst_73 {dimension_numbers = #tpu.dot_dimension_numbers<[1], [0], [0], [1], [0, 0, 1, 1], [], []>} : vector<8x32xbf16>, vector<32x128xbf16>, vector<8x128xf32> -> vector<8x128xf32>
    %128 = arith.addf %124, %127 : vector<8x128xf32>
    %c0_74 = arith.constant 0 : index
    %c0_75 = arith.constant 0 : index
    %129 = vector.load %arg16[%c0_74, %c0_75] : memref<8x32xf32, #tpu.memory_space<vmem>>, vector<8x32xf32>
    %130 = vector.broadcast %18 : vector<1x128xf32> to vector<8x128xf32>
    %131 = arith.mulf %128, %130 : vector<8x128xf32>
    %132 = math.tanh %131 : vector<8x128xf32>
    %133 = vector.extract_strided_slice %132 {offsets = [0, 0], sizes = [8, 32], strides = [1, 1]} : vector<8x128xf32> to vector<8x32xf32>
    %cst_76 = arith.constant 5.000000e-01 : f32
    %134 = vector.broadcast %cst_76 : f32 to vector<8x32xf32>
    %135 = arith.mulf %133, %134 : vector<8x32xf32>
    %cst_77 = arith.constant 5.000000e-01 : f32
    %136 = vector.broadcast %cst_77 : f32 to vector<8x32xf32>
    %137 = arith.addf %135, %136 : vector<8x32xf32>
    %138 = vector.extract_strided_slice %132 {offsets = [0, 32], sizes = [8, 32], strides = [1, 1]} : vector<8x128xf32> to vector<8x32xf32>
    %cst_78 = arith.constant 5.000000e-01 : f32
    %139 = vector.broadcast %cst_78 : f32 to vector<8x32xf32>
    %140 = arith.mulf %138, %139 : vector<8x32xf32>
    %cst_79 = arith.constant 5.000000e-01 : f32
    %141 = vector.broadcast %cst_79 : f32 to vector<8x32xf32>
    %142 = arith.addf %140, %141 : vector<8x32xf32>
    %143 = vector.extract_strided_slice %132 {offsets = [0, 64], sizes = [8, 32], strides = [1, 1]} : vector<8x128xf32> to vector<8x32xf32>
    %cst_80 = arith.constant 5.000000e-01 : f32
    %144 = vector.broadcast %cst_80 : f32 to vector<8x32xf32>
    %145 = arith.mulf %143, %144 : vector<8x32xf32>
    %cst_81 = arith.constant 5.000000e-01 : f32
    %146 = vector.broadcast %cst_81 : f32 to vector<8x32xf32>
    %147 = arith.addf %145, %146 : vector<8x32xf32>
    %148 = vector.extract_strided_slice %132 {offsets = [0, 96], sizes = [8, 32], strides = [1, 1]} : vector<8x128xf32> to vector<8x32xf32>
    %149 = arith.mulf %142, %129 : vector<8x32xf32>
    %150 = arith.mulf %137, %148 : vector<8x32xf32>
    %151 = arith.addf %149, %150 : vector<8x32xf32>
    %152 = math.tanh %151 : vector<8x32xf32>
    %153 = arith.mulf %147, %152 : vector<8x32xf32>
    %154 = arith.truncf %153 : vector<8x32xf32> to vector<8x32xbf16>
    %c0_82 = arith.constant 0 : index
    %c0_83 = arith.constant 0 : index
    %155 = vector.load %arg17[%c0_82, %c0_83] : memref<8x32xbf16, #tpu.memory_space<vmem>>, vector<8x32xbf16>
    %156 = tpu.concatenate %154, %155 in 1 : vector<8x32xbf16>, vector<8x32xbf16> -> vector<8x64xbf16>
    %c0_84 = arith.constant 0 : index
    %c0_85 = arith.constant 0 : index
    %157 = vector.load %arg5[%c0_84, %c0_85] : memref<64x128xbf16, #tpu.memory_space<vmem>>, vector<64x128xbf16>
    %cst_86 = arith.constant dense<0.000000e+00> : vector<8x128xf32>
    %158 = tpu.matmul %156, %157, %cst_86 {dimension_numbers = #tpu.dot_dimension_numbers<[1], [0], [0], [1], [0, 0, 1, 1], [], []>} : vector<8x64xbf16>, vector<64x128xbf16>, vector<8x128xf32> -> vector<8x128xf32>
    %159 = arith.addf %12, %158 : vector<8x128xf32>
    %c0_87 = arith.constant 0 : index
    %c0_88 = arith.constant 0 : index
    %160 = vector.load %arg18[%c0_87, %c0_88] : memref<8x32xf32, #tpu.memory_space<vmem>>, vector<8x32xf32>
    %161 = vector.broadcast %18 : vector<1x128xf32> to vector<8x128xf32>
    %162 = arith.mulf %159, %161 : vector<8x128xf32>
    %163 = math.tanh %162 : vector<8x128xf32>
    %164 = vector.extract_strided_slice %163 {offsets = [0, 0], sizes = [8, 32], strides = [1, 1]} : vector<8x128xf32> to vector<8x32xf32>
    %cst_89 = arith.constant 5.000000e-01 : f32
    %165 = vector.broadcast %cst_89 : f32 to vector<8x32xf32>
    %166 = arith.mulf %164, %165 : vector<8x32xf32>
    %cst_90 = arith.constant 5.000000e-01 : f32
    %167 = vector.broadcast %cst_90 : f32 to vector<8x32xf32>
    %168 = arith.addf %166, %167 : vector<8x32xf32>
    %169 = vector.extract_strided_slice %163 {offsets = [0, 32], sizes = [8, 32], strides = [1, 1]} : vector<8x128xf32> to vector<8x32xf32>
    %cst_91 = arith.constant 5.000000e-01 : f32
    %170 = vector.broadcast %cst_91 : f32 to vector<8x32xf32>
    %171 = arith.mulf %169, %170 : vector<8x32xf32>
    %cst_92 = arith.constant 5.000000e-01 : f32
    %172 = vector.broadcast %cst_92 : f32 to vector<8x32xf32>
    %173 = arith.addf %171, %172 : vector<8x32xf32>
    %174 = vector.extract_strided_slice %163 {offsets = [0, 64], sizes = [8, 32], strides = [1, 1]} : vector<8x128xf32> to vector<8x32xf32>
    %cst_93 = arith.constant 5.000000e-01 : f32
    %175 = vector.broadcast %cst_93 : f32 to vector<8x32xf32>
    %176 = arith.mulf %174, %175 : vector<8x32xf32>
    %cst_94 = arith.constant 5.000000e-01 : f32
    %177 = vector.broadcast %cst_94 : f32 to vector<8x32xf32>
    %178 = arith.addf %176, %177 : vector<8x32xf32>
    %179 = vector.extract_strided_slice %163 {offsets = [0, 96], sizes = [8, 32], strides = [1, 1]} : vector<8x128xf32> to vector<8x32xf32>
    %180 = arith.mulf %173, %160 : vector<8x32xf32>
    %181 = arith.mulf %168, %179 : vector<8x32xf32>
    %182 = arith.addf %180, %181 : vector<8x32xf32>
    %183 = math.tanh %182 : vector<8x32xf32>
    %184 = arith.mulf %178, %183 : vector<8x32xf32>
    %185 = arith.truncf %184 : vector<8x32xf32> to vector<8x32xbf16>
    %c0_95 = arith.constant 0 : index
    %c0_96 = arith.constant 0 : index
    %186 = vector.load %arg19[%c0_95, %c0_96] : memref<8x32xbf16, #tpu.memory_space<vmem>>, vector<8x32xbf16>
    %187 = tpu.concatenate %185, %186 in 1 : vector<8x32xbf16>, vector<8x32xbf16> -> vector<8x64xbf16>
    %c0_97 = arith.constant 0 : index
    %c0_98 = arith.constant 0 : index
    %188 = vector.load %arg7[%c0_97, %c0_98] : memref<64x128xbf16, #tpu.memory_space<vmem>>, vector<64x128xbf16>
    %cst_99 = arith.constant dense<0.000000e+00> : vector<8x128xf32>
    %189 = tpu.matmul %187, %188, %cst_99 {dimension_numbers = #tpu.dot_dimension_numbers<[1], [0], [0], [1], [0, 0, 1, 1], [], []>} : vector<8x64xbf16>, vector<64x128xbf16>, vector<8x128xf32> -> vector<8x128xf32>
    %190 = arith.addf %15, %189 : vector<8x128xf32>
    %c0_100 = arith.constant 0 : index
    %c0_101 = arith.constant 0 : index
    %191 = vector.load %arg20[%c0_100, %c0_101] : memref<8x32xf32, #tpu.memory_space<vmem>>, vector<8x32xf32>
    %192 = vector.broadcast %18 : vector<1x128xf32> to vector<8x128xf32>
    %193 = arith.mulf %190, %192 : vector<8x128xf32>
    %194 = math.tanh %193 : vector<8x128xf32>
    %195 = vector.extract_strided_slice %194 {offsets = [0, 0], sizes = [8, 32], strides = [1, 1]} : vector<8x128xf32> to vector<8x32xf32>
    %cst_102 = arith.constant 5.000000e-01 : f32
    %196 = vector.broadcast %cst_102 : f32 to vector<8x32xf32>
    %197 = arith.mulf %195, %196 : vector<8x32xf32>
    %cst_103 = arith.constant 5.000000e-01 : f32
    %198 = vector.broadcast %cst_103 : f32 to vector<8x32xf32>
    %199 = arith.addf %197, %198 : vector<8x32xf32>
    %200 = vector.extract_strided_slice %194 {offsets = [0, 32], sizes = [8, 32], strides = [1, 1]} : vector<8x128xf32> to vector<8x32xf32>
    %cst_104 = arith.constant 5.000000e-01 : f32
    %201 = vector.broadcast %cst_104 : f32 to vector<8x32xf32>
    %202 = arith.mulf %200, %201 : vector<8x32xf32>
    %cst_105 = arith.constant 5.000000e-01 : f32
    %203 = vector.broadcast %cst_105 : f32 to vector<8x32xf32>
    %204 = arith.addf %202, %203 : vector<8x32xf32>
    %205 = vector.extract_strided_slice %194 {offsets = [0, 64], sizes = [8, 32], strides = [1, 1]} : vector<8x128xf32> to vector<8x32xf32>
    %cst_106 = arith.constant 5.000000e-01 : f32
    %206 = vector.broadcast %cst_106 : f32 to vector<8x32xf32>
    %207 = arith.mulf %205, %206 : vector<8x32xf32>
    %cst_107 = arith.constant 5.000000e-01 : f32
    %208 = vector.broadcast %cst_107 : f32 to vector<8x32xf32>
    %209 = arith.addf %207, %208 : vector<8x32xf32>
    %210 = vector.extract_strided_slice %194 {offsets = [0, 96], sizes = [8, 32], strides = [1, 1]} : vector<8x128xf32> to vector<8x32xf32>
    %211 = arith.mulf %204, %191 : vector<8x32xf32>
    %212 = arith.mulf %199, %210 : vector<8x32xf32>
    %213 = arith.addf %211, %212 : vector<8x32xf32>
    %214 = math.tanh %213 : vector<8x32xf32>
    %215 = arith.mulf %209, %214 : vector<8x32xf32>
    %216 = arith.truncf %215 : vector<8x32xf32> to vector<8x32xbf16>
    %c0_108 = arith.constant 0 : index
    %c0_109 = arith.constant 0 : index
    %217 = vector.load %arg15[%c0_108, %c0_109] : memref<8x32xbf16, #tpu.memory_space<vmem>>, vector<8x32xbf16>
    tpu.vector_store %arg15[%c0_108, %c0_109], %154 {strides = array<i32>} : memref<8x32xbf16, #tpu.memory_space<vmem>>, vector<8x32xbf16>,
    %c0_110 = arith.constant 0 : index
    %c0_111 = arith.constant 0 : index
    %218 = vector.load %arg16[%c0_110, %c0_111] : memref<8x32xf32, #tpu.memory_space<vmem>>, vector<8x32xf32>
    tpu.vector_store %arg16[%c0_110, %c0_111], %151 {strides = array<i32>} : memref<8x32xf32, #tpu.memory_space<vmem>>, vector<8x32xf32>,
    %c0_112 = arith.constant 0 : index
    %c0_113 = arith.constant 0 : index
    %219 = vector.load %arg17[%c0_112, %c0_113] : memref<8x32xbf16, #tpu.memory_space<vmem>>, vector<8x32xbf16>
    tpu.vector_store %arg17[%c0_112, %c0_113], %185 {strides = array<i32>} : memref<8x32xbf16, #tpu.memory_space<vmem>>, vector<8x32xbf16>,
    %c0_114 = arith.constant 0 : index
    %c0_115 = arith.constant 0 : index
    %220 = vector.load %arg18[%c0_114, %c0_115] : memref<8x32xf32, #tpu.memory_space<vmem>>, vector<8x32xf32>
    tpu.vector_store %arg18[%c0_114, %c0_115], %182 {strides = array<i32>} : memref<8x32xf32, #tpu.memory_space<vmem>>, vector<8x32xf32>,
    %c0_116 = arith.constant 0 : index
    %c0_117 = arith.constant 0 : index
    %221 = vector.load %arg19[%c0_116, %c0_117] : memref<8x32xbf16, #tpu.memory_space<vmem>>, vector<8x32xbf16>
    tpu.vector_store %arg19[%c0_116, %c0_117], %216 {strides = array<i32>} : memref<8x32xbf16, #tpu.memory_space<vmem>>, vector<8x32xbf16>,
    %c0_118 = arith.constant 0 : index
    %c0_119 = arith.constant 0 : index
    %222 = vector.load %arg20[%c0_118, %c0_119] : memref<8x32xf32, #tpu.memory_space<vmem>>, vector<8x32xf32>
    tpu.vector_store %arg20[%c0_118, %c0_119], %213 {strides = array<i32>} : memref<8x32xf32, #tpu.memory_space<vmem>>, vector<8x32xf32>,
    %c2_i32 = arith.constant 2 : i32
    %c8_i32_120 = arith.constant 8 : i32
    %223 = arith.muli %c2_i32, %c8_i32_120 : i32
    %224 = tpu.assume_multiple %223, 8 : i32
    %225 = arith.index_cast %224 : i32 to index
    %c0_121 = arith.constant 0 : index
    %226 = vector.load %arg14[%225, %c0_121] : memref<64x128xf32, #tpu.memory_space<vmem>>, vector<8x128xf32>
    %c0_122 = arith.constant 0 : index
    %c0_123 = arith.constant 0 : index
    %227 = vector.load %arg15[%c0_122, %c0_123] : memref<8x32xbf16, #tpu.memory_space<vmem>>, vector<8x32xbf16>
    %c0_124 = arith.constant 0 : index
    %c0_125 = arith.constant 0 : index
    %228 = vector.load %arg4[%c0_124, %c0_125] : memref<32x128xbf16, #tpu.memory_space<vmem>>, vector<32x128xbf16>
    %cst_126 = arith.constant dense<0.000000e+00> : vector<8x128xf32>
    %229 = tpu.matmul %227, %228, %cst_126 {dimension_numbers = #tpu.dot_dimension_numbers<[1], [0], [0], [1], [0, 0, 1, 1], [], []>} : vector<8x32xbf16>, vector<32x128xbf16>, vector<8x128xf32> -> vector<8x128xf32>
    %230 = arith.addf %226, %229 : vector<8x128xf32>
    %c0_127 = arith.constant 0 : index
    %c0_128 = arith.constant 0 : index
    %231 = vector.load %arg16[%c0_127, %c0_128] : memref<8x32xf32, #tpu.memory_space<vmem>>, vector<8x32xf32>
    %232 = vector.broadcast %18 : vector<1x128xf32> to vector<8x128xf32>
    %233 = arith.mulf %230, %232 : vector<8x128xf32>
    %234 = math.tanh %233 : vector<8x128xf32>
    %235 = vector.extract_strided_slice %234 {offsets = [0, 0], sizes = [8, 32], strides = [1, 1]} : vector<8x128xf32> to vector<8x32xf32>
    %cst_129 = arith.constant 5.000000e-01 : f32
    %236 = vector.broadcast %cst_129 : f32 to vector<8x32xf32>
    %237 = arith.mulf %235, %236 : vector<8x32xf32>
    %cst_130 = arith.constant 5.000000e-01 : f32
    %238 = vector.broadcast %cst_130 : f32 to vector<8x32xf32>
    %239 = arith.addf %237, %238 : vector<8x32xf32>
    %240 = vector.extract_strided_slice %234 {offsets = [0, 32], sizes = [8, 32], strides = [1, 1]} : vector<8x128xf32> to vector<8x32xf32>
    %cst_131 = arith.constant 5.000000e-01 : f32
    %241 = vector.broadcast %cst_131 : f32 to vector<8x32xf32>
    %242 = arith.mulf %240, %241 : vector<8x32xf32>
    %cst_132 = arith.constant 5.000000e-01 : f32
    %243 = vector.broadcast %cst_132 : f32 to vector<8x32xf32>
    %244 = arith.addf %242, %243 : vector<8x32xf32>
    %245 = vector.extract_strided_slice %234 {offsets = [0, 64], sizes = [8, 32], strides = [1, 1]} : vector<8x128xf32> to vector<8x32xf32>
    %cst_133 = arith.constant 5.000000e-01 : f32
    %246 = vector.broadcast %cst_133 : f32 to vector<8x32xf32>
    %247 = arith.mulf %245, %246 : vector<8x32xf32>
    %cst_134 = arith.constant 5.000000e-01 : f32
    %248 = vector.broadcast %cst_134 : f32 to vector<8x32xf32>
    %249 = arith.addf %247, %248 : vector<8x32xf32>
    %250 = vector.extract_strided_slice %234 {offsets = [0, 96], sizes = [8, 32], strides = [1, 1]} : vector<8x128xf32> to vector<8x32xf32>
    %251 = arith.mulf %244, %231 : vector<8x32xf32>
    %252 = arith.mulf %239, %250 : vector<8x32xf32>
    %253 = arith.addf %251, %252 : vector<8x32xf32>
    %254 = math.tanh %253 : vector<8x32xf32>
    %255 = arith.mulf %249, %254 : vector<8x32xf32>
    %256 = arith.truncf %255 : vector<8x32xf32> to vector<8x32xbf16>
    %c0_135 = arith.constant 0 : index
    %c0_136 = arith.constant 0 : index
    %257 = vector.load %arg17[%c0_135, %c0_136] : memref<8x32xbf16, #tpu.memory_space<vmem>>, vector<8x32xbf16>
    %258 = tpu.concatenate %256, %257 in 1 : vector<8x32xbf16>, vector<8x32xbf16> -> vector<8x64xbf16>
    %c0_137 = arith.constant 0 : index
    %c0_138 = arith.constant 0 : index
    %259 = vector.load %arg5[%c0_137, %c0_138] : memref<64x128xbf16, #tpu.memory_space<vmem>>, vector<64x128xbf16>
    %cst_139 = arith.constant dense<0.000000e+00> : vector<8x128xf32>
    %260 = tpu.matmul %258, %259, %cst_139 {dimension_numbers = #tpu.dot_dimension_numbers<[1], [0], [0], [1], [0, 0, 1, 1], [], []>} : vector<8x64xbf16>, vector<64x128xbf16>, vector<8x128xf32> -> vector<8x128xf32>
    %261 = arith.addf %12, %260 : vector<8x128xf32>
    %c0_140 = arith.constant 0 : index
    %c0_141 = arith.constant 0 : index
    %262 = vector.load %arg18[%c0_140, %c0_141] : memref<8x32xf32, #tpu.memory_space<vmem>>, vector<8x32xf32>
    %263 = vector.broadcast %18 : vector<1x128xf32> to vector<8x128xf32>
    %264 = arith.mulf %261, %263 : vector<8x128xf32>
    %265 = math.tanh %264 : vector<8x128xf32>
    %266 = vector.extract_strided_slice %265 {offsets = [0, 0], sizes = [8, 32], strides = [1, 1]} : vector<8x128xf32> to vector<8x32xf32>
    %cst_142 = arith.constant 5.000000e-01 : f32
    %267 = vector.broadcast %cst_142 : f32 to vector<8x32xf32>
    %268 = arith.mulf %266, %267 : vector<8x32xf32>
    %cst_143 = arith.constant 5.000000e-01 : f32
    %269 = vector.broadcast %cst_143 : f32 to vector<8x32xf32>
    %270 = arith.addf %268, %269 : vector<8x32xf32>
    %271 = vector.extract_strided_slice %265 {offsets = [0, 32], sizes = [8, 32], strides = [1, 1]} : vector<8x128xf32> to vector<8x32xf32>
    %cst_144 = arith.constant 5.000000e-01 : f32
    %272 = vector.broadcast %cst_144 : f32 to vector<8x32xf32>
    %273 = arith.mulf %271, %272 : vector<8x32xf32>
    %cst_145 = arith.constant 5.000000e-01 : f32
    %274 = vector.broadcast %cst_145 : f32 to vector<8x32xf32>
    %275 = arith.addf %273, %274 : vector<8x32xf32>
    %276 = vector.extract_strided_slice %265 {offsets = [0, 64], sizes = [8, 32], strides = [1, 1]} : vector<8x128xf32> to vector<8x32xf32>
    %cst_146 = arith.constant 5.000000e-01 : f32
    %277 = vector.broadcast %cst_146 : f32 to vector<8x32xf32>
    %278 = arith.mulf %276, %277 : vector<8x32xf32>
    %cst_147 = arith.constant 5.000000e-01 : f32
    %279 = vector.broadcast %cst_147 : f32 to vector<8x32xf32>
    %280 = arith.addf %278, %279 : vector<8x32xf32>
    %281 = vector.extract_strided_slice %265 {offsets = [0, 96], sizes = [8, 32], strides = [1, 1]} : vector<8x128xf32> to vector<8x32xf32>
    %282 = arith.mulf %275, %262 : vector<8x32xf32>
    %283 = arith.mulf %270, %281 : vector<8x32xf32>
    %284 = arith.addf %282, %283 : vector<8x32xf32>
    %285 = math.tanh %284 : vector<8x32xf32>
    %286 = arith.mulf %280, %285 : vector<8x32xf32>
    %287 = arith.truncf %286 : vector<8x32xf32> to vector<8x32xbf16>
    %c0_148 = arith.constant 0 : index
    %c0_149 = arith.constant 0 : index
    %288 = vector.load %arg19[%c0_148, %c0_149] : memref<8x32xbf16, #tpu.memory_space<vmem>>, vector<8x32xbf16>
    %289 = tpu.concatenate %287, %288 in 1 : vector<8x32xbf16>, vector<8x32xbf16> -> vector<8x64xbf16>
    %c0_150 = arith.constant 0 : index
    %c0_151 = arith.constant 0 : index
    %290 = vector.load %arg7[%c0_150, %c0_151] : memref<64x128xbf16, #tpu.memory_space<vmem>>, vector<64x128xbf16>
    %cst_152 = arith.constant dense<0.000000e+00> : vector<8x128xf32>
    %291 = tpu.matmul %289, %290, %cst_152 {dimension_numbers = #tpu.dot_dimension_numbers<[1], [0], [0], [1], [0, 0, 1, 1], [], []>} : vector<8x64xbf16>, vector<64x128xbf16>, vector<8x128xf32> -> vector<8x128xf32>
    %292 = arith.addf %15, %291 : vector<8x128xf32>
    %c0_153 = arith.constant 0 : index
    %c0_154 = arith.constant 0 : index
    %293 = vector.load %arg20[%c0_153, %c0_154] : memref<8x32xf32, #tpu.memory_space<vmem>>, vector<8x32xf32>
    %294 = vector.broadcast %18 : vector<1x128xf32> to vector<8x128xf32>
    %295 = arith.mulf %292, %294 : vector<8x128xf32>
    %296 = math.tanh %295 : vector<8x128xf32>
    %297 = vector.extract_strided_slice %296 {offsets = [0, 0], sizes = [8, 32], strides = [1, 1]} : vector<8x128xf32> to vector<8x32xf32>
    %cst_155 = arith.constant 5.000000e-01 : f32
    %298 = vector.broadcast %cst_155 : f32 to vector<8x32xf32>
    %299 = arith.mulf %297, %298 : vector<8x32xf32>
    %cst_156 = arith.constant 5.000000e-01 : f32
    %300 = vector.broadcast %cst_156 : f32 to vector<8x32xf32>
    %301 = arith.addf %299, %300 : vector<8x32xf32>
    %302 = vector.extract_strided_slice %296 {offsets = [0, 32], sizes = [8, 32], strides = [1, 1]} : vector<8x128xf32> to vector<8x32xf32>
    %cst_157 = arith.constant 5.000000e-01 : f32
    %303 = vector.broadcast %cst_157 : f32 to vector<8x32xf32>
    %304 = arith.mulf %302, %303 : vector<8x32xf32>
    %cst_158 = arith.constant 5.000000e-01 : f32
    %305 = vector.broadcast %cst_158 : f32 to vector<8x32xf32>
    %306 = arith.addf %304, %305 : vector<8x32xf32>
    %307 = vector.extract_strided_slice %296 {offsets = [0, 64], sizes = [8, 32], strides = [1, 1]} : vector<8x128xf32> to vector<8x32xf32>
    %cst_159 = arith.constant 5.000000e-01 : f32
    %308 = vector.broadcast %cst_159 : f32 to vector<8x32xf32>
    %309 = arith.mulf %307, %308 : vector<8x32xf32>
    %cst_160 = arith.constant 5.000000e-01 : f32
    %310 = vector.broadcast %cst_160 : f32 to vector<8x32xf32>
    %311 = arith.addf %309, %310 : vector<8x32xf32>
    %312 = vector.extract_strided_slice %296 {offsets = [0, 96], sizes = [8, 32], strides = [1, 1]} : vector<8x128xf32> to vector<8x32xf32>
    %313 = arith.mulf %306, %293 : vector<8x32xf32>
    %314 = arith.mulf %301, %312 : vector<8x32xf32>
    %315 = arith.addf %313, %314 : vector<8x32xf32>
    %316 = math.tanh %315 : vector<8x32xf32>
    %317 = arith.mulf %311, %316 : vector<8x32xf32>
    %318 = arith.truncf %317 : vector<8x32xf32> to vector<8x32xbf16>
    %c0_161 = arith.constant 0 : index
    %c0_162 = arith.constant 0 : index
    %319 = vector.load %arg15[%c0_161, %c0_162] : memref<8x32xbf16, #tpu.memory_space<vmem>>, vector<8x32xbf16>
    tpu.vector_store %arg15[%c0_161, %c0_162], %256 {strides = array<i32>} : memref<8x32xbf16, #tpu.memory_space<vmem>>, vector<8x32xbf16>,
    %c0_163 = arith.constant 0 : index
    %c0_164 = arith.constant 0 : index
    %320 = vector.load %arg16[%c0_163, %c0_164] : memref<8x32xf32, #tpu.memory_space<vmem>>, vector<8x32xf32>
    tpu.vector_store %arg16[%c0_163, %c0_164], %253 {strides = array<i32>} : memref<8x32xf32, #tpu.memory_space<vmem>>, vector<8x32xf32>,
    %c0_165 = arith.constant 0 : index
    %c0_166 = arith.constant 0 : index
    %321 = vector.load %arg17[%c0_165, %c0_166] : memref<8x32xbf16, #tpu.memory_space<vmem>>, vector<8x32xbf16>
    tpu.vector_store %arg17[%c0_165, %c0_166], %287 {strides = array<i32>} : memref<8x32xbf16, #tpu.memory_space<vmem>>, vector<8x32xbf16>,
    %c0_167 = arith.constant 0 : index
    %c0_168 = arith.constant 0 : index
    %322 = vector.load %arg18[%c0_167, %c0_168] : memref<8x32xf32, #tpu.memory_space<vmem>>, vector<8x32xf32>
    tpu.vector_store %arg18[%c0_167, %c0_168], %284 {strides = array<i32>} : memref<8x32xf32, #tpu.memory_space<vmem>>, vector<8x32xf32>,
    %c0_169 = arith.constant 0 : index
    %c0_170 = arith.constant 0 : index
    %323 = vector.load %arg19[%c0_169, %c0_170] : memref<8x32xbf16, #tpu.memory_space<vmem>>, vector<8x32xbf16>
    tpu.vector_store %arg19[%c0_169, %c0_170], %318 {strides = array<i32>} : memref<8x32xbf16, #tpu.memory_space<vmem>>, vector<8x32xbf16>,
    %c0_171 = arith.constant 0 : index
    %c0_172 = arith.constant 0 : index
    %324 = vector.load %arg20[%c0_171, %c0_172] : memref<8x32xf32, #tpu.memory_space<vmem>>, vector<8x32xf32>
    tpu.vector_store %arg20[%c0_171, %c0_172], %315 {strides = array<i32>} : memref<8x32xf32, #tpu.memory_space<vmem>>, vector<8x32xf32>,
    %c3_i32 = arith.constant 3 : i32
    %c8_i32_173 = arith.constant 8 : i32
    %325 = arith.muli %c3_i32, %c8_i32_173 : i32
    %326 = tpu.assume_multiple %325, 8 : i32
    %327 = arith.index_cast %326 : i32 to index
    %c0_174 = arith.constant 0 : index
    %328 = vector.load %arg14[%327, %c0_174] : memref<64x128xf32, #tpu.memory_space<vmem>>, vector<8x128xf32>
    %c0_175 = arith.constant 0 : index
    %c0_176 = arith.constant 0 : index
    %329 = vector.load %arg15[%c0_175, %c0_176] : memref<8x32xbf16, #tpu.memory_space<vmem>>, vector<8x32xbf16>
    %c0_177 = arith.constant 0 : index
    %c0_178 = arith.constant 0 : index
    %330 = vector.load %arg4[%c0_177, %c0_178] : memref<32x128xbf16, #tpu.memory_space<vmem>>, vector<32x128xbf16>
    %cst_179 = arith.constant dense<0.000000e+00> : vector<8x128xf32>
    %331 = tpu.matmul %329, %330, %cst_179 {dimension_numbers = #tpu.dot_dimension_numbers<[1], [0], [0], [1], [0, 0, 1, 1], [], []>} : vector<8x32xbf16>, vector<32x128xbf16>, vector<8x128xf32> -> vector<8x128xf32>
    %332 = arith.addf %328, %331 : vector<8x128xf32>
    %c0_180 = arith.constant 0 : index
    %c0_181 = arith.constant 0 : index
    %333 = vector.load %arg16[%c0_180, %c0_181] : memref<8x32xf32, #tpu.memory_space<vmem>>, vector<8x32xf32>
    %334 = vector.broadcast %18 : vector<1x128xf32> to vector<8x128xf32>
    %335 = arith.mulf %332, %334 : vector<8x128xf32>
    %336 = math.tanh %335 : vector<8x128xf32>
    %337 = vector.extract_strided_slice %336 {offsets = [0, 0], sizes = [8, 32], strides = [1, 1]} : vector<8x128xf32> to vector<8x32xf32>
    %cst_182 = arith.constant 5.000000e-01 : f32
    %338 = vector.broadcast %cst_182 : f32 to vector<8x32xf32>
    %339 = arith.mulf %337, %338 : vector<8x32xf32>
    %cst_183 = arith.constant 5.000000e-01 : f32
    %340 = vector.broadcast %cst_183 : f32 to vector<8x32xf32>
    %341 = arith.addf %339, %340 : vector<8x32xf32>
    %342 = vector.extract_strided_slice %336 {offsets = [0, 32], sizes = [8, 32], strides = [1, 1]} : vector<8x128xf32> to vector<8x32xf32>
    %cst_184 = arith.constant 5.000000e-01 : f32
    %343 = vector.broadcast %cst_184 : f32 to vector<8x32xf32>
    %344 = arith.mulf %342, %343 : vector<8x32xf32>
    %cst_185 = arith.constant 5.000000e-01 : f32
    %345 = vector.broadcast %cst_185 : f32 to vector<8x32xf32>
    %346 = arith.addf %344, %345 : vector<8x32xf32>
    %347 = vector.extract_strided_slice %336 {offsets = [0, 64], sizes = [8, 32], strides = [1, 1]} : vector<8x128xf32> to vector<8x32xf32>
    %cst_186 = arith.constant 5.000000e-01 : f32
    %348 = vector.broadcast %cst_186 : f32 to vector<8x32xf32>
    %349 = arith.mulf %347, %348 : vector<8x32xf32>
    %cst_187 = arith.constant 5.000000e-01 : f32
    %350 = vector.broadcast %cst_187 : f32 to vector<8x32xf32>
    %351 = arith.addf %349, %350 : vector<8x32xf32>
    %352 = vector.extract_strided_slice %336 {offsets = [0, 96], sizes = [8, 32], strides = [1, 1]} : vector<8x128xf32> to vector<8x32xf32>
    %353 = arith.mulf %346, %333 : vector<8x32xf32>
    %354 = arith.mulf %341, %352 : vector<8x32xf32>
    %355 = arith.addf %353, %354 : vector<8x32xf32>
    %356 = math.tanh %355 : vector<8x32xf32>
    %357 = arith.mulf %351, %356 : vector<8x32xf32>
    %358 = arith.truncf %357 : vector<8x32xf32> to vector<8x32xbf16>
    %c0_188 = arith.constant 0 : index
    %c0_189 = arith.constant 0 : index
    %359 = vector.load %arg17[%c0_188, %c0_189] : memref<8x32xbf16, #tpu.memory_space<vmem>>, vector<8x32xbf16>
    %360 = tpu.concatenate %358, %359 in 1 : vector<8x32xbf16>, vector<8x32xbf16> -> vector<8x64xbf16>
    %c0_190 = arith.constant 0 : index
    %c0_191 = arith.constant 0 : index
    %361 = vector.load %arg5[%c0_190, %c0_191] : memref<64x128xbf16, #tpu.memory_space<vmem>>, vector<64x128xbf16>
    %cst_192 = arith.constant dense<0.000000e+00> : vector<8x128xf32>
    %362 = tpu.matmul %360, %361, %cst_192 {dimension_numbers = #tpu.dot_dimension_numbers<[1], [0], [0], [1], [0, 0, 1, 1], [], []>} : vector<8x64xbf16>, vector<64x128xbf16>, vector<8x128xf32> -> vector<8x128xf32>
    %363 = arith.addf %12, %362 : vector<8x128xf32>
    %c0_193 = arith.constant 0 : index
    %c0_194 = arith.constant 0 : index
    %364 = vector.load %arg18[%c0_193, %c0_194] : memref<8x32xf32, #tpu.memory_space<vmem>>, vector<8x32xf32>
    %365 = vector.broadcast %18 : vector<1x128xf32> to vector<8x128xf32>
    %366 = arith.mulf %363, %365 : vector<8x128xf32>
    %367 = math.tanh %366 : vector<8x128xf32>
    %368 = vector.extract_strided_slice %367 {offsets = [0, 0], sizes = [8, 32], strides = [1, 1]} : vector<8x128xf32> to vector<8x32xf32>
    %cst_195 = arith.constant 5.000000e-01 : f32
    %369 = vector.broadcast %cst_195 : f32 to vector<8x32xf32>
    %370 = arith.mulf %368, %369 : vector<8x32xf32>
    %cst_196 = arith.constant 5.000000e-01 : f32
    %371 = vector.broadcast %cst_196 : f32 to vector<8x32xf32>
    %372 = arith.addf %370, %371 : vector<8x32xf32>
    %373 = vector.extract_strided_slice %367 {offsets = [0, 32], sizes = [8, 32], strides = [1, 1]} : vector<8x128xf32> to vector<8x32xf32>
    %cst_197 = arith.constant 5.000000e-01 : f32
    %374 = vector.broadcast %cst_197 : f32 to vector<8x32xf32>
    %375 = arith.mulf %373, %374 : vector<8x32xf32>
    %cst_198 = arith.constant 5.000000e-01 : f32
    %376 = vector.broadcast %cst_198 : f32 to vector<8x32xf32>
    %377 = arith.addf %375, %376 : vector<8x32xf32>
    %378 = vector.extract_strided_slice %367 {offsets = [0, 64], sizes = [8, 32], strides = [1, 1]} : vector<8x128xf32> to vector<8x32xf32>
    %cst_199 = arith.constant 5.000000e-01 : f32
    %379 = vector.broadcast %cst_199 : f32 to vector<8x32xf32>
    %380 = arith.mulf %378, %379 : vector<8x32xf32>
    %cst_200 = arith.constant 5.000000e-01 : f32
    %381 = vector.broadcast %cst_200 : f32 to vector<8x32xf32>
    %382 = arith.addf %380, %381 : vector<8x32xf32>
    %383 = vector.extract_strided_slice %367 {offsets = [0, 96], sizes = [8, 32], strides = [1, 1]} : vector<8x128xf32> to vector<8x32xf32>
    %384 = arith.mulf %377, %364 : vector<8x32xf32>
    %385 = arith.mulf %372, %383 : vector<8x32xf32>
    %386 = arith.addf %384, %385 : vector<8x32xf32>
    %387 = math.tanh %386 : vector<8x32xf32>
    %388 = arith.mulf %382, %387 : vector<8x32xf32>
    %389 = arith.truncf %388 : vector<8x32xf32> to vector<8x32xbf16>
    %c0_201 = arith.constant 0 : index
    %c0_202 = arith.constant 0 : index
    %390 = vector.load %arg19[%c0_201, %c0_202] : memref<8x32xbf16, #tpu.memory_space<vmem>>, vector<8x32xbf16>
    %391 = tpu.concatenate %389, %390 in 1 : vector<8x32xbf16>, vector<8x32xbf16> -> vector<8x64xbf16>
    %c0_203 = arith.constant 0 : index
    %c0_204 = arith.constant 0 : index
    %392 = vector.load %arg7[%c0_203, %c0_204] : memref<64x128xbf16, #tpu.memory_space<vmem>>, vector<64x128xbf16>
    %cst_205 = arith.constant dense<0.000000e+00> : vector<8x128xf32>
    %393 = tpu.matmul %391, %392, %cst_205 {dimension_numbers = #tpu.dot_dimension_numbers<[1], [0], [0], [1], [0, 0, 1, 1], [], []>} : vector<8x64xbf16>, vector<64x128xbf16>, vector<8x128xf32> -> vector<8x128xf32>
    %394 = arith.addf %15, %393 : vector<8x128xf32>
    %c0_206 = arith.constant 0 : index
    %c0_207 = arith.constant 0 : index
    %395 = vector.load %arg20[%c0_206, %c0_207] : memref<8x32xf32, #tpu.memory_space<vmem>>, vector<8x32xf32>
    %396 = vector.broadcast %18 : vector<1x128xf32> to vector<8x128xf32>
    %397 = arith.mulf %394, %396 : vector<8x128xf32>
    %398 = math.tanh %397 : vector<8x128xf32>
    %399 = vector.extract_strided_slice %398 {offsets = [0, 0], sizes = [8, 32], strides = [1, 1]} : vector<8x128xf32> to vector<8x32xf32>
    %cst_208 = arith.constant 5.000000e-01 : f32
    %400 = vector.broadcast %cst_208 : f32 to vector<8x32xf32>
    %401 = arith.mulf %399, %400 : vector<8x32xf32>
    %cst_209 = arith.constant 5.000000e-01 : f32
    %402 = vector.broadcast %cst_209 : f32 to vector<8x32xf32>
    %403 = arith.addf %401, %402 : vector<8x32xf32>
    %404 = vector.extract_strided_slice %398 {offsets = [0, 32], sizes = [8, 32], strides = [1, 1]} : vector<8x128xf32> to vector<8x32xf32>
    %cst_210 = arith.constant 5.000000e-01 : f32
    %405 = vector.broadcast %cst_210 : f32 to vector<8x32xf32>
    %406 = arith.mulf %404, %405 : vector<8x32xf32>
    %cst_211 = arith.constant 5.000000e-01 : f32
    %407 = vector.broadcast %cst_211 : f32 to vector<8x32xf32>
    %408 = arith.addf %406, %407 : vector<8x32xf32>
    %409 = vector.extract_strided_slice %398 {offsets = [0, 64], sizes = [8, 32], strides = [1, 1]} : vector<8x128xf32> to vector<8x32xf32>
    %cst_212 = arith.constant 5.000000e-01 : f32
    %410 = vector.broadcast %cst_212 : f32 to vector<8x32xf32>
    %411 = arith.mulf %409, %410 : vector<8x32xf32>
    %cst_213 = arith.constant 5.000000e-01 : f32
    %412 = vector.broadcast %cst_213 : f32 to vector<8x32xf32>
    %413 = arith.addf %411, %412 : vector<8x32xf32>
    %414 = vector.extract_strided_slice %398 {offsets = [0, 96], sizes = [8, 32], strides = [1, 1]} : vector<8x128xf32> to vector<8x32xf32>
    %415 = arith.mulf %408, %395 : vector<8x32xf32>
    %416 = arith.mulf %403, %414 : vector<8x32xf32>
    %417 = arith.addf %415, %416 : vector<8x32xf32>
    %418 = math.tanh %417 : vector<8x32xf32>
    %419 = arith.mulf %413, %418 : vector<8x32xf32>
    %420 = arith.truncf %419 : vector<8x32xf32> to vector<8x32xbf16>
    %c0_214 = arith.constant 0 : index
    %c0_215 = arith.constant 0 : index
    %421 = vector.load %arg15[%c0_214, %c0_215] : memref<8x32xbf16, #tpu.memory_space<vmem>>, vector<8x32xbf16>
    tpu.vector_store %arg15[%c0_214, %c0_215], %358 {strides = array<i32>} : memref<8x32xbf16, #tpu.memory_space<vmem>>, vector<8x32xbf16>,
    %c0_216 = arith.constant 0 : index
    %c0_217 = arith.constant 0 : index
    %422 = vector.load %arg16[%c0_216, %c0_217] : memref<8x32xf32, #tpu.memory_space<vmem>>, vector<8x32xf32>
    tpu.vector_store %arg16[%c0_216, %c0_217], %355 {strides = array<i32>} : memref<8x32xf32, #tpu.memory_space<vmem>>, vector<8x32xf32>,
    %c0_218 = arith.constant 0 : index
    %c0_219 = arith.constant 0 : index
    %423 = vector.load %arg17[%c0_218, %c0_219] : memref<8x32xbf16, #tpu.memory_space<vmem>>, vector<8x32xbf16>
    tpu.vector_store %arg17[%c0_218, %c0_219], %389 {strides = array<i32>} : memref<8x32xbf16, #tpu.memory_space<vmem>>, vector<8x32xbf16>,
    %c0_220 = arith.constant 0 : index
    %c0_221 = arith.constant 0 : index
    %424 = vector.load %arg18[%c0_220, %c0_221] : memref<8x32xf32, #tpu.memory_space<vmem>>, vector<8x32xf32>
    tpu.vector_store %arg18[%c0_220, %c0_221], %386 {strides = array<i32>} : memref<8x32xf32, #tpu.memory_space<vmem>>, vector<8x32xf32>,
    %c0_222 = arith.constant 0 : index
    %c0_223 = arith.constant 0 : index
    %425 = vector.load %arg19[%c0_222, %c0_223] : memref<8x32xbf16, #tpu.memory_space<vmem>>, vector<8x32xbf16>
    tpu.vector_store %arg19[%c0_222, %c0_223], %420 {strides = array<i32>} : memref<8x32xbf16, #tpu.memory_space<vmem>>, vector<8x32xbf16>,
    %c0_224 = arith.constant 0 : index
    %c0_225 = arith.constant 0 : index
    %426 = vector.load %arg20[%c0_224, %c0_225] : memref<8x32xf32, #tpu.memory_space<vmem>>, vector<8x32xf32>
    tpu.vector_store %arg20[%c0_224, %c0_225], %417 {strides = array<i32>} : memref<8x32xf32, #tpu.memory_space<vmem>>, vector<8x32xf32>,
    %c4_i32 = arith.constant 4 : i32
    %c8_i32_226 = arith.constant 8 : i32
    %427 = arith.muli %c4_i32, %c8_i32_226 : i32
    %428 = tpu.assume_multiple %427, 8 : i32
    %429 = arith.index_cast %428 : i32 to index
    %c0_227 = arith.constant 0 : index
    %430 = vector.load %arg14[%429, %c0_227] : memref<64x128xf32, #tpu.memory_space<vmem>>, vector<8x128xf32>
    %c0_228 = arith.constant 0 : index
    %c0_229 = arith.constant 0 : index
    %431 = vector.load %arg15[%c0_228, %c0_229] : memref<8x32xbf16, #tpu.memory_space<vmem>>, vector<8x32xbf16>
    %c0_230 = arith.constant 0 : index
    %c0_231 = arith.constant 0 : index
    %432 = vector.load %arg4[%c0_230, %c0_231] : memref<32x128xbf16, #tpu.memory_space<vmem>>, vector<32x128xbf16>
    %cst_232 = arith.constant dense<0.000000e+00> : vector<8x128xf32>
    %433 = tpu.matmul %431, %432, %cst_232 {dimension_numbers = #tpu.dot_dimension_numbers<[1], [0], [0], [1], [0, 0, 1, 1], [], []>} : vector<8x32xbf16>, vector<32x128xbf16>, vector<8x128xf32> -> vector<8x128xf32>
    %434 = arith.addf %430, %433 : vector<8x128xf32>
    %c0_233 = arith.constant 0 : index
    %c0_234 = arith.constant 0 : index
    %435 = vector.load %arg16[%c0_233, %c0_234] : memref<8x32xf32, #tpu.memory_space<vmem>>, vector<8x32xf32>
    %436 = vector.broadcast %18 : vector<1x128xf32> to vector<8x128xf32>
    %437 = arith.mulf %434, %436 : vector<8x128xf32>
    %438 = math.tanh %437 : vector<8x128xf32>
    %439 = vector.extract_strided_slice %438 {offsets = [0, 0], sizes = [8, 32], strides = [1, 1]} : vector<8x128xf32> to vector<8x32xf32>
    %cst_235 = arith.constant 5.000000e-01 : f32
    %440 = vector.broadcast %cst_235 : f32 to vector<8x32xf32>
    %441 = arith.mulf %439, %440 : vector<8x32xf32>
    %cst_236 = arith.constant 5.000000e-01 : f32
    %442 = vector.broadcast %cst_236 : f32 to vector<8x32xf32>
    %443 = arith.addf %441, %442 : vector<8x32xf32>
    %444 = vector.extract_strided_slice %438 {offsets = [0, 32], sizes = [8, 32], strides = [1, 1]} : vector<8x128xf32> to vector<8x32xf32>
    %cst_237 = arith.constant 5.000000e-01 : f32
    %445 = vector.broadcast %cst_237 : f32 to vector<8x32xf32>
    %446 = arith.mulf %444, %445 : vector<8x32xf32>
    %cst_238 = arith.constant 5.000000e-01 : f32
    %447 = vector.broadcast %cst_238 : f32 to vector<8x32xf32>
    %448 = arith.addf %446, %447 : vector<8x32xf32>
    %449 = vector.extract_strided_slice %438 {offsets = [0, 64], sizes = [8, 32], strides = [1, 1]} : vector<8x128xf32> to vector<8x32xf32>
    %cst_239 = arith.constant 5.000000e-01 : f32
    %450 = vector.broadcast %cst_239 : f32 to vector<8x32xf32>
    %451 = arith.mulf %449, %450 : vector<8x32xf32>
    %cst_240 = arith.constant 5.000000e-01 : f32
    %452 = vector.broadcast %cst_240 : f32 to vector<8x32xf32>
    %453 = arith.addf %451, %452 : vector<8x32xf32>
    %454 = vector.extract_strided_slice %438 {offsets = [0, 96], sizes = [8, 32], strides = [1, 1]} : vector<8x128xf32> to vector<8x32xf32>
    %455 = arith.mulf %448, %435 : vector<8x32xf32>
    %456 = arith.mulf %443, %454 : vector<8x32xf32>
    %457 = arith.addf %455, %456 : vector<8x32xf32>
    %458 = math.tanh %457 : vector<8x32xf32>
    %459 = arith.mulf %453, %458 : vector<8x32xf32>
    %460 = arith.truncf %459 : vector<8x32xf32> to vector<8x32xbf16>
    %c0_241 = arith.constant 0 : index
    %c0_242 = arith.constant 0 : index
    %461 = vector.load %arg17[%c0_241, %c0_242] : memref<8x32xbf16, #tpu.memory_space<vmem>>, vector<8x32xbf16>
    %462 = tpu.concatenate %460, %461 in 1 : vector<8x32xbf16>, vector<8x32xbf16> -> vector<8x64xbf16>
    %c0_243 = arith.constant 0 : index
    %c0_244 = arith.constant 0 : index
    %463 = vector.load %arg5[%c0_243, %c0_244] : memref<64x128xbf16, #tpu.memory_space<vmem>>, vector<64x128xbf16>
    %cst_245 = arith.constant dense<0.000000e+00> : vector<8x128xf32>
    %464 = tpu.matmul %462, %463, %cst_245 {dimension_numbers = #tpu.dot_dimension_numbers<[1], [0], [0], [1], [0, 0, 1, 1], [], []>} : vector<8x64xbf16>, vector<64x128xbf16>, vector<8x128xf32> -> vector<8x128xf32>
    %465 = arith.addf %12, %464 : vector<8x128xf32>
    %c0_246 = arith.constant 0 : index
    %c0_247 = arith.constant 0 : index
    %466 = vector.load %arg18[%c0_246, %c0_247] : memref<8x32xf32, #tpu.memory_space<vmem>>, vector<8x32xf32>
    %467 = vector.broadcast %18 : vector<1x128xf32> to vector<8x128xf32>
    %468 = arith.mulf %465, %467 : vector<8x128xf32>
    %469 = math.tanh %468 : vector<8x128xf32>
    %470 = vector.extract_strided_slice %469 {offsets = [0, 0], sizes = [8, 32], strides = [1, 1]} : vector<8x128xf32> to vector<8x32xf32>
    %cst_248 = arith.constant 5.000000e-01 : f32
    %471 = vector.broadcast %cst_248 : f32 to vector<8x32xf32>
    %472 = arith.mulf %470, %471 : vector<8x32xf32>
    %cst_249 = arith.constant 5.000000e-01 : f32
    %473 = vector.broadcast %cst_249 : f32 to vector<8x32xf32>
    %474 = arith.addf %472, %473 : vector<8x32xf32>
    %475 = vector.extract_strided_slice %469 {offsets = [0, 32], sizes = [8, 32], strides = [1, 1]} : vector<8x128xf32> to vector<8x32xf32>
    %cst_250 = arith.constant 5.000000e-01 : f32
    %476 = vector.broadcast %cst_250 : f32 to vector<8x32xf32>
    %477 = arith.mulf %475, %476 : vector<8x32xf32>
    %cst_251 = arith.constant 5.000000e-01 : f32
    %478 = vector.broadcast %cst_251 : f32 to vector<8x32xf32>
    %479 = arith.addf %477, %478 : vector<8x32xf32>
    %480 = vector.extract_strided_slice %469 {offsets = [0, 64], sizes = [8, 32], strides = [1, 1]} : vector<8x128xf32> to vector<8x32xf32>
    %cst_252 = arith.constant 5.000000e-01 : f32
    %481 = vector.broadcast %cst_252 : f32 to vector<8x32xf32>
    %482 = arith.mulf %480, %481 : vector<8x32xf32>
    %cst_253 = arith.constant 5.000000e-01 : f32
    %483 = vector.broadcast %cst_253 : f32 to vector<8x32xf32>
    %484 = arith.addf %482, %483 : vector<8x32xf32>
    %485 = vector.extract_strided_slice %469 {offsets = [0, 96], sizes = [8, 32], strides = [1, 1]} : vector<8x128xf32> to vector<8x32xf32>
    %486 = arith.mulf %479, %466 : vector<8x32xf32>
    %487 = arith.mulf %474, %485 : vector<8x32xf32>
    %488 = arith.addf %486, %487 : vector<8x32xf32>
    %489 = math.tanh %488 : vector<8x32xf32>
    %490 = arith.mulf %484, %489 : vector<8x32xf32>
    %491 = arith.truncf %490 : vector<8x32xf32> to vector<8x32xbf16>
    %c0_254 = arith.constant 0 : index
    %c0_255 = arith.constant 0 : index
    %492 = vector.load %arg19[%c0_254, %c0_255] : memref<8x32xbf16, #tpu.memory_space<vmem>>, vector<8x32xbf16>
    %493 = tpu.concatenate %491, %492 in 1 : vector<8x32xbf16>, vector<8x32xbf16> -> vector<8x64xbf16>
    %c0_256 = arith.constant 0 : index
    %c0_257 = arith.constant 0 : index
    %494 = vector.load %arg7[%c0_256, %c0_257] : memref<64x128xbf16, #tpu.memory_space<vmem>>, vector<64x128xbf16>
    %cst_258 = arith.constant dense<0.000000e+00> : vector<8x128xf32>
    %495 = tpu.matmul %493, %494, %cst_258 {dimension_numbers = #tpu.dot_dimension_numbers<[1], [0], [0], [1], [0, 0, 1, 1], [], []>} : vector<8x64xbf16>, vector<64x128xbf16>, vector<8x128xf32> -> vector<8x128xf32>
    %496 = arith.addf %15, %495 : vector<8x128xf32>
    %c0_259 = arith.constant 0 : index
    %c0_260 = arith.constant 0 : index
    %497 = vector.load %arg20[%c0_259, %c0_260] : memref<8x32xf32, #tpu.memory_space<vmem>>, vector<8x32xf32>
    %498 = vector.broadcast %18 : vector<1x128xf32> to vector<8x128xf32>
    %499 = arith.mulf %496, %498 : vector<8x128xf32>
    %500 = math.tanh %499 : vector<8x128xf32>
    %501 = vector.extract_strided_slice %500 {offsets = [0, 0], sizes = [8, 32], strides = [1, 1]} : vector<8x128xf32> to vector<8x32xf32>
    %cst_261 = arith.constant 5.000000e-01 : f32
    %502 = vector.broadcast %cst_261 : f32 to vector<8x32xf32>
    %503 = arith.mulf %501, %502 : vector<8x32xf32>
    %cst_262 = arith.constant 5.000000e-01 : f32
    %504 = vector.broadcast %cst_262 : f32 to vector<8x32xf32>
    %505 = arith.addf %503, %504 : vector<8x32xf32>
    %506 = vector.extract_strided_slice %500 {offsets = [0, 32], sizes = [8, 32], strides = [1, 1]} : vector<8x128xf32> to vector<8x32xf32>
    %cst_263 = arith.constant 5.000000e-01 : f32
    %507 = vector.broadcast %cst_263 : f32 to vector<8x32xf32>
    %508 = arith.mulf %506, %507 : vector<8x32xf32>
    %cst_264 = arith.constant 5.000000e-01 : f32
    %509 = vector.broadcast %cst_264 : f32 to vector<8x32xf32>
    %510 = arith.addf %508, %509 : vector<8x32xf32>
    %511 = vector.extract_strided_slice %500 {offsets = [0, 64], sizes = [8, 32], strides = [1, 1]} : vector<8x128xf32> to vector<8x32xf32>
    %cst_265 = arith.constant 5.000000e-01 : f32
    %512 = vector.broadcast %cst_265 : f32 to vector<8x32xf32>
    %513 = arith.mulf %511, %512 : vector<8x32xf32>
    %cst_266 = arith.constant 5.000000e-01 : f32
    %514 = vector.broadcast %cst_266 : f32 to vector<8x32xf32>
    %515 = arith.addf %513, %514 : vector<8x32xf32>
    %516 = vector.extract_strided_slice %500 {offsets = [0, 96], sizes = [8, 32], strides = [1, 1]} : vector<8x128xf32> to vector<8x32xf32>
    %517 = arith.mulf %510, %497 : vector<8x32xf32>
    %518 = arith.mulf %505, %516 : vector<8x32xf32>
    %519 = arith.addf %517, %518 : vector<8x32xf32>
    %520 = math.tanh %519 : vector<8x32xf32>
    %521 = arith.mulf %515, %520 : vector<8x32xf32>
    %522 = arith.truncf %521 : vector<8x32xf32> to vector<8x32xbf16>
    %c0_267 = arith.constant 0 : index
    %c0_268 = arith.constant 0 : index
    %523 = vector.load %arg15[%c0_267, %c0_268] : memref<8x32xbf16, #tpu.memory_space<vmem>>, vector<8x32xbf16>
    tpu.vector_store %arg15[%c0_267, %c0_268], %460 {strides = array<i32>} : memref<8x32xbf16, #tpu.memory_space<vmem>>, vector<8x32xbf16>,
    %c0_269 = arith.constant 0 : index
    %c0_270 = arith.constant 0 : index
    %524 = vector.load %arg16[%c0_269, %c0_270] : memref<8x32xf32, #tpu.memory_space<vmem>>, vector<8x32xf32>
    tpu.vector_store %arg16[%c0_269, %c0_270], %457 {strides = array<i32>} : memref<8x32xf32, #tpu.memory_space<vmem>>, vector<8x32xf32>,
    %c0_271 = arith.constant 0 : index
    %c0_272 = arith.constant 0 : index
    %525 = vector.load %arg17[%c0_271, %c0_272] : memref<8x32xbf16, #tpu.memory_space<vmem>>, vector<8x32xbf16>
    tpu.vector_store %arg17[%c0_271, %c0_272], %491 {strides = array<i32>} : memref<8x32xbf16, #tpu.memory_space<vmem>>, vector<8x32xbf16>,
    %c0_273 = arith.constant 0 : index
    %c0_274 = arith.constant 0 : index
    %526 = vector.load %arg18[%c0_273, %c0_274] : memref<8x32xf32, #tpu.memory_space<vmem>>, vector<8x32xf32>
    tpu.vector_store %arg18[%c0_273, %c0_274], %488 {strides = array<i32>} : memref<8x32xf32, #tpu.memory_space<vmem>>, vector<8x32xf32>,
    %c0_275 = arith.constant 0 : index
    %c0_276 = arith.constant 0 : index
    %527 = vector.load %arg19[%c0_275, %c0_276] : memref<8x32xbf16, #tpu.memory_space<vmem>>, vector<8x32xbf16>
    tpu.vector_store %arg19[%c0_275, %c0_276], %522 {strides = array<i32>} : memref<8x32xbf16, #tpu.memory_space<vmem>>, vector<8x32xbf16>,
    %c0_277 = arith.constant 0 : index
    %c0_278 = arith.constant 0 : index
    %528 = vector.load %arg20[%c0_277, %c0_278] : memref<8x32xf32, #tpu.memory_space<vmem>>, vector<8x32xf32>
    tpu.vector_store %arg20[%c0_277, %c0_278], %519 {strides = array<i32>} : memref<8x32xf32, #tpu.memory_space<vmem>>, vector<8x32xf32>,
    %c5_i32 = arith.constant 5 : i32
    %c8_i32_279 = arith.constant 8 : i32
    %529 = arith.muli %c5_i32, %c8_i32_279 : i32
    %530 = tpu.assume_multiple %529, 8 : i32
    %531 = arith.index_cast %530 : i32 to index
    %c0_280 = arith.constant 0 : index
    %532 = vector.load %arg14[%531, %c0_280] : memref<64x128xf32, #tpu.memory_space<vmem>>, vector<8x128xf32>
    %c0_281 = arith.constant 0 : index
    %c0_282 = arith.constant 0 : index
    %533 = vector.load %arg15[%c0_281, %c0_282] : memref<8x32xbf16, #tpu.memory_space<vmem>>, vector<8x32xbf16>
    %c0_283 = arith.constant 0 : index
    %c0_284 = arith.constant 0 : index
    %534 = vector.load %arg4[%c0_283, %c0_284] : memref<32x128xbf16, #tpu.memory_space<vmem>>, vector<32x128xbf16>
    %cst_285 = arith.constant dense<0.000000e+00> : vector<8x128xf32>
    %535 = tpu.matmul %533, %534, %cst_285 {dimension_numbers = #tpu.dot_dimension_numbers<[1], [0], [0], [1], [0, 0, 1, 1], [], []>} : vector<8x32xbf16>, vector<32x128xbf16>, vector<8x128xf32> -> vector<8x128xf32>
    %536 = arith.addf %532, %535 : vector<8x128xf32>
    %c0_286 = arith.constant 0 : index
    %c0_287 = arith.constant 0 : index
    %537 = vector.load %arg16[%c0_286, %c0_287] : memref<8x32xf32, #tpu.memory_space<vmem>>, vector<8x32xf32>
    %538 = vector.broadcast %18 : vector<1x128xf32> to vector<8x128xf32>
    %539 = arith.mulf %536, %538 : vector<8x128xf32>
    %540 = math.tanh %539 : vector<8x128xf32>
    %541 = vector.extract_strided_slice %540 {offsets = [0, 0], sizes = [8, 32], strides = [1, 1]} : vector<8x128xf32> to vector<8x32xf32>
    %cst_288 = arith.constant 5.000000e-01 : f32
    %542 = vector.broadcast %cst_288 : f32 to vector<8x32xf32>
    %543 = arith.mulf %541, %542 : vector<8x32xf32>
    %cst_289 = arith.constant 5.000000e-01 : f32
    %544 = vector.broadcast %cst_289 : f32 to vector<8x32xf32>
    %545 = arith.addf %543, %544 : vector<8x32xf32>
    %546 = vector.extract_strided_slice %540 {offsets = [0, 32], sizes = [8, 32], strides = [1, 1]} : vector<8x128xf32> to vector<8x32xf32>
    %cst_290 = arith.constant 5.000000e-01 : f32
    %547 = vector.broadcast %cst_290 : f32 to vector<8x32xf32>
    %548 = arith.mulf %546, %547 : vector<8x32xf32>
    %cst_291 = arith.constant 5.000000e-01 : f32
    %549 = vector.broadcast %cst_291 : f32 to vector<8x32xf32>
    %550 = arith.addf %548, %549 : vector<8x32xf32>
    %551 = vector.extract_strided_slice %540 {offsets = [0, 64], sizes = [8, 32], strides = [1, 1]} : vector<8x128xf32> to vector<8x32xf32>
    %cst_292 = arith.constant 5.000000e-01 : f32
    %552 = vector.broadcast %cst_292 : f32 to vector<8x32xf32>
    %553 = arith.mulf %551, %552 : vector<8x32xf32>
    %cst_293 = arith.constant 5.000000e-01 : f32
    %554 = vector.broadcast %cst_293 : f32 to vector<8x32xf32>
    %555 = arith.addf %553, %554 : vector<8x32xf32>
    %556 = vector.extract_strided_slice %540 {offsets = [0, 96], sizes = [8, 32], strides = [1, 1]} : vector<8x128xf32> to vector<8x32xf32>
    %557 = arith.mulf %550, %537 : vector<8x32xf32>
    %558 = arith.mulf %545, %556 : vector<8x32xf32>
    %559 = arith.addf %557, %558 : vector<8x32xf32>
    %560 = math.tanh %559 : vector<8x32xf32>
    %561 = arith.mulf %555, %560 : vector<8x32xf32>
    %562 = arith.truncf %561 : vector<8x32xf32> to vector<8x32xbf16>
    %c0_294 = arith.constant 0 : index
    %c0_295 = arith.constant 0 : index
    %563 = vector.load %arg17[%c0_294, %c0_295] : memref<8x32xbf16, #tpu.memory_space<vmem>>, vector<8x32xbf16>
    %564 = tpu.concatenate %562, %563 in 1 : vector<8x32xbf16>, vector<8x32xbf16> -> vector<8x64xbf16>
    %c0_296 = arith.constant 0 : index
    %c0_297 = arith.constant 0 : index
    %565 = vector.load %arg5[%c0_296, %c0_297] : memref<64x128xbf16, #tpu.memory_space<vmem>>, vector<64x128xbf16>
    %cst_298 = arith.constant dense<0.000000e+00> : vector<8x128xf32>
    %566 = tpu.matmul %564, %565, %cst_298 {dimension_numbers = #tpu.dot_dimension_numbers<[1], [0], [0], [1], [0, 0, 1, 1], [], []>} : vector<8x64xbf16>, vector<64x128xbf16>, vector<8x128xf32> -> vector<8x128xf32>
    %567 = arith.addf %12, %566 : vector<8x128xf32>
    %c0_299 = arith.constant 0 : index
    %c0_300 = arith.constant 0 : index
    %568 = vector.load %arg18[%c0_299, %c0_300] : memref<8x32xf32, #tpu.memory_space<vmem>>, vector<8x32xf32>
    %569 = vector.broadcast %18 : vector<1x128xf32> to vector<8x128xf32>
    %570 = arith.mulf %567, %569 : vector<8x128xf32>
    %571 = math.tanh %570 : vector<8x128xf32>
    %572 = vector.extract_strided_slice %571 {offsets = [0, 0], sizes = [8, 32], strides = [1, 1]} : vector<8x128xf32> to vector<8x32xf32>
    %cst_301 = arith.constant 5.000000e-01 : f32
    %573 = vector.broadcast %cst_301 : f32 to vector<8x32xf32>
    %574 = arith.mulf %572, %573 : vector<8x32xf32>
    %cst_302 = arith.constant 5.000000e-01 : f32
    %575 = vector.broadcast %cst_302 : f32 to vector<8x32xf32>
    %576 = arith.addf %574, %575 : vector<8x32xf32>
    %577 = vector.extract_strided_slice %571 {offsets = [0, 32], sizes = [8, 32], strides = [1, 1]} : vector<8x128xf32> to vector<8x32xf32>
    %cst_303 = arith.constant 5.000000e-01 : f32
    %578 = vector.broadcast %cst_303 : f32 to vector<8x32xf32>
    %579 = arith.mulf %577, %578 : vector<8x32xf32>
    %cst_304 = arith.constant 5.000000e-01 : f32
    %580 = vector.broadcast %cst_304 : f32 to vector<8x32xf32>
    %581 = arith.addf %579, %580 : vector<8x32xf32>
    %582 = vector.extract_strided_slice %571 {offsets = [0, 64], sizes = [8, 32], strides = [1, 1]} : vector<8x128xf32> to vector<8x32xf32>
    %cst_305 = arith.constant 5.000000e-01 : f32
    %583 = vector.broadcast %cst_305 : f32 to vector<8x32xf32>
    %584 = arith.mulf %582, %583 : vector<8x32xf32>
    %cst_306 = arith.constant 5.000000e-01 : f32
    %585 = vector.broadcast %cst_306 : f32 to vector<8x32xf32>
    %586 = arith.addf %584, %585 : vector<8x32xf32>
    %587 = vector.extract_strided_slice %571 {offsets = [0, 96], sizes = [8, 32], strides = [1, 1]} : vector<8x128xf32> to vector<8x32xf32>
    %588 = arith.mulf %581, %568 : vector<8x32xf32>
    %589 = arith.mulf %576, %587 : vector<8x32xf32>
    %590 = arith.addf %588, %589 : vector<8x32xf32>
    %591 = math.tanh %590 : vector<8x32xf32>
    %592 = arith.mulf %586, %591 : vector<8x32xf32>
    %593 = arith.truncf %592 : vector<8x32xf32> to vector<8x32xbf16>
    %c0_307 = arith.constant 0 : index
    %c0_308 = arith.constant 0 : index
    %594 = vector.load %arg19[%c0_307, %c0_308] : memref<8x32xbf16, #tpu.memory_space<vmem>>, vector<8x32xbf16>
    %595 = tpu.concatenate %593, %594 in 1 : vector<8x32xbf16>, vector<8x32xbf16> -> vector<8x64xbf16>
    %c0_309 = arith.constant 0 : index
    %c0_310 = arith.constant 0 : index
    %596 = vector.load %arg7[%c0_309, %c0_310] : memref<64x128xbf16, #tpu.memory_space<vmem>>, vector<64x128xbf16>
    %cst_311 = arith.constant dense<0.000000e+00> : vector<8x128xf32>
    %597 = tpu.matmul %595, %596, %cst_311 {dimension_numbers = #tpu.dot_dimension_numbers<[1], [0], [0], [1], [0, 0, 1, 1], [], []>} : vector<8x64xbf16>, vector<64x128xbf16>, vector<8x128xf32> -> vector<8x128xf32>
    %598 = arith.addf %15, %597 : vector<8x128xf32>
    %c0_312 = arith.constant 0 : index
    %c0_313 = arith.constant 0 : index
    %599 = vector.load %arg20[%c0_312, %c0_313] : memref<8x32xf32, #tpu.memory_space<vmem>>, vector<8x32xf32>
    %600 = vector.broadcast %18 : vector<1x128xf32> to vector<8x128xf32>
    %601 = arith.mulf %598, %600 : vector<8x128xf32>
    %602 = math.tanh %601 : vector<8x128xf32>
    %603 = vector.extract_strided_slice %602 {offsets = [0, 0], sizes = [8, 32], strides = [1, 1]} : vector<8x128xf32> to vector<8x32xf32>
    %cst_314 = arith.constant 5.000000e-01 : f32
    %604 = vector.broadcast %cst_314 : f32 to vector<8x32xf32>
    %605 = arith.mulf %603, %604 : vector<8x32xf32>
    %cst_315 = arith.constant 5.000000e-01 : f32
    %606 = vector.broadcast %cst_315 : f32 to vector<8x32xf32>
    %607 = arith.addf %605, %606 : vector<8x32xf32>
    %608 = vector.extract_strided_slice %602 {offsets = [0, 32], sizes = [8, 32], strides = [1, 1]} : vector<8x128xf32> to vector<8x32xf32>
    %cst_316 = arith.constant 5.000000e-01 : f32
    %609 = vector.broadcast %cst_316 : f32 to vector<8x32xf32>
    %610 = arith.mulf %608, %609 : vector<8x32xf32>
    %cst_317 = arith.constant 5.000000e-01 : f32
    %611 = vector.broadcast %cst_317 : f32 to vector<8x32xf32>
    %612 = arith.addf %610, %611 : vector<8x32xf32>
    %613 = vector.extract_strided_slice %602 {offsets = [0, 64], sizes = [8, 32], strides = [1, 1]} : vector<8x128xf32> to vector<8x32xf32>
    %cst_318 = arith.constant 5.000000e-01 : f32
    %614 = vector.broadcast %cst_318 : f32 to vector<8x32xf32>
    %615 = arith.mulf %613, %614 : vector<8x32xf32>
    %cst_319 = arith.constant 5.000000e-01 : f32
    %616 = vector.broadcast %cst_319 : f32 to vector<8x32xf32>
    %617 = arith.addf %615, %616 : vector<8x32xf32>
    %618 = vector.extract_strided_slice %602 {offsets = [0, 96], sizes = [8, 32], strides = [1, 1]} : vector<8x128xf32> to vector<8x32xf32>
    %619 = arith.mulf %612, %599 : vector<8x32xf32>
    %620 = arith.mulf %607, %618 : vector<8x32xf32>
    %621 = arith.addf %619, %620 : vector<8x32xf32>
    %622 = math.tanh %621 : vector<8x32xf32>
    %623 = arith.mulf %617, %622 : vector<8x32xf32>
    %624 = arith.truncf %623 : vector<8x32xf32> to vector<8x32xbf16>
    %c0_320 = arith.constant 0 : index
    %c0_321 = arith.constant 0 : index
    %625 = vector.load %arg15[%c0_320, %c0_321] : memref<8x32xbf16, #tpu.memory_space<vmem>>, vector<8x32xbf16>
    tpu.vector_store %arg15[%c0_320, %c0_321], %562 {strides = array<i32>} : memref<8x32xbf16, #tpu.memory_space<vmem>>, vector<8x32xbf16>,
    %c0_322 = arith.constant 0 : index
    %c0_323 = arith.constant 0 : index
    %626 = vector.load %arg16[%c0_322, %c0_323] : memref<8x32xf32, #tpu.memory_space<vmem>>, vector<8x32xf32>
    tpu.vector_store %arg16[%c0_322, %c0_323], %559 {strides = array<i32>} : memref<8x32xf32, #tpu.memory_space<vmem>>, vector<8x32xf32>,
    %c0_324 = arith.constant 0 : index
    %c0_325 = arith.constant 0 : index
    %627 = vector.load %arg17[%c0_324, %c0_325] : memref<8x32xbf16, #tpu.memory_space<vmem>>, vector<8x32xbf16>
    tpu.vector_store %arg17[%c0_324, %c0_325], %593 {strides = array<i32>} : memref<8x32xbf16, #tpu.memory_space<vmem>>, vector<8x32xbf16>,
    %c0_326 = arith.constant 0 : index
    %c0_327 = arith.constant 0 : index
    %628 = vector.load %arg18[%c0_326, %c0_327] : memref<8x32xf32, #tpu.memory_space<vmem>>, vector<8x32xf32>
    tpu.vector_store %arg18[%c0_326, %c0_327], %590 {strides = array<i32>} : memref<8x32xf32, #tpu.memory_space<vmem>>, vector<8x32xf32>,
    %c0_328 = arith.constant 0 : index
    %c0_329 = arith.constant 0 : index
    %629 = vector.load %arg19[%c0_328, %c0_329] : memref<8x32xbf16, #tpu.memory_space<vmem>>, vector<8x32xbf16>
    tpu.vector_store %arg19[%c0_328, %c0_329], %624 {strides = array<i32>} : memref<8x32xbf16, #tpu.memory_space<vmem>>, vector<8x32xbf16>,
    %c0_330 = arith.constant 0 : index
    %c0_331 = arith.constant 0 : index
    %630 = vector.load %arg20[%c0_330, %c0_331] : memref<8x32xf32, #tpu.memory_space<vmem>>, vector<8x32xf32>
    tpu.vector_store %arg20[%c0_330, %c0_331], %621 {strides = array<i32>} : memref<8x32xf32, #tpu.memory_space<vmem>>, vector<8x32xf32>,
    %c6_i32 = arith.constant 6 : i32
    %c8_i32_332 = arith.constant 8 : i32
    %631 = arith.muli %c6_i32, %c8_i32_332 : i32
    %632 = tpu.assume_multiple %631, 8 : i32
    %633 = arith.index_cast %632 : i32 to index
    %c0_333 = arith.constant 0 : index
    %634 = vector.load %arg14[%633, %c0_333] : memref<64x128xf32, #tpu.memory_space<vmem>>, vector<8x128xf32>
    %c0_334 = arith.constant 0 : index
    %c0_335 = arith.constant 0 : index
    %635 = vector.load %arg15[%c0_334, %c0_335] : memref<8x32xbf16, #tpu.memory_space<vmem>>, vector<8x32xbf16>
    %c0_336 = arith.constant 0 : index
    %c0_337 = arith.constant 0 : index
    %636 = vector.load %arg4[%c0_336, %c0_337] : memref<32x128xbf16, #tpu.memory_space<vmem>>, vector<32x128xbf16>
    %cst_338 = arith.constant dense<0.000000e+00> : vector<8x128xf32>
    %637 = tpu.matmul %635, %636, %cst_338 {dimension_numbers = #tpu.dot_dimension_numbers<[1], [0], [0], [1], [0, 0, 1, 1], [], []>} : vector<8x32xbf16>, vector<32x128xbf16>, vector<8x128xf32> -> vector<8x128xf32>
    %638 = arith.addf %634, %637 : vector<8x128xf32>
    %c0_339 = arith.constant 0 : index
    %c0_340 = arith.constant 0 : index
    %639 = vector.load %arg16[%c0_339, %c0_340] : memref<8x32xf32, #tpu.memory_space<vmem>>, vector<8x32xf32>
    %640 = vector.broadcast %18 : vector<1x128xf32> to vector<8x128xf32>
    %641 = arith.mulf %638, %640 : vector<8x128xf32>
    %642 = math.tanh %641 : vector<8x128xf32>
    %643 = vector.extract_strided_slice %642 {offsets = [0, 0], sizes = [8, 32], strides = [1, 1]} : vector<8x128xf32> to vector<8x32xf32>
    %cst_341 = arith.constant 5.000000e-01 : f32
    %644 = vector.broadcast %cst_341 : f32 to vector<8x32xf32>
    %645 = arith.mulf %643, %644 : vector<8x32xf32>
    %cst_342 = arith.constant 5.000000e-01 : f32
    %646 = vector.broadcast %cst_342 : f32 to vector<8x32xf32>
    %647 = arith.addf %645, %646 : vector<8x32xf32>
    %648 = vector.extract_strided_slice %642 {offsets = [0, 32], sizes = [8, 32], strides = [1, 1]} : vector<8x128xf32> to vector<8x32xf32>
    %cst_343 = arith.constant 5.000000e-01 : f32
    %649 = vector.broadcast %cst_343 : f32 to vector<8x32xf32>
    %650 = arith.mulf %648, %649 : vector<8x32xf32>
    %cst_344 = arith.constant 5.000000e-01 : f32
    %651 = vector.broadcast %cst_344 : f32 to vector<8x32xf32>
    %652 = arith.addf %650, %651 : vector<8x32xf32>
    %653 = vector.extract_strided_slice %642 {offsets = [0, 64], sizes = [8, 32], strides = [1, 1]} : vector<8x128xf32> to vector<8x32xf32>
    %cst_345 = arith.constant 5.000000e-01 : f32
    %654 = vector.broadcast %cst_345 : f32 to vector<8x32xf32>
    %655 = arith.mulf %653, %654 : vector<8x32xf32>
    %cst_346 = arith.constant 5.000000e-01 : f32
    %656 = vector.broadcast %cst_346 : f32 to vector<8x32xf32>
    %657 = arith.addf %655, %656 : vector<8x32xf32>
    %658 = vector.extract_strided_slice %642 {offsets = [0, 96], sizes = [8, 32], strides = [1, 1]} : vector<8x128xf32> to vector<8x32xf32>
    %659 = arith.mulf %652, %639 : vector<8x32xf32>
    %660 = arith.mulf %647, %658 : vector<8x32xf32>
    %661 = arith.addf %659, %660 : vector<8x32xf32>
    %662 = math.tanh %661 : vector<8x32xf32>
    %663 = arith.mulf %657, %662 : vector<8x32xf32>
    %664 = arith.truncf %663 : vector<8x32xf32> to vector<8x32xbf16>
    %c0_347 = arith.constant 0 : index
    %c0_348 = arith.constant 0 : index
    %665 = vector.load %arg17[%c0_347, %c0_348] : memref<8x32xbf16, #tpu.memory_space<vmem>>, vector<8x32xbf16>
    %666 = tpu.concatenate %664, %665 in 1 : vector<8x32xbf16>, vector<8x32xbf16> -> vector<8x64xbf16>
    %c0_349 = arith.constant 0 : index
    %c0_350 = arith.constant 0 : index
    %667 = vector.load %arg5[%c0_349, %c0_350] : memref<64x128xbf16, #tpu.memory_space<vmem>>, vector<64x128xbf16>
    %cst_351 = arith.constant dense<0.000000e+00> : vector<8x128xf32>
    %668 = tpu.matmul %666, %667, %cst_351 {dimension_numbers = #tpu.dot_dimension_numbers<[1], [0], [0], [1], [0, 0, 1, 1], [], []>} : vector<8x64xbf16>, vector<64x128xbf16>, vector<8x128xf32> -> vector<8x128xf32>
    %669 = arith.addf %12, %668 : vector<8x128xf32>
    %c0_352 = arith.constant 0 : index
    %c0_353 = arith.constant 0 : index
    %670 = vector.load %arg18[%c0_352, %c0_353] : memref<8x32xf32, #tpu.memory_space<vmem>>, vector<8x32xf32>
    %671 = vector.broadcast %18 : vector<1x128xf32> to vector<8x128xf32>
    %672 = arith.mulf %669, %671 : vector<8x128xf32>
    %673 = math.tanh %672 : vector<8x128xf32>
    %674 = vector.extract_strided_slice %673 {offsets = [0, 0], sizes = [8, 32], strides = [1, 1]} : vector<8x128xf32> to vector<8x32xf32>
    %cst_354 = arith.constant 5.000000e-01 : f32
    %675 = vector.broadcast %cst_354 : f32 to vector<8x32xf32>
    %676 = arith.mulf %674, %675 : vector<8x32xf32>
    %cst_355 = arith.constant 5.000000e-01 : f32
    %677 = vector.broadcast %cst_355 : f32 to vector<8x32xf32>
    %678 = arith.addf %676, %677 : vector<8x32xf32>
    %679 = vector.extract_strided_slice %673 {offsets = [0, 32], sizes = [8, 32], strides = [1, 1]} : vector<8x128xf32> to vector<8x32xf32>
    %cst_356 = arith.constant 5.000000e-01 : f32
    %680 = vector.broadcast %cst_356 : f32 to vector<8x32xf32>
    %681 = arith.mulf %679, %680 : vector<8x32xf32>
    %cst_357 = arith.constant 5.000000e-01 : f32
    %682 = vector.broadcast %cst_357 : f32 to vector<8x32xf32>
    %683 = arith.addf %681, %682 : vector<8x32xf32>
    %684 = vector.extract_strided_slice %673 {offsets = [0, 64], sizes = [8, 32], strides = [1, 1]} : vector<8x128xf32> to vector<8x32xf32>
    %cst_358 = arith.constant 5.000000e-01 : f32
    %685 = vector.broadcast %cst_358 : f32 to vector<8x32xf32>
    %686 = arith.mulf %684, %685 : vector<8x32xf32>
    %cst_359 = arith.constant 5.000000e-01 : f32
    %687 = vector.broadcast %cst_359 : f32 to vector<8x32xf32>
    %688 = arith.addf %686, %687 : vector<8x32xf32>
    %689 = vector.extract_strided_slice %673 {offsets = [0, 96], sizes = [8, 32], strides = [1, 1]} : vector<8x128xf32> to vector<8x32xf32>
    %690 = arith.mulf %683, %670 : vector<8x32xf32>
    %691 = arith.mulf %678, %689 : vector<8x32xf32>
    %692 = arith.addf %690, %691 : vector<8x32xf32>
    %693 = math.tanh %692 : vector<8x32xf32>
    %694 = arith.mulf %688, %693 : vector<8x32xf32>
    %695 = arith.truncf %694 : vector<8x32xf32> to vector<8x32xbf16>
    %c0_360 = arith.constant 0 : index
    %c0_361 = arith.constant 0 : index
    %696 = vector.load %arg19[%c0_360, %c0_361] : memref<8x32xbf16, #tpu.memory_space<vmem>>, vector<8x32xbf16>
    %697 = tpu.concatenate %695, %696 in 1 : vector<8x32xbf16>, vector<8x32xbf16> -> vector<8x64xbf16>
    %c0_362 = arith.constant 0 : index
    %c0_363 = arith.constant 0 : index
    %698 = vector.load %arg7[%c0_362, %c0_363] : memref<64x128xbf16, #tpu.memory_space<vmem>>, vector<64x128xbf16>
    %cst_364 = arith.constant dense<0.000000e+00> : vector<8x128xf32>
    %699 = tpu.matmul %697, %698, %cst_364 {dimension_numbers = #tpu.dot_dimension_numbers<[1], [0], [0], [1], [0, 0, 1, 1], [], []>} : vector<8x64xbf16>, vector<64x128xbf16>, vector<8x128xf32> -> vector<8x128xf32>
    %700 = arith.addf %15, %699 : vector<8x128xf32>
    %c0_365 = arith.constant 0 : index
    %c0_366 = arith.constant 0 : index
    %701 = vector.load %arg20[%c0_365, %c0_366] : memref<8x32xf32, #tpu.memory_space<vmem>>, vector<8x32xf32>
    %702 = vector.broadcast %18 : vector<1x128xf32> to vector<8x128xf32>
    %703 = arith.mulf %700, %702 : vector<8x128xf32>
    %704 = math.tanh %703 : vector<8x128xf32>
    %705 = vector.extract_strided_slice %704 {offsets = [0, 0], sizes = [8, 32], strides = [1, 1]} : vector<8x128xf32> to vector<8x32xf32>
    %cst_367 = arith.constant 5.000000e-01 : f32
    %706 = vector.broadcast %cst_367 : f32 to vector<8x32xf32>
    %707 = arith.mulf %705, %706 : vector<8x32xf32>
    %cst_368 = arith.constant 5.000000e-01 : f32
    %708 = vector.broadcast %cst_368 : f32 to vector<8x32xf32>
    %709 = arith.addf %707, %708 : vector<8x32xf32>
    %710 = vector.extract_strided_slice %704 {offsets = [0, 32], sizes = [8, 32], strides = [1, 1]} : vector<8x128xf32> to vector<8x32xf32>
    %cst_369 = arith.constant 5.000000e-01 : f32
    %711 = vector.broadcast %cst_369 : f32 to vector<8x32xf32>
    %712 = arith.mulf %710, %711 : vector<8x32xf32>
    %cst_370 = arith.constant 5.000000e-01 : f32
    %713 = vector.broadcast %cst_370 : f32 to vector<8x32xf32>
    %714 = arith.addf %712, %713 : vector<8x32xf32>
    %715 = vector.extract_strided_slice %704 {offsets = [0, 64], sizes = [8, 32], strides = [1, 1]} : vector<8x128xf32> to vector<8x32xf32>
    %cst_371 = arith.constant 5.000000e-01 : f32
    %716 = vector.broadcast %cst_371 : f32 to vector<8x32xf32>
    %717 = arith.mulf %715, %716 : vector<8x32xf32>
    %cst_372 = arith.constant 5.000000e-01 : f32
    %718 = vector.broadcast %cst_372 : f32 to vector<8x32xf32>
    %719 = arith.addf %717, %718 : vector<8x32xf32>
    %720 = vector.extract_strided_slice %704 {offsets = [0, 96], sizes = [8, 32], strides = [1, 1]} : vector<8x128xf32> to vector<8x32xf32>
    %721 = arith.mulf %714, %701 : vector<8x32xf32>
    %722 = arith.mulf %709, %720 : vector<8x32xf32>
    %723 = arith.addf %721, %722 : vector<8x32xf32>
    %724 = math.tanh %723 : vector<8x32xf32>
    %725 = arith.mulf %719, %724 : vector<8x32xf32>
    %726 = arith.truncf %725 : vector<8x32xf32> to vector<8x32xbf16>
    %c0_373 = arith.constant 0 : index
    %c0_374 = arith.constant 0 : index
    %727 = vector.load %arg15[%c0_373, %c0_374] : memref<8x32xbf16, #tpu.memory_space<vmem>>, vector<8x32xbf16>
    tpu.vector_store %arg15[%c0_373, %c0_374], %664 {strides = array<i32>} : memref<8x32xbf16, #tpu.memory_space<vmem>>, vector<8x32xbf16>,
    %c0_375 = arith.constant 0 : index
    %c0_376 = arith.constant 0 : index
    %728 = vector.load %arg16[%c0_375, %c0_376] : memref<8x32xf32, #tpu.memory_space<vmem>>, vector<8x32xf32>
    tpu.vector_store %arg16[%c0_375, %c0_376], %661 {strides = array<i32>} : memref<8x32xf32, #tpu.memory_space<vmem>>, vector<8x32xf32>,
    %c0_377 = arith.constant 0 : index
    %c0_378 = arith.constant 0 : index
    %729 = vector.load %arg17[%c0_377, %c0_378] : memref<8x32xbf16, #tpu.memory_space<vmem>>, vector<8x32xbf16>
    tpu.vector_store %arg17[%c0_377, %c0_378], %695 {strides = array<i32>} : memref<8x32xbf16, #tpu.memory_space<vmem>>, vector<8x32xbf16>,
    %c0_379 = arith.constant 0 : index
    %c0_380 = arith.constant 0 : index
    %730 = vector.load %arg18[%c0_379, %c0_380] : memref<8x32xf32, #tpu.memory_space<vmem>>, vector<8x32xf32>
    tpu.vector_store %arg18[%c0_379, %c0_380], %692 {strides = array<i32>} : memref<8x32xf32, #tpu.memory_space<vmem>>, vector<8x32xf32>,
    %c0_381 = arith.constant 0 : index
    %c0_382 = arith.constant 0 : index
    %731 = vector.load %arg19[%c0_381, %c0_382] : memref<8x32xbf16, #tpu.memory_space<vmem>>, vector<8x32xbf16>
    tpu.vector_store %arg19[%c0_381, %c0_382], %726 {strides = array<i32>} : memref<8x32xbf16, #tpu.memory_space<vmem>>, vector<8x32xbf16>,
    %c0_383 = arith.constant 0 : index
    %c0_384 = arith.constant 0 : index
    %732 = vector.load %arg20[%c0_383, %c0_384] : memref<8x32xf32, #tpu.memory_space<vmem>>, vector<8x32xf32>
    tpu.vector_store %arg20[%c0_383, %c0_384], %723 {strides = array<i32>} : memref<8x32xf32, #tpu.memory_space<vmem>>, vector<8x32xf32>,
    %c7_i32 = arith.constant 7 : i32
    %c8_i32_385 = arith.constant 8 : i32
    %733 = arith.muli %c7_i32, %c8_i32_385 : i32
    %734 = tpu.assume_multiple %733, 8 : i32
    %735 = arith.index_cast %734 : i32 to index
    %c0_386 = arith.constant 0 : index
    %736 = vector.load %arg14[%735, %c0_386] : memref<64x128xf32, #tpu.memory_space<vmem>>, vector<8x128xf32>
    %c0_387 = arith.constant 0 : index
    %c0_388 = arith.constant 0 : index
    %737 = vector.load %arg15[%c0_387, %c0_388] : memref<8x32xbf16, #tpu.memory_space<vmem>>, vector<8x32xbf16>
    %c0_389 = arith.constant 0 : index
    %c0_390 = arith.constant 0 : index
    %738 = vector.load %arg4[%c0_389, %c0_390] : memref<32x128xbf16, #tpu.memory_space<vmem>>, vector<32x128xbf16>
    %cst_391 = arith.constant dense<0.000000e+00> : vector<8x128xf32>
    %739 = tpu.matmul %737, %738, %cst_391 {dimension_numbers = #tpu.dot_dimension_numbers<[1], [0], [0], [1], [0, 0, 1, 1], [], []>} : vector<8x32xbf16>, vector<32x128xbf16>, vector<8x128xf32> -> vector<8x128xf32>
    %740 = arith.addf %736, %739 : vector<8x128xf32>
    %c0_392 = arith.constant 0 : index
    %c0_393 = arith.constant 0 : index
    %741 = vector.load %arg16[%c0_392, %c0_393] : memref<8x32xf32, #tpu.memory_space<vmem>>, vector<8x32xf32>
    %742 = vector.broadcast %18 : vector<1x128xf32> to vector<8x128xf32>
    %743 = arith.mulf %740, %742 : vector<8x128xf32>
    %744 = math.tanh %743 : vector<8x128xf32>
    %745 = vector.extract_strided_slice %744 {offsets = [0, 0], sizes = [8, 32], strides = [1, 1]} : vector<8x128xf32> to vector<8x32xf32>
    %cst_394 = arith.constant 5.000000e-01 : f32
    %746 = vector.broadcast %cst_394 : f32 to vector<8x32xf32>
    %747 = arith.mulf %745, %746 : vector<8x32xf32>
    %cst_395 = arith.constant 5.000000e-01 : f32
    %748 = vector.broadcast %cst_395 : f32 to vector<8x32xf32>
    %749 = arith.addf %747, %748 : vector<8x32xf32>
    %750 = vector.extract_strided_slice %744 {offsets = [0, 32], sizes = [8, 32], strides = [1, 1]} : vector<8x128xf32> to vector<8x32xf32>
    %cst_396 = arith.constant 5.000000e-01 : f32
    %751 = vector.broadcast %cst_396 : f32 to vector<8x32xf32>
    %752 = arith.mulf %750, %751 : vector<8x32xf32>
    %cst_397 = arith.constant 5.000000e-01 : f32
    %753 = vector.broadcast %cst_397 : f32 to vector<8x32xf32>
    %754 = arith.addf %752, %753 : vector<8x32xf32>
    %755 = vector.extract_strided_slice %744 {offsets = [0, 64], sizes = [8, 32], strides = [1, 1]} : vector<8x128xf32> to vector<8x32xf32>
    %cst_398 = arith.constant 5.000000e-01 : f32
    %756 = vector.broadcast %cst_398 : f32 to vector<8x32xf32>
    %757 = arith.mulf %755, %756 : vector<8x32xf32>
    %cst_399 = arith.constant 5.000000e-01 : f32
    %758 = vector.broadcast %cst_399 : f32 to vector<8x32xf32>
    %759 = arith.addf %757, %758 : vector<8x32xf32>
    %760 = vector.extract_strided_slice %744 {offsets = [0, 96], sizes = [8, 32], strides = [1, 1]} : vector<8x128xf32> to vector<8x32xf32>
    %761 = arith.mulf %754, %741 : vector<8x32xf32>
    %762 = arith.mulf %749, %760 : vector<8x32xf32>
    %763 = arith.addf %761, %762 : vector<8x32xf32>
    %764 = math.tanh %763 : vector<8x32xf32>
    %765 = arith.mulf %759, %764 : vector<8x32xf32>
    %766 = arith.truncf %765 : vector<8x32xf32> to vector<8x32xbf16>
    %c0_400 = arith.constant 0 : index
    %c0_401 = arith.constant 0 : index
    %767 = vector.load %arg17[%c0_400, %c0_401] : memref<8x32xbf16, #tpu.memory_space<vmem>>, vector<8x32xbf16>
    %768 = tpu.concatenate %766, %767 in 1 : vector<8x32xbf16>, vector<8x32xbf16> -> vector<8x64xbf16>
    %c0_402 = arith.constant 0 : index
    %c0_403 = arith.constant 0 : index
    %769 = vector.load %arg5[%c0_402, %c0_403] : memref<64x128xbf16, #tpu.memory_space<vmem>>, vector<64x128xbf16>
    %cst_404 = arith.constant dense<0.000000e+00> : vector<8x128xf32>
    %770 = tpu.matmul %768, %769, %cst_404 {dimension_numbers = #tpu.dot_dimension_numbers<[1], [0], [0], [1], [0, 0, 1, 1], [], []>} : vector<8x64xbf16>, vector<64x128xbf16>, vector<8x128xf32> -> vector<8x128xf32>
    %771 = arith.addf %12, %770 : vector<8x128xf32>
    %c0_405 = arith.constant 0 : index
    %c0_406 = arith.constant 0 : index
    %772 = vector.load %arg18[%c0_405, %c0_406] : memref<8x32xf32, #tpu.memory_space<vmem>>, vector<8x32xf32>
    %773 = vector.broadcast %18 : vector<1x128xf32> to vector<8x128xf32>
    %774 = arith.mulf %771, %773 : vector<8x128xf32>
    %775 = math.tanh %774 : vector<8x128xf32>
    %776 = vector.extract_strided_slice %775 {offsets = [0, 0], sizes = [8, 32], strides = [1, 1]} : vector<8x128xf32> to vector<8x32xf32>
    %cst_407 = arith.constant 5.000000e-01 : f32
    %777 = vector.broadcast %cst_407 : f32 to vector<8x32xf32>
    %778 = arith.mulf %776, %777 : vector<8x32xf32>
    %cst_408 = arith.constant 5.000000e-01 : f32
    %779 = vector.broadcast %cst_408 : f32 to vector<8x32xf32>
    %780 = arith.addf %778, %779 : vector<8x32xf32>
    %781 = vector.extract_strided_slice %775 {offsets = [0, 32], sizes = [8, 32], strides = [1, 1]} : vector<8x128xf32> to vector<8x32xf32>
    %cst_409 = arith.constant 5.000000e-01 : f32
    %782 = vector.broadcast %cst_409 : f32 to vector<8x32xf32>
    %783 = arith.mulf %781, %782 : vector<8x32xf32>
    %cst_410 = arith.constant 5.000000e-01 : f32
    %784 = vector.broadcast %cst_410 : f32 to vector<8x32xf32>
    %785 = arith.addf %783, %784 : vector<8x32xf32>
    %786 = vector.extract_strided_slice %775 {offsets = [0, 64], sizes = [8, 32], strides = [1, 1]} : vector<8x128xf32> to vector<8x32xf32>
    %cst_411 = arith.constant 5.000000e-01 : f32
    %787 = vector.broadcast %cst_411 : f32 to vector<8x32xf32>
    %788 = arith.mulf %786, %787 : vector<8x32xf32>
    %cst_412 = arith.constant 5.000000e-01 : f32
    %789 = vector.broadcast %cst_412 : f32 to vector<8x32xf32>
    %790 = arith.addf %788, %789 : vector<8x32xf32>
    %791 = vector.extract_strided_slice %775 {offsets = [0, 96], sizes = [8, 32], strides = [1, 1]} : vector<8x128xf32> to vector<8x32xf32>
    %792 = arith.mulf %785, %772 : vector<8x32xf32>
    %793 = arith.mulf %780, %791 : vector<8x32xf32>
    %794 = arith.addf %792, %793 : vector<8x32xf32>
    %795 = math.tanh %794 : vector<8x32xf32>
    %796 = arith.mulf %790, %795 : vector<8x32xf32>
    %797 = arith.truncf %796 : vector<8x32xf32> to vector<8x32xbf16>
    %c0_413 = arith.constant 0 : index
    %c0_414 = arith.constant 0 : index
    %798 = vector.load %arg19[%c0_413, %c0_414] : memref<8x32xbf16, #tpu.memory_space<vmem>>, vector<8x32xbf16>
    %799 = tpu.concatenate %797, %798 in 1 : vector<8x32xbf16>, vector<8x32xbf16> -> vector<8x64xbf16>
    %c0_415 = arith.constant 0 : index
    %c0_416 = arith.constant 0 : index
    %800 = vector.load %arg7[%c0_415, %c0_416] : memref<64x128xbf16, #tpu.memory_space<vmem>>, vector<64x128xbf16>
    %cst_417 = arith.constant dense<0.000000e+00> : vector<8x128xf32>
    %801 = tpu.matmul %799, %800, %cst_417 {dimension_numbers = #tpu.dot_dimension_numbers<[1], [0], [0], [1], [0, 0, 1, 1], [], []>} : vector<8x64xbf16>, vector<64x128xbf16>, vector<8x128xf32> -> vector<8x128xf32>
    %802 = arith.addf %15, %801 : vector<8x128xf32>
    %c0_418 = arith.constant 0 : index
    %c0_419 = arith.constant 0 : index
    %803 = vector.load %arg20[%c0_418, %c0_419] : memref<8x32xf32, #tpu.memory_space<vmem>>, vector<8x32xf32>
    %804 = vector.broadcast %18 : vector<1x128xf32> to vector<8x128xf32>
    %805 = arith.mulf %802, %804 : vector<8x128xf32>
    %806 = math.tanh %805 : vector<8x128xf32>
    %807 = vector.extract_strided_slice %806 {offsets = [0, 0], sizes = [8, 32], strides = [1, 1]} : vector<8x128xf32> to vector<8x32xf32>
    %cst_420 = arith.constant 5.000000e-01 : f32
    %808 = vector.broadcast %cst_420 : f32 to vector<8x32xf32>
    %809 = arith.mulf %807, %808 : vector<8x32xf32>
    %cst_421 = arith.constant 5.000000e-01 : f32
    %810 = vector.broadcast %cst_421 : f32 to vector<8x32xf32>
    %811 = arith.addf %809, %810 : vector<8x32xf32>
    %812 = vector.extract_strided_slice %806 {offsets = [0, 32], sizes = [8, 32], strides = [1, 1]} : vector<8x128xf32> to vector<8x32xf32>
    %cst_422 = arith.constant 5.000000e-01 : f32
    %813 = vector.broadcast %cst_422 : f32 to vector<8x32xf32>
    %814 = arith.mulf %812, %813 : vector<8x32xf32>
    %cst_423 = arith.constant 5.000000e-01 : f32
    %815 = vector.broadcast %cst_423 : f32 to vector<8x32xf32>
    %816 = arith.addf %814, %815 : vector<8x32xf32>
    %817 = vector.extract_strided_slice %806 {offsets = [0, 64], sizes = [8, 32], strides = [1, 1]} : vector<8x128xf32> to vector<8x32xf32>
    %cst_424 = arith.constant 5.000000e-01 : f32
    %818 = vector.broadcast %cst_424 : f32 to vector<8x32xf32>
    %819 = arith.mulf %817, %818 : vector<8x32xf32>
    %cst_425 = arith.constant 5.000000e-01 : f32
    %820 = vector.broadcast %cst_425 : f32 to vector<8x32xf32>
    %821 = arith.addf %819, %820 : vector<8x32xf32>
    %822 = vector.extract_strided_slice %806 {offsets = [0, 96], sizes = [8, 32], strides = [1, 1]} : vector<8x128xf32> to vector<8x32xf32>
    %823 = arith.mulf %816, %803 : vector<8x32xf32>
    %824 = arith.mulf %811, %822 : vector<8x32xf32>
    %825 = arith.addf %823, %824 : vector<8x32xf32>
    %826 = math.tanh %825 : vector<8x32xf32>
    %827 = arith.mulf %821, %826 : vector<8x32xf32>
    %828 = arith.truncf %827 : vector<8x32xf32> to vector<8x32xbf16>
    %c0_426 = arith.constant 0 : index
    %c0_427 = arith.constant 0 : index
    %829 = vector.load %arg15[%c0_426, %c0_427] : memref<8x32xbf16, #tpu.memory_space<vmem>>, vector<8x32xbf16>
    tpu.vector_store %arg15[%c0_426, %c0_427], %766 {strides = array<i32>} : memref<8x32xbf16, #tpu.memory_space<vmem>>, vector<8x32xbf16>,
    %c0_428 = arith.constant 0 : index
    %c0_429 = arith.constant 0 : index
    %830 = vector.load %arg16[%c0_428, %c0_429] : memref<8x32xf32, #tpu.memory_space<vmem>>, vector<8x32xf32>
    tpu.vector_store %arg16[%c0_428, %c0_429], %763 {strides = array<i32>} : memref<8x32xf32, #tpu.memory_space<vmem>>, vector<8x32xf32>,
    %c0_430 = arith.constant 0 : index
    %c0_431 = arith.constant 0 : index
    %831 = vector.load %arg17[%c0_430, %c0_431] : memref<8x32xbf16, #tpu.memory_space<vmem>>, vector<8x32xbf16>
    tpu.vector_store %arg17[%c0_430, %c0_431], %797 {strides = array<i32>} : memref<8x32xbf16, #tpu.memory_space<vmem>>, vector<8x32xbf16>,
    %c0_432 = arith.constant 0 : index
    %c0_433 = arith.constant 0 : index
    %832 = vector.load %arg18[%c0_432, %c0_433] : memref<8x32xf32, #tpu.memory_space<vmem>>, vector<8x32xf32>
    tpu.vector_store %arg18[%c0_432, %c0_433], %794 {strides = array<i32>} : memref<8x32xf32, #tpu.memory_space<vmem>>, vector<8x32xf32>,
    %c0_434 = arith.constant 0 : index
    %c0_435 = arith.constant 0 : index
    %833 = vector.load %arg19[%c0_434, %c0_435] : memref<8x32xbf16, #tpu.memory_space<vmem>>, vector<8x32xbf16>
    tpu.vector_store %arg19[%c0_434, %c0_435], %828 {strides = array<i32>} : memref<8x32xbf16, #tpu.memory_space<vmem>>, vector<8x32xbf16>,
    %c0_436 = arith.constant 0 : index
    %c0_437 = arith.constant 0 : index
    %834 = vector.load %arg20[%c0_436, %c0_437] : memref<8x32xf32, #tpu.memory_space<vmem>>, vector<8x32xf32>
    tpu.vector_store %arg20[%c0_436, %c0_437], %825 {strides = array<i32>} : memref<8x32xf32, #tpu.memory_space<vmem>>, vector<8x32xf32>,
    %c8_i32_438 = arith.constant 8 : i32
    %c0_i32_439 = arith.constant 0 : i32
    %835 = arith.cmpi eq, %arg0, %c0_i32_439 : i32
    %836 = arith.extui %835 : i1 to i32
    %c0_i32_440 = arith.constant 0 : i32
    %837 = arith.cmpi ne, %836, %c0_i32_440 : i32
    scf.if %837 {
      %c0_441 = arith.constant 0 : index
      %c0_442 = arith.constant 0 : index
      %838 = vector.load %arg19[%c0_441, %c0_442] : memref<8x32xbf16, #tpu.memory_space<vmem>>, vector<8x32xbf16>
      %cst_443 = arith.constant 0.000000e+00 : bf16
      %839 = vector.broadcast %cst_443 : bf16 to vector<8x32xbf16>
      %840 = arith.maximumf %838, %839 : vector<8x32xbf16>
      %c0_444 = arith.constant 0 : index
      %c0_445 = arith.constant 0 : index
      %841 = vector.load %arg9[%c0_444, %c0_445] : memref<32x128xbf16, #tpu.memory_space<vmem>>, vector<32x128xbf16>
      %cst_446 = arith.constant dense<0.000000e+00> : vector<8x128xf32>
      %842 = tpu.matmul %840, %841, %cst_446 {dimension_numbers = #tpu.dot_dimension_numbers<[1], [0], [0], [1], [0, 0, 1, 1], [], []>} : vector<8x32xbf16>, vector<32x128xbf16>, vector<8x128xf32> -> vector<8x128xf32>
      %c0_447 = arith.constant 0 : index
      %c0_448 = arith.constant 0 : index
      %843 = vector.load %arg10[%c0_447, %c0_448] : memref<1x128xf32, #tpu.memory_space<vmem>>, vector<1x128xf32>
      %844 = vector.broadcast %843 : vector<1x128xf32> to vector<8x128xf32>
      %845 = arith.addf %842, %844 : vector<8x128xf32>
      %cst_449 = arith.constant 0.000000e+00 : f32
      %846 = vector.broadcast %cst_449 : f32 to vector<8x128xf32>
      %847 = arith.maximumf %845, %846 : vector<8x128xf32>
      %848 = arith.truncf %847 : vector<8x128xf32> to vector<8x128xbf16>
      %c0_450 = arith.constant 0 : index
      %c0_451 = arith.constant 0 : index
      %849 = vector.load %arg11[%c0_450, %c0_451] : memref<128x1xbf16, #tpu.memory_space<vmem>>, vector<128x1xbf16>
      %cst_452 = arith.constant dense<0.000000e+00> : vector<8x1xf32>
      %850 = tpu.matmul %848, %849, %cst_452 {dimension_numbers = #tpu.dot_dimension_numbers<[1], [0], [0], [1], [0, 0, 1, 1], [], []>} : vector<8x128xbf16>, vector<128x1xbf16>, vector<8x1xf32> -> vector<8x1xf32>
      %c0_453 = arith.constant 0 : index
      %c0_454 = arith.constant 0 : index
      %851 = vector.load %arg12[%c0_453, %c0_454] : memref<1x1xf32, #tpu.memory_space<vmem>>, vector<1x1xf32>
      %852 = vector.broadcast %851 : vector<1x1xf32> to vector<8x1xf32>
      %853 = arith.addf %850, %852 : vector<8x1xf32>
      %c0_455 = arith.constant 0 : index
      %c0_456 = arith.constant 0 : index
      %854 = vector.load %arg13[%c0_455, %c0_456] : memref<8x1xf32, #tpu.memory_space<vmem>>, vector<8x1xf32>
      tpu.vector_store %arg13[%c0_455, %c0_456], %853 {strides = array<i32>} : memref<8x1xf32, #tpu.memory_space<vmem>>, vector<8x1xf32>,
    } else {
    }
    return
  }
  func.func @transform_0(%arg0: i32) -> (i32, i32) {
    %c0_i32 = arith.constant 0 : i32
    %c0_i32_0 = arith.constant 0 : i32
    return %arg0, %c0_i32 : i32, i32
  }
  func.func @transform_1(%arg0: i32) -> (i32, i32) {
    %c0_i32 = arith.constant 0 : i32
    %c0_i32_0 = arith.constant 0 : i32
    %c0_i32_1 = arith.constant 0 : i32
    return %c0_i32, %c0_i32_0 : i32, i32
  }
  func.func @transform_2(%arg0: i32) -> (i32, i32) {
    %c0_i32 = arith.constant 0 : i32
    %c0_i32_0 = arith.constant 0 : i32
    %c0_i32_1 = arith.constant 0 : i32
    return %c0_i32, %c0_i32_0 : i32, i32
  }
  func.func @transform_3(%arg0: i32) -> (i32, i32) {
    %c0_i32 = arith.constant 0 : i32
    %c0_i32_0 = arith.constant 0 : i32
    %c0_i32_1 = arith.constant 0 : i32
    return %c0_i32, %c0_i32_0 : i32, i32
  }
  func.func @transform_4(%arg0: i32) -> (i32, i32) {
    %c0_i32 = arith.constant 0 : i32
    %c0_i32_0 = arith.constant 0 : i32
    %c0_i32_1 = arith.constant 0 : i32
    return %c0_i32, %c0_i32_0 : i32, i32
  }
  func.func @transform_5(%arg0: i32) -> (i32, i32) {
    %c0_i32 = arith.constant 0 : i32
    %c0_i32_0 = arith.constant 0 : i32
    %c0_i32_1 = arith.constant 0 : i32
    return %c0_i32, %c0_i32_0 : i32, i32
  }
  func.func @transform_6(%arg0: i32) -> (i32, i32) {
    %c0_i32 = arith.constant 0 : i32
    %c0_i32_0 = arith.constant 0 : i32
    %c0_i32_1 = arith.constant 0 : i32
    return %c0_i32, %c0_i32_0 : i32, i32
  }
  func.func @transform_7(%arg0: i32) -> (i32, i32) {
    %c0_i32 = arith.constant 0 : i32
    %c0_i32_0 = arith.constant 0 : i32
    %c0_i32_1 = arith.constant 0 : i32
    return %c0_i32, %c0_i32_0 : i32, i32
  }
  func.func @transform_8(%arg0: i32) -> (i32, i32) {
    %c0_i32 = arith.constant 0 : i32
    %c0_i32_0 = arith.constant 0 : i32
    %c0_i32_1 = arith.constant 0 : i32
    return %c0_i32, %c0_i32_0 : i32, i32
  }
  func.func @transform_9(%arg0: i32) -> (i32, i32) {
    %c0_i32 = arith.constant 0 : i32
    %c0_i32_0 = arith.constant 0 : i32
    %c0_i32_1 = arith.constant 0 : i32
    return %c0_i32, %c0_i32_0 : i32, i32
  }
  func.func @transform_10(%arg0: i32) -> (i32, i32) {
    %c0_i32 = arith.constant 0 : i32
    %c0_i32_0 = arith.constant 0 : i32
    %c0_i32_1 = arith.constant 0 : i32
    return %c0_i32, %c0_i32_0 : i32, i32
  }
  func.func @transform_11(%arg0: i32) -> (i32, i32) {
    %c0_i32 = arith.constant 0 : i32
    %c0_i32_0 = arith.constant 0 : i32
    %c0_i32_1 = arith.constant 0 : i32
    return %c0_i32, %c0_i32_0 : i32, i32
  }
  func.func @transform_12(%arg0: i32) -> (i32, i32) {
    %c0_i32 = arith.constant 0 : i32
    %c0_i32_0 = arith.constant 0 : i32
    %c0_i32_1 = arith.constant 0 : i32
    return %c0_i32, %c0_i32_0 : i32, i32
  }
}

</mosaic_0001>

<bundles_post_ra>
// kernel: tpu_custom_call.1
= control target key start
LH: loop header
LB: loop body
LE: loop exit
PB: predicated region body
PF: predicated region fallthrough
CT: control target
= control target key end

     0   :  { %vm116_vm0 = vcmask 1040384   ;;  %vm103_vm1 = vcmask 146432   ;;  %v4052_v0 = vmov 0.0   ;;  %vm4053_vm2 = vmmov 0   ;;  %s4056_s16 = smov 32   ;;  %s4057_s28 = smov 64   ;;  %s5027_s1 = inlined_call_operand.vmem [shape: bf16[18,128], index: 1, kind: input, shape index: {}]   ;;  %s5028_s3 = inlined_call_operand.vmem [shape: bf16[32,128], index: 3, kind: input, shape index: {}]   ;;  %s5029_s0 = inlined_call_operand.vmem [shape: bf16[64,18], index: 0, kind: input, shape index: {}]   ;;  %s5030_s2 = inlined_call_operand.vmem [shape: f32[1,128], index: 2, kind: input, shape index: {}]   ;;  %s5031_s4 = inlined_call_operand.vmem [shape: bf16[64,128], index: 4, kind: input, shape index: {}]   ;;  %s5032_s5 = inlined_call_operand.vmem [shape: f32[1,128], index: 5, kind: input, shape index: {}]   ;;  %s5033_s6 = inlined_call_operand.vmem [shape: bf16[64,128], index: 6, kind: input, shape index: {}]   ;;  %s5034_s7 = inlined_call_operand.vmem [shape: f32[1,128], index: 7, kind: input, shape index: {}]   ;;  %s5035_s8 = inlined_call_operand.vmem [shape: bf16[32,128], index: 8, kind: input, shape index: {}]   ;;  %s5036_s10 = inlined_call_operand.vmem [shape: bf16[128,1], index: 10, kind: input, shape index: {}]   ;;  %s5037_s11 = inlined_call_operand.<no memory space> [shape: f32[1,1], index: 11, kind: input, shape index: {}]   ;;  %s5038_s9 = inlined_call_operand.vmem [shape: f32[1,128], index: 9, kind: input, shape index: {}]   ;;  %s5039_s12 = inlined_call_operand.vmem [shape: f32[8,1], index: 12, kind: output, shape index: {}]  }
   0x1   :  { %3549 = vmatprep.subr.bf16.mxu1 %v4052_v0  ;;  %v3841_v1 = vld [vmem:[%s5027_s1 + $0x8] ss:$0 sps:$4 sm:$0x11]   ;;  %3553 = vmatprep.mubr.msk.bf16.mxu1 %vm4053_vm2, %v4052_v0  ;;  %v3843_v4 = vld [vmem:[%s5027_s1] sm:$0xff]   ;;  %vm48_vm3 = vcmask 257024   ;;  %vm52_vm4 = vcmask 261120   ;;  %v273_v10 = vlaneseq }
   0x2   :  { %v3842_v2 = vld [vmem:[%s5028_s3 + $0x8] sm:$0xff]   ;;  %3833 = vmatprep.subr.msk.bf16.mxu0 %vm116_vm0, %v3841_v1  ;;  %v118_v3 = vsel %vm116_vm0, %v3841_v1, 0  ;;  %v3844_v5 = vld [vmem:[%s5028_s3] sm:$0xff]   ;;  %v4054_v8 = vmov 0   ;;  %53 = vst.msk [vmem:[#allocation4] sm:$0xff] %vm52_vm4, %v4052_v0  ;;  %54 = vst.msk [vmem:[#allocation6] sm:$0xff] %vm52_vm4, %v4052_v0 }
   0x3   :  { %3550 = vmatpush3.bf16.msra.mxu1 %v3842_v2  ;;  %3538 = vmatpush3.bf16.msra.mxu0 %v118_v3  ;;  %v3845_v6 = vld [vmem:[%s5029_s0] sm:$0xff]   ;;  %v3846_v7 = vld [vmem:[%s5029_s0 + $0x8] sm:$0xff]   ;;  %49 = vst.msk [vmem:[#allocation3] sm:$0xf] %vm48_vm3, %v4054_v8  ;;  %50 = vst.msk [vmem:[#allocation5] sm:$0xf] %vm48_vm3, %v4054_v8 }
   0x4   :  { %3551 = vmatprep.subr.bf16.mxu1 %v4052_v0  ;;  %3539 = vmatprep.subr.bf16.mxu0 %v3843_v4  ;;  %51 = vst.msk [vmem:[#allocation7] sm:$0xf] %vm48_vm3, %v4054_v8  ;;  %v274_v11 = vshrl.u32 %v273_v10, 7  ;;  %vm207_vm5 = vcmask 785408   ;;  %v4055_v14 = vmov 1.0   ;;  %v3849_v38 = vld [vmem:[%s5029_s0 + $0x10] sm:$0xff]  }
   0x5   :  { %55 = vst.msk [vmem:[#allocation8] sm:$0xff] %vm52_vm4, %v4052_v0  ;;  %3541 = vmatprep.mubr.msk.bf16.mxu0 %vm103_vm1, %v3845_v6  ;;  %v208_v15 = vsel %vm207_vm5, 0.5, %v4055_v14  ;;  %v4170_v16 = vld [vmem:[%s5030_s2] ss:$0 sm:$0xff]  ;;  %v3850_v39 = vld [vmem:[%s5029_s0 + $0x18] sm:$0xff]   ;;  %v3851_v41 = vld [vmem:[%s5031_s4 + $0x10] sm:$0xff]  }
   0x6   :  { %v275_v12 = vsub.s32 0, %v274_v11  ;;  %v3848_v40 = vld [vmem:[%s5031_s4 + $0x18] sm:$0xff]   ;;  %v3852_v42 = vld [vmem:[%s5031_s4 + $0x8] sm:$0xff]   ;;  %v3853_v43 = vld [vmem:[%s5031_s4] sm:$0xff]   ;;  %s4058_s29 = smov 96   ;;  %vm347_vm6 = vcmask 523264  }
   0x7   :  { %3552 = vmatpush3.bf16.msra.mxu1 %v3844_v5  ;;  %3540 = vmatpush3.bf16.msra.mxu0 %v3843_v4  ;;  %v3854_v49 = vld [vmem:[%s5028_s3 + $0x8] sm:$0xff]   ;;  %v3855_v52 = vld [vmem:[%s5028_s3] sm:$0xff]   ;;  %vm3215_vm7 = vcmask 7168  }
   0x8   :  { %3569 = vmatprep.subr.bf16.mxu1 %v4052_v0  ;;  %3557 = vmatprep.subr.bf16.mxu0 %v4052_v0  ;;  %v4173_v20 = vrot.slane %v208_v15, %v275_v12  ;;  %v4242_v1 = vld [vmem:[%s5032_s5] ss:$0 sm:$0xff] }
   0x9   :  { %v272_v27 = vld [vmem:[#allocation4] sm:$0xff]  ;;  %v391_v47 = vld [vmem:[#allocation6] sm:$0xff] }
   0xa   :  { %3542 = vmatmul.mubr.msk.bf16.vlgmr.msra.gmra.mxu0 %vm103_vm1, %v3846_v7  ;;  %v210_v9 = vld [vmem:[#allocation3] sm:$0xf]  ;;  %v3847_v37 = vld [vmem:[#allocation5] ss:$0 sps:$4 sm:$0xff]  }
   0xb   :  { %3554 = vmatmul.mubr.msk.bf16.vlgmr.msra.gmra.mxu1 %vm52_vm4, %v210_v9  ;;  %3545 = vmatprep.mubr.msk.bf16.mxu0 %vm103_vm1, %v3849_v38 }
   0xc   :  { %3577 = vmatprep.mubr.msk.bf16.mxu1 %vm4053_vm2, %v4052_v0  ;;  %3558 = vmatpush3.bf16.msra.mxu0 %v3848_v40 }
   0xd   :  { %3559 = vmatprep.subr.bf16.mxu0 %v4052_v0 }
  0x10   :  { %3560 = vmatpush3.bf16.msra.mxu0 %v3851_v41 }
  0x11   :  { %3561 = vmatprep.subr.bf16.mxu0 %v4052_v0 }
  0x12   :  { %3546 = vmatmul.mubr.msk.bf16.gmra.mxu0 %vm103_vm1, %v3850_v39 }
  0x13   :  { %3565 = vmatprep.mubr.msk.bf16.mxu0 %vm4053_vm2, %v4052_v0 }
  0x14   :  { %3562 = vmatpush3.bf16.msra.mxu0 %v3852_v42 }
  0x15   :  { %3563 = vmatprep.subr.bf16.mxu0 %v4052_v0 }
  0x18   :  { %3564 = vmatpush3.bf16.msra.mxu0 %v3853_v43 }
  0x19   :  { %3581 = vmatprep.subr.bf16.mxu0 %v4052_v0 }
  0xca   :  { %v4165_v13 = vpop.f32.mrf.mxu0 }
  0xcb   :  { %v265_v18 = vpop.f32.mrf.mxu1 }
  0xcc   :  { %v154_v17 = vpop.f32.mrf.mxu0 }
  0xcd   :  { %v155_v19 = vadd.f32 %v4170_v16, %v154_v17  ;;  %v3555_v21 = vpop.f32.mrf.mxu1 }
  0xce   :  { %v4229_v58 = vpop.f32.mrf.mxu0 }
  0xcf   :  { %v271_v22 = vadd.f32 %v265_v18, %v155_v19  ;;  %v268_v24 = vpop.f32.mrf.mxu1 }
  0xd0   :  { %v157_v59 = vpop.f32.mrf.mxu0 }
  0xd1   :  { %v277_v23 = vmul.f32 %v4173_v20, %v271_v22  ;;  %v3556_v25 = vpop.f32.mrf.mxu1  ;;  %v158_v15 = vadd.f32 %v4170_v16, %v157_v59  ;;  %v505_v59 = vld [vmem:[#allocation8] sm:$0xff] }
  0xd2   :  { %v4231_v60 = vpop.f32.mrf.mxu0 }
  0xd3   :  { %3953 = vtanh.f32 %v277_v23 }
  0xd4   :  { %v4233_v61 = vpop.f32.mrf.mxu0 }
  0xd6   :  { %v4235_v62 = vpop.f32.mrf.mxu0 }
  0xd8   :  { %v4237_v63 = vpop.f32.mrf.mxu0 }
  0xe0   :  { %v3954_v26 = vpop.eup %3953 }
  0xe1   :  { %287 = vrot.lane.b32.xlu0 %v3954_v26, %s4056_s16  ;;  %v279_v28 = vmul.f32 0.5, %v3954_v26 }
  0xe3   :  { %v280_v29 = vadd.f32 0.5, %v279_v28 }
  0xe5   :  { %282 = vrot.lane.b32.xlu0 %v272_v27, %s4056_s16 }
 0x153   :  { %v288_v30 = vpop.permute.xlu0 %287 }
 0x154   :  { %v290_v31 = vmul.f32 %v288_v30, %v280_v29 }
 0x156   :  { %292 = vrot.lane.b32.xlu1 %v290_v31, %s4056_s16 }
 0x157   :  { %v283_v32 = vpop.permute.xlu0 %282 }
 0x158   :  { %v285_v33 = vmul.f32 %v283_v32, %v280_v29  ;;  %v3857_v32 = vld [vmem:[%s5033_s6 + $0x18] sm:$0xff]  }
 0x159   :  { %3570 = vmatpush3.bf16.msra.mxu1 %v3857_v32 }
 0x15a   :  { %3571 = vmatprep.subr.bf16.mxu1 %v4052_v0 }
 0x1c8   :  { %v293_v34 = vpop.permute.xlu1 %292 }
 0x1c9   :  { %v295_v35 = vadd.f32 %v293_v34, %v285_v33  ;;  %v3858_v33 = vld [vmem:[%s5033_s6 + $0x10] sm:$0xff]  }
 0x1ca   :  { %3572 = vmatpush3.bf16.msra.mxu1 %v3858_v33 }
 0x1cb   :  { %3955 = vtanh.f32 %v295_v35  ;;  %3573 = vmatprep.subr.bf16.mxu1 %v4052_v0 }
 0x1d8   :  { %v3956_v36 = vpop.eup %3955 }
 0x1d9   :  { %298 = vrot.lane.b32.xlu1 %v3956_v36, %s4056_s16  ;;  %v3859_v36 = vld [vmem:[%s5033_s6 + $0x8] sm:$0xff]  }
 0x1da   :  { %3574 = vmatpush3.bf16.msra.mxu1 %v3859_v36 }
 0x1db   :  { %3575 = vmatprep.subr.bf16.mxu1 %v4052_v0 }
 0x1dd   :  { %310 = vrot.lane.b32.xlu1 %v3847_v37, %s4056_s16  ;;  %v3860_v37 = vld [vmem:[%s5033_s6] sm:$0xff]  }
 0x1de   :  { %3576 = vmatpush3.bf16.msra.mxu1 %v3860_v37 }
 0x1df   :  { %3589 = vmatprep.subr.bf16.mxu1 %v4052_v0 }
 0x24b   :  { %v299_v44 = vpop.permute.xlu1 %298 }
 0x24c   :  { %v301_v45 = vmul.f32 %v299_v44, %v280_v29 }
 0x24e   :  { %v302_v46 = vpack.c.bf16 %v301_v45, %v301_v45 }
 0x24f   :  { %v311_v48 = vpop.permute.xlu1 %310 }
 0x250   :  { %305 = vrot.lane.b32.xlu0 %v302_v46, %s4057_s28 }
 0x254   :  { %534 = vrot.lane.b32.xlu0 %v302_v46, %s4057_s28 }
 0x258   :  { %397 = vrot.lane.b32.xlu0 %v391_v47, %s4056_s16  ;;  %v3862_v47 = vld [vmem:[%s5031_s4 + $0x18] sm:$0xff]  }
 0x25c   :  { %540 = vrot.lane.b32.xlu0 %v295_v35, %s4058_s29  ;;  %v3856_v35 = vld [vmem:[#allocation7] ss:$0 sps:$4 sm:$0xff]  }
 0x2c2   :  { %v306_v50 = vpop.permute.xlu0 %305 }
 0x2c3   :  { %v314_v51 = vsel %vm52_vm4, %v306_v50, %v311_v48 }
 0x2c4   :  { %3566 = vmatmul.mubr.msk.bf16.vlgmr.msra.gmra.mxu0 %vm347_vm6, %v314_v51 }
 0x2c5   :  { %3582 = vmatpush3.bf16.msra.mxu0 %v3854_v49  ;;  %3585 = vmatprep.mubr.msk.bf16.mxu0 %vm4053_vm2, %v4052_v0 }
 0x2c6   :  { %v535_v53 = vpop.permute.xlu0 %534  ;;  %3583 = vmatprep.subr.bf16.mxu0 %v4052_v0 }
 0x2c7   :  { %538 = vst.msk [vmem:[#allocation3] sm:$0xf] %vm48_vm3, %v535_v53 }
 0x2c9   :  { %3584 = vmatpush3.bf16.msra.mxu0 %v3855_v52  ;;  %v3863_v52 = vld [vmem:[%s5031_s4 + $0x10] sm:$0xff]  }
 0x2ca   :  { %v398_v54 = vpop.permute.xlu0 %397  ;;  %3621 = vmatprep.subr.bf16.mxu0 %v4052_v0 }
 0x2ce   :  { %v541_v55 = vpop.permute.xlu0 %540  ;;  %v569_v56 = vld [vmem:[#allocation3] sm:$0xf] }
 0x2cf   :  { %543 = vst.msk [vmem:[#allocation4] sm:$0xff] %vm52_vm4, %v541_v55  ;;  %3586 = vmatmul.mubr.msk.bf16.vlgmr.msra.gmra.mxu0 %vm52_vm4, %v569_v56  ;;  %v3864_v55 = vld [vmem:[%s5031_s4 + $0x8] sm:$0xff]   ;;  %v3865_v56 = vld [vmem:[%s5031_s4] sm:$0xff]  }
 0x2d0   :  { %3629 = vmatprep.mubr.msk.bf16.mxu0 %vm4053_vm2, %v4052_v0 }
 0x2d6   :  { %v630_v57 = vld [vmem:[#allocation4] sm:$0xff] }
 0x2d7   :  { %636 = vrot.lane.b32.xlu0 %v630_v57, %s4056_s16 }
 0x349   :  { %v637_v38 = vpop.permute.xlu0 %636 }
 0x384   :  { %v384_v2 = vpop.f32.mrf.mxu0 }
 0x385   :  { %v390_v3 = vadd.f32 %v4242_v1, %v384_v2 }
 0x386   :  { %v3567_v4 = vpop.f32.mrf.mxu0 }
 0x387   :  { %v392_v5 = vmul.f32 %v390_v3, %v4173_v20 }
 0x388   :  { %v387_v6 = vpop.f32.mrf.mxu0 }
 0x389   :  { %3957 = vtanh.f32 %v392_v5 }
 0x38a   :  { %v3568_v7 = vpop.f32.mrf.mxu0 }
 0x38f   :  { %v623_v9 = vpop.f32.mrf.mxu0 }
 0x390   :  { %v629_v17 = vadd.f32 %v623_v9, %v158_v15  ;;  %v4313_v9 = vld [vmem:[%s5034_s7] ss:$0 sm:$0xff] }
 0x391   :  { %v3587_v10 = vpop.f32.mrf.mxu0 }
 0x392   :  { %v631_v18 = vmul.f32 %v629_v17, %v4173_v20 }
 0x393   :  { %v626_v11 = vpop.f32.mrf.mxu0 }
 0x394   :  { %3959 = vtanh.f32 %v631_v18 }
 0x395   :  { %v3588_v12 = vpop.f32.mrf.mxu0 }
 0x396   :  { %v3958_v14 = vpop.eup %3957 }
 0x397   :  { %402 = vrot.lane.b32.xlu1 %v3958_v14, %s4056_s16  ;;  %v394_v19 = vmul.f32 0.5, %v3958_v14 }
 0x399   :  { %v395_v21 = vadd.f32 0.5, %v394_v19 }
 0x39b   :  { %v400_v25 = vmul.f32 %v398_v54, %v395_v21 }
 0x3a1   :  { %v3960_v24 = vpop.eup %3959 }
 0x3a2   :  { %v633_v26 = vmul.f32 0.5, %v3960_v24 }
 0x3a4   :  { %v634_v29 = vadd.f32 0.5, %v633_v26 }
 0x3a6   :  { %v639_v39 = vmul.f32 %v637_v38, %v634_v29 }
 0x409   :  { %v403_v22 = vpop.permute.xlu1 %402 }
 0x40a   :  { %v405_v23 = vmul.f32 %v403_v22, %v395_v21 }
 0x40c   :  { %407 = vrot.lane.b32.xlu1 %v405_v23, %s4056_s16 }
 0x410   :  { %641 = vrot.lane.b32.xlu1 %v3960_v24, %s4056_s16 }
 0x47e   :  { %v408_v27 = vpop.permute.xlu1 %407 }
 0x47f   :  { %v410_v28 = vadd.f32 %v408_v27, %v400_v25 }
 0x481   :  { %3961 = vtanh.f32 %v410_v28 }
 0x482   :  { %v642_v30 = vpop.permute.xlu1 %641 }
 0x483   :  { %v644_v31 = vmul.f32 %v642_v30, %v634_v29 }
 0x485   :  { %646 = vrot.lane.b32.xlu1 %v644_v31, %s4056_s16 }
 0x48e   :  { %v3962_v34 = vpop.eup %3961 }
 0x48f   :  { %413 = vrot.lane.b32.xlu0 %v3962_v34, %s4056_s16 }
 0x493   :  { %425 = vrot.lane.b32.xlu0 %v3856_v35, %s4056_s16 }
 0x4f7   :  { %v647_v40 = vpop.permute.xlu1 %646 }
 0x4f8   :  { %v4270_v41 = vadd.f32 %v647_v40, %v639_v39 }
 0x4fa   :  { %3963 = vtanh.f32 %v4270_v41 }
 0x501   :  { %v414_v42 = vpop.permute.xlu0 %413 }
 0x502   :  { %v416_v43 = vmul.f32 %v414_v42, %v395_v21 }
 0x504   :  { %v417_v44 = vpack.c.bf16 %v416_v43, %v416_v43 }
 0x505   :  { %v426_v46 = vpop.permute.xlu0 %425 }
 0x506   :  { %420 = vrot.lane.b32.xlu1 %v417_v44, %s4057_s28 }
 0x507   :  { %v3964_v45 = vpop.eup %3963 }
 0x508   :  { %652 = vrot.lane.b32.xlu0 %v3964_v45, %s4056_s16 }
 0x50a   :  { %546 = vrot.lane.b32.xlu1 %v417_v44, %s4057_s28 }
 0x578   :  { %v421_v48 = vpop.permute.xlu1 %420 }
 0x579   :  { %v429_v49 = vsel %vm52_vm4, %v421_v48, %v426_v46  ;;  %v3868_v48 = vld [vmem:[%s5033_s6 + $0x10] sm:$0xff]  }
 0x57a   :  { %3578 = vmatmul.mubr.msk.bf16.vlgmr.msra.gmra.mxu1 %vm347_vm6, %v429_v49  ;;  %v653_v50 = vpop.permute.xlu0 %652 }
 0x57b   :  { %v655_v51 = vmul.f32 %v653_v50, %v634_v29  ;;  %3590 = vmatpush3.bf16.msra.mxu1 %v3862_v47  ;;  %3597 = vmatprep.mubr.msk.bf16.mxu1 %vm4053_vm2, %v4052_v0  ;;  %v3867_v47 = vld [vmem:[%s5033_s6 + $0x18] sm:$0xff]   ;;  %v3869_v50 = vld [vmem:[%s5033_s6 + $0x8] sm:$0xff]  }
 0x57c   :  { %v547_v53 = vpop.permute.xlu1 %546  ;;  %3591 = vmatprep.subr.bf16.mxu1 %v4052_v0 }
 0x57d   :  { %v4287_v54 = vpack.c.bf16 %v655_v51, %v655_v51  ;;  %549 = vst.msk [vmem:[#allocation5] sm:$0xf] %vm48_vm3, %v547_v53  ;;  %v3870_v51 = vld [vmem:[%s5033_s6] sm:$0xff]  }
 0x57f   :  { %659 = vrot.lane.b32.xlu1 %v4287_v54, %s4057_s28  ;;  %3592 = vmatpush3.bf16.msra.mxu1 %v3863_v52 }
 0x580   :  { %3593 = vmatprep.subr.bf16.mxu1 %v4052_v0 }
 0x583   :  { %3594 = vmatpush3.bf16.msra.mxu1 %v3864_v55 }
 0x584   :  { %v3861_v57 = vld [vmem:[#allocation5] ss:$0 sps:$4 sm:$0xff]   ;;  %3595 = vmatprep.subr.bf16.mxu1 %v4052_v0 }
 0x585   :  { %664 = vrot.lane.b32.xlu0 %v3861_v57, %s4056_s16 }
 0x587   :  { %3596 = vmatpush3.bf16.msra.mxu1 %v3865_v56 }
 0x588   :  { %3601 = vmatprep.subr.bf16.mxu1 %v4052_v0 }
 0x589   :  { %511 = vrot.lane.b32.xlu0 %v505_v59, %s4056_s16 }
 0x58d   :  { %551 = vrot.lane.b32.xlu0 %v410_v28, %s4058_s29 }
 0x5f1   :  { %v660_v2 = vpop.permute.xlu1 %659 }
 0x5f7   :  { %v665_v3 = vpop.permute.xlu0 %664 }
 0x5f8   :  { %v668_v4 = vsel %vm52_vm4, %v660_v2, %v665_v3  ;;  %v3871_v2 = vld [vmem:[%s5028_s3 + $0x8] sm:$0xff]  }
 0x5f9   :  { %3598 = vmatmul.mubr.msk.bf16.vlgmr.msra.gmra.mxu1 %vm347_vm6, %v668_v4 }
 0x5fa   :  { %3609 = vmatprep.mubr.msk.bf16.mxu1 %vm4053_vm2, %v4052_v0  ;;  %3602 = vmatpush3.bf16.msra.mxu1 %v3867_v47 }
 0x5fb   :  { %v512_v5 = vpop.permute.xlu0 %511  ;;  %3603 = vmatprep.subr.bf16.mxu1 %v4052_v0 }
 0x5fe   :  { %3604 = vmatpush3.bf16.msra.mxu1 %v3868_v48 }
 0x5ff   :  { %v552_v6 = vpop.permute.xlu0 %551  ;;  %3605 = vmatprep.subr.bf16.mxu1 %v4052_v0 }
 0x600   :  { %554 = vst.msk [vmem:[#allocation6] sm:$0xff] %vm52_vm4, %v552_v6 }
 0x602   :  { %3606 = vmatpush3.bf16.msra.mxu1 %v3869_v50  ;;  %v3878_v50 = vld [vmem:[%s5028_s3 + $0x8] sm:$0xff]  }
 0x603   :  { %3607 = vmatprep.subr.bf16.mxu1 %v4052_v0 }
 0x606   :  { %3608 = vmatpush3.bf16.msra.mxu1 %v3870_v51 }
 0x607   :  { %v744_v7 = vld [vmem:[#allocation6] sm:$0xff]  ;;  %3613 = vmatprep.subr.bf16.mxu1 %v4052_v0 }
 0x608   :  { %750 = vrot.lane.b32.xlu0 %v744_v7, %s4056_s16 }
 0x63a   :  { %v498_v10 = vpop.f32.mrf.mxu1 }
 0x63b   :  { %v504_v11 = vadd.f32 %v4313_v9, %v498_v10 }
 0x63c   :  { %v3579_v12 = vpop.f32.mrf.mxu1 }
 0x63d   :  { %v506_v14 = vmul.f32 %v504_v11, %v4173_v20 }
 0x63e   :  { %v501_v15 = vpop.f32.mrf.mxu1 }
 0x63f   :  { %3965 = vtanh.f32 %v506_v14 }
 0x640   :  { %v3580_v17 = vpop.f32.mrf.mxu1 }
 0x64c   :  { %v3966_v18 = vpop.eup %3965 }
 0x64d   :  { %516 = vrot.lane.b32.xlu1 %v3966_v18, %s4056_s16  ;;  %v508_v21 = vmul.f32 0.5, %v3966_v18  ;;  %v163_v18 = vadd.f32 %v4165_v13, %v4170_v16 }
 0x64f   :  { %v509_v25 = vadd.f32 0.5, %v508_v21 }
 0x651   :  { %v514_v31 = vmul.f32 %v512_v5, %v509_v25 }
 0x67a   :  { %v751_v39 = vpop.permute.xlu0 %750 }
 0x6b9   :  { %v737_v19 = vpop.f32.mrf.mxu1 }
 0x6ba   :  { %v743_v22 = vadd.f32 %v4242_v1, %v737_v19 }
 0x6bb   :  { %v3599_v23 = vpop.f32.mrf.mxu1 }
 0x6bc   :  { %v745_v24 = vmul.f32 %v743_v22, %v4173_v20 }
 0x6bd   :  { %v740_v26 = vpop.f32.mrf.mxu1 }
 0x6be   :  { %3967 = vtanh.f32 %v745_v24 }
 0x6bf   :  { %v517_v27 = vpop.permute.xlu1 %516  ;;  %v3600_v29 = vpop.f32.mrf.mxu1 }
 0x6c0   :  { %v519_v28 = vmul.f32 %v517_v27, %v509_v25 }
 0x6c2   :  { %521 = vrot.lane.b32.xlu1 %v519_v28, %s4056_s16 }
 0x6cb   :  { %v3968_v30 = vpop.eup %3967 }
 0x6cc   :  { %755 = vrot.lane.b32.xlu1 %v3968_v30, %s4056_s16  ;;  %v747_v34 = vmul.f32 0.5, %v3968_v30 }
 0x6ce   :  { %v748_v35 = vadd.f32 0.5, %v747_v34 }
 0x6d0   :  { %v753_v40 = vmul.f32 %v751_v39, %v748_v35  ;;  %v3877_v39 = vld [vmem:[%s5031_s4] sm:$0xff]  }
 0x734   :  { %v522_v32 = vpop.permute.xlu1 %521 }
 0x735   :  { %v4322_v33 = vadd.f32 %v522_v32, %v514_v31 }
 0x737   :  { %3969 = vtanh.f32 %v4322_v33 }
 0x73e   :  { %v756_v36 = vpop.permute.xlu1 %755 }
 0x73f   :  { %v758_v37 = vmul.f32 %v756_v36, %v748_v35  ;;  %v3874_v36 = vld [vmem:[%s5031_s4 + $0x18] sm:$0xff]  }
 0x740   :  { %3622 = vmatpush3.bf16.msra.mxu0 %v3874_v36 }
 0x741   :  { %760 = vrot.lane.b32.xlu1 %v758_v37, %s4056_s16  ;;  %v3875_v37 = vld [vmem:[%s5031_s4 + $0x10] sm:$0xff]   ;;  %3623 = vmatprep.subr.bf16.mxu0 %v4052_v0 }
 0x744   :  { %v3970_v38 = vpop.eup %3969  ;;  %3624 = vmatpush3.bf16.msra.mxu0 %v3875_v37 }
 0x745   :  { %527 = vrot.lane.b32.xlu0 %v3970_v38, %s4056_s16  ;;  %v3876_v38 = vld [vmem:[%s5031_s4 + $0x8] sm:$0xff]   ;;  %3625 = vmatprep.subr.bf16.mxu0 %v4052_v0 }
 0x748   :  { %3626 = vmatpush3.bf16.msra.mxu0 %v3876_v38 }
 0x749   :  { %3627 = vmatprep.subr.bf16.mxu0 %v4052_v0 }
 0x74c   :  { %3628 = vmatpush3.bf16.msra.mxu0 %v3877_v39 }
 0x74d   :  { %3645 = vmatprep.subr.bf16.mxu0 %v4052_v0 }
 0x7b3   :  { %v761_v42 = vpop.permute.xlu1 %760 }
 0x7b4   :  { %v4327_v43 = vadd.f32 %v761_v42, %v753_v40 }
 0x7b6   :  { %3971 = vtanh.f32 %v4327_v43 }
 0x7b7   :  { %v528_v44 = vpop.permute.xlu0 %527 }
 0x7b8   :  { %v530_v45 = vmul.f32 %v528_v44, %v509_v25 }
 0x7ba   :  { %v3393_v46 = vpack.c.bf16 %v530_v45, %v530_v45 }
 0x7bc   :  { %558 = vrot.lane.b32.xlu1 %v3393_v46, %s4057_s28 }
 0x7c3   :  { %v3972_v49 = vpop.eup %3971 }
 0x7c4   :  { %766 = vrot.lane.b32.xlu0 %v3972_v49, %s4056_s16 }
 0x82e   :  { %v559_v52 = vpop.permute.xlu1 %558 }
 0x82f   :  { %561 = vst.msk [vmem:[#allocation7] sm:$0xf] %vm48_vm3, %v559_v52 }
 0x836   :  { %v3866_v53 = vld [vmem:[#allocation7] ss:$0 sps:$4 sm:$0xff]   ;;  %v767_v55 = vpop.permute.xlu0 %766 }
 0x837   :  { %v769_v56 = vmul.f32 %v767_v55, %v748_v35  ;;  %778 = vrot.lane.b32.xlu0 %v3866_v53, %s4056_s16  ;;  %v3879_v55 = vld [vmem:[%s5028_s3] sm:$0xff]  }
 0x839   :  { %v770_v57 = vpack.c.bf16 %v769_v56, %v769_v56 }
 0x83b   :  { %892 = vrot.lane.b32.xlu0 %v4270_v41, %s4058_s29  ;;  %773 = vrot.lane.b32.xlu1 %v770_v57, %s4057_s28  ;;  %v3872_v41 = vld [vmem:[%s5028_s3] sm:$0xff]  }
 0x83f   :  { %887 = vrot.lane.b32.xlu1 %v4287_v54, %s4057_s28 }
 0x8a9   :  { %v779_v59 = vpop.permute.xlu0 %778 }
 0x8ad   :  { %v774_v3 = vpop.permute.xlu1 %773  ;;  %v893_v4 = vpop.permute.xlu0 %892 }
 0x8ae   :  { %v782_v5 = vsel %vm52_vm4, %v774_v3, %v779_v59  ;;  %895 = vst.msk [vmem:[#allocation4] sm:$0xff] %vm52_vm4, %v893_v4 }
 0x8af   :  { %3610 = vmatmul.mubr.msk.bf16.vlgmr.msra.gmra.mxu1 %vm347_vm6, %v782_v5 }
 0x8b0   :  { %3614 = vmatpush3.bf16.msra.mxu1 %v3871_v2  ;;  %3617 = vmatprep.mubr.msk.bf16.mxu1 %vm4053_vm2, %v4052_v0 }
 0x8b1   :  { %v888_v54 = vpop.permute.xlu1 %887  ;;  %3615 = vmatprep.subr.bf16.mxu1 %v4052_v0 }
 0x8b2   :  { %890 = vst.msk [vmem:[#allocation3] sm:$0xf] %vm48_vm3, %v888_v54 }
 0x8b4   :  { %3616 = vmatpush3.bf16.msra.mxu1 %v3872_v41 }
 0x8b5   :  { %v982_v6 = vld [vmem:[#allocation4] sm:$0xff]  ;;  %3633 = vmatprep.subr.bf16.mxu1 %v4052_v0 }
 0x8b6   :  { %988 = vrot.lane.b32.xlu0 %v982_v6, %s4056_s16 }
 0x8b9   :  { %v921_v7 = vld [vmem:[#allocation3] sm:$0xf] }
 0x8ba   :  { %3618 = vmatmul.mubr.msk.bf16.vlgmr.msra.gmra.mxu1 %vm52_vm4, %v921_v7  ;;  %898 = vrot.lane.b32.xlu0 %v770_v57, %s4057_s28 }
 0x8bb   :  { %3641 = vmatprep.mubr.msk.bf16.mxu1 %vm4053_vm2, %v4052_v0 }
 0x928   :  { %v989_v10 = vpop.permute.xlu0 %988 }
 0x92c   :  { %v899_v11 = vpop.permute.xlu0 %898 }
 0x92d   :  { %901 = vst.msk [vmem:[#allocation5] sm:$0xf] %vm48_vm3, %v899_v11 }
 0x934   :  { %v3873_v35 = vld [vmem:[#allocation5] ss:$0 sps:$4 sm:$0xff]  }
 0x96f   :  { %v851_v12 = vpop.f32.mrf.mxu1 }
 0x971   :  { %v3611_v14 = vpop.f32.mrf.mxu1 }
 0x973   :  { %v854_v15 = vpop.f32.mrf.mxu1 }
 0x974   :  { %v166_v15 = vadd.f32 %v4229_v58, %v4170_v16 }
 0x975   :  { %v3612_v17 = vpop.f32.mrf.mxu1 }
 0x97a   :  { %v975_v19 = vpop.f32.mrf.mxu1 }
 0x97b   :  { %v981_v21 = vadd.f32 %v975_v19, %v163_v18 }
 0x97c   :  { %v3619_v22 = vpop.f32.mrf.mxu1 }
 0x97d   :  { %v983_v23 = vmul.f32 %v981_v21, %v4173_v20 }
 0x97e   :  { %v978_v24 = vpop.f32.mrf.mxu1 }
 0x97f   :  { %3973 = vtanh.f32 %v983_v23 }
 0x980   :  { %v3620_v25 = vpop.f32.mrf.mxu1 }
 0x98c   :  { %v3974_v26 = vpop.eup %3973 }
 0x98d   :  { %993 = vrot.lane.b32.xlu1 %v3974_v26, %s4056_s16  ;;  %v985_v27 = vmul.f32 0.5, %v3974_v26 }
 0x98f   :  { %v986_v28 = vadd.f32 0.5, %v985_v27 }
 0x991   :  { %v991_v31 = vmul.f32 %v989_v10, %v986_v28 }
 0x9ff   :  { %v994_v29 = vpop.permute.xlu1 %993 }
 0xa00   :  { %v996_v30 = vmul.f32 %v994_v29, %v986_v28 }
 0xa02   :  { %998 = vrot.lane.b32.xlu1 %v996_v30, %s4056_s16 }
 0xa74   :  { %v999_v32 = vpop.permute.xlu1 %998 }
 0xa75   :  { %v1001_v13 = vadd.f32 %v999_v32, %v991_v31 }
 0xa77   :  { %3975 = vtanh.f32 %v1001_v13 }
 0xa84   :  { %v3976_v34 = vpop.eup %3975 }
 0xa85   :  { %1004 = vrot.lane.b32.xlu1 %v3976_v34, %s4056_s16 }
 0xa89   :  { %1016 = vrot.lane.b32.xlu1 %v3873_v35, %s4056_s16 }
 0xa8d   :  { %563 = vrot.lane.b32.xlu1 %v4322_v33, %s4058_s29  ;;  %v857_v33 = vadd.f32 %v4313_v9, %v851_v12 }
 0xa8f   :  { %v859_v40 = vmul.f32 %v857_v33, %v4173_v20 }
 0xa91   :  { %3977 = vtanh.f32 %v859_v40 }
 0xa9e   :  { %v3978_v48 = vpop.eup %3977 }
 0xa9f   :  { %v861_v53 = vmul.f32 0.5, %v3978_v48 }
 0xaf7   :  { %v1005_v42 = vpop.permute.xlu1 %1004 }
 0xaf8   :  { %v1007_v44 = vmul.f32 %v1005_v42, %v986_v28 }
 0xafa   :  { %v1008_v45 = vpack.c.bf16 %v1007_v44, %v1007_v44  ;;  %v3881_v44 = vld [vmem:[%s5033_s6 + $0x18] sm:$0xff]  }
 0xafb   :  { %v1017_v46 = vpop.permute.xlu1 %1016  ;;  %3634 = vmatpush3.bf16.msra.mxu1 %v3881_v44 }
 0xafc   :  { %1011 = vrot.lane.b32.xlu0 %v1008_v45, %s4057_s28  ;;  %3635 = vmatprep.subr.bf16.mxu1 %v4052_v0 }
 0xaff   :  { %v564_v47 = vpop.permute.xlu1 %563 }
 0xb00   :  { %566 = vst.msk [vmem:[#allocation8] sm:$0xff] %vm52_vm4, %v564_v47  ;;  %1239 = vrot.lane.b32.xlu0 %v1008_v45, %s4057_s28  ;;  %v3882_v45 = vld [vmem:[%s5033_s6 + $0x10] sm:$0xff]   ;;  %v3883_v47 = vld [vmem:[%s5033_s6 + $0x8] sm:$0xff]  }
 0xb01   :  { %3636 = vmatpush3.bf16.msra.mxu1 %v3882_v45  ;;  %v4531_v45 = vld [vmem:[%s5030_s2] ss:$0 sm:$0xff] }
 0xb02   :  { %3637 = vmatprep.subr.bf16.mxu1 %v4052_v0 }
 0xb04   :  { %869 = vrot.lane.b32.xlu0 %v3978_v48, %s4056_s16 }
 0xb05   :  { %3638 = vmatpush3.bf16.msra.mxu1 %v3883_v47 }
 0xb06   :  { %3639 = vmatprep.subr.bf16.mxu1 %v4052_v0 }
 0xb07   :  { %v858_v49 = vld [vmem:[#allocation8] sm:$0xff] }
 0xb08   :  { %864 = vrot.lane.b32.xlu1 %v858_v49, %s4056_s16 }
 0xb0c   :  { %903 = vrot.lane.b32.xlu1 %v4327_v43, %s4058_s29  ;;  %v862_v43 = vadd.f32 0.5, %v861_v53 }
 0xb6e   :  { %v1012_v51 = vpop.permute.xlu0 %1011 }
 0xb6f   :  { %v1020_v52 = vsel %vm52_vm4, %v1012_v51, %v1017_v46 }
 0xb70   :  { %3630 = vmatmul.mubr.msk.bf16.vlgmr.msra.gmra.mxu0 %vm347_vm6, %v1020_v52  ;;  %v3884_v52 = vld [vmem:[%s5033_s6] sm:$0xff]  }
 0xb71   :  { %3646 = vmatpush3.bf16.msra.mxu0 %v3878_v50  ;;  %3649 = vmatprep.mubr.msk.bf16.mxu0 %vm4053_vm2, %v4052_v0 }
 0xb72   :  { %v1240_v56 = vpop.permute.xlu0 %1239  ;;  %3647 = vmatprep.subr.bf16.mxu0 %v4052_v0  ;;  %3640 = vmatpush3.bf16.msra.mxu1 %v3884_v52 }
 0xb73   :  { %1242 = vst.msk [vmem:[#allocation3] sm:$0xf] %vm48_vm3, %v1240_v56  ;;  %3653 = vmatprep.subr.bf16.mxu1 %v4052_v0 }
 0xb75   :  { %3648 = vmatpush3.bf16.msra.mxu0 %v3879_v55 }
 0xb76   :  { %v870_v57 = vpop.permute.xlu0 %869  ;;  %3665 = vmatprep.subr.bf16.mxu0 %v4052_v0 }
 0xb77   :  { %v872_v59 = vmul.f32 %v870_v57, %v862_v43 }
 0xb79   :  { %874 = vrot.lane.b32.xlu0 %v872_v59, %s4056_s16 }
 0xb7a   :  { %v865_v2 = vpop.permute.xlu1 %864  ;;  %v1273_v3 = vld [vmem:[#allocation3] sm:$0xf] }
 0xb7b   :  { %3650 = vmatmul.mubr.msk.bf16.vlgmr.msra.gmra.mxu0 %vm52_vm4, %v1273_v3  ;;  %v867_v27 = vmul.f32 %v865_v2, %v862_v43  ;;  %v3886_v3 = vld [vmem:[%s5031_s4 + $0x18] sm:$0xff]  }
 0xb7c   :  { %3673 = vmatprep.mubr.msk.bf16.mxu0 %vm4053_vm2, %v4052_v0 }
 0xb7e   :  { %v904_v4 = vpop.permute.xlu1 %903 }
 0xb7f   :  { %906 = vst.msk [vmem:[#allocation6] sm:$0xff] %vm52_vm4, %v904_v4 }
 0xb86   :  { %v1096_v5 = vld [vmem:[#allocation6] sm:$0xff] }
 0xb87   :  { %1102 = vrot.lane.b32.xlu1 %v1096_v5, %s4056_s16 }
 0xb8b   :  { %1244 = vrot.lane.b32.xlu1 %v1001_v13, %s4058_s29 }
 0xbeb   :  { %v875_v26 = vpop.permute.xlu0 %874 }
 0xbec   :  { %v4437_v28 = vadd.f32 %v875_v26, %v867_v27 }
 0xbf9   :  { %v1103_v41 = vpop.permute.xlu1 %1102 }
 0xbfd   :  { %v1245_v54 = vpop.permute.xlu1 %1244 }
 0xbfe   :  { %1247 = vst.msk [vmem:[#allocation4] sm:$0xff] %vm52_vm4, %v1245_v54 }
 0xc05   :  { %v1334_v13 = vld [vmem:[#allocation4] sm:$0xff] }
 0xc30   :  { %v1089_v6 = vpop.f32.mrf.mxu0 }
 0xc31   :  { %v1095_v7 = vadd.f32 %v4242_v1, %v1089_v6  ;;  %v3887_v6 = vld [vmem:[%s5031_s4 + $0x10] sm:$0xff]  }
 0xc32   :  { %v3631_v10 = vpop.f32.mrf.mxu0 }
 0xc33   :  { %v1097_v11 = vmul.f32 %v1095_v7, %v4173_v20 }
 0xc34   :  { %v1092_v12 = vpop.f32.mrf.mxu0 }
 0xc35   :  { %3979 = vtanh.f32 %v1097_v11  ;;  %v3888_v11 = vld [vmem:[%s5031_s4 + $0x8] sm:$0xff]   ;;  %v3889_v12 = vld [vmem:[%s5031_s4] sm:$0xff]  }
 0xc36   :  { %v3632_v14 = vpop.f32.mrf.mxu0 }
 0xc3b   :  { %v1327_v17 = vpop.f32.mrf.mxu0 }
 0xc3c   :  { %v1333_v18 = vadd.f32 %v1327_v17, %v166_v15 }
 0xc3d   :  { %v3651_v19 = vpop.f32.mrf.mxu0 }
 0xc3e   :  { %v1335_v21 = vmul.f32 %v1333_v18, %v4173_v20  ;;  %v3890_v18 = vld [vmem:[%s5028_s3 + $0x8] sm:$0xff]  }
 0xc3f   :  { %v1330_v22 = vpop.f32.mrf.mxu0 }
 0xc40   :  { %3981 = vtanh.f32 %v1335_v21  ;;  %v3891_v22 = vld [vmem:[%s5028_s3] sm:$0xff]  }
 0xc41   :  { %v3652_v23 = vpop.f32.mrf.mxu0  ;;  %3983 = vtanh.f32 %v4437_v28 }
 0xc42   :  { %v3980_v24 = vpop.eup %3979 }
 0xc43   :  { %1107 = vrot.lane.b32.xlu0 %v3980_v24, %s4056_s16  ;;  %v1099_v16 = vmul.f32 0.5, %v3980_v24 }
 0xc45   :  { %v1100_v58 = vadd.f32 0.5, %v1099_v16 }
 0xc47   :  { %v1105_v37 = vmul.f32 %v1103_v41, %v1100_v58 }
 0xc4d   :  { %v3982_v25 = vpop.eup %3981 }
 0xc4e   :  { %1345 = vrot.lane.b32.xlu1 %v3982_v25, %s4056_s16  ;;  %v3984_v31 = vpop.eup %3983  ;;  %v1337_v32 = vmul.f32 0.5, %v3982_v25 }
 0xc50   :  { %v1338_v34 = vadd.f32 0.5, %v1337_v32 }
 0xcb5   :  { %v1108_v29 = vpop.permute.xlu0 %1107 }
 0xcb6   :  { %v1110_v30 = vmul.f32 %v1108_v29, %v1100_v58 }
 0xcb8   :  { %1112 = vrot.lane.b32.xlu0 %v1110_v30, %s4056_s16 }
 0xcbc   :  { %880 = vrot.lane.b32.xlu0 %v3984_v31, %s4056_s16 }
 0xcc0   :  { %1340 = vrot.lane.b32.xlu0 %v1334_v13, %s4056_s16  ;;  %v1346_v35 = vpop.permute.xlu1 %1345 }
 0xcc1   :  { %v1348_v36 = vmul.f32 %v1346_v35, %v1338_v34 }
 0xcc4   :  { %1350 = vrot.lane.b32.xlu0 %v1348_v36, %s4056_s16 }
 0xd2a   :  { %v1113_v38 = vpop.permute.xlu0 %1112 }
 0xd2b   :  { %v4444_v39 = vadd.f32 %v1113_v38, %v1105_v37 }
 0xd2d   :  { %3985 = vtanh.f32 %v4444_v39 }
 0xd2e   :  { %v881_v33 = vpop.permute.xlu0 %880 }
 0xd2f   :  { %v883_v40 = vmul.f32 %v881_v33, %v862_v43 }
 0xd31   :  { %v3396_v42 = vpack.c.bf16 %v883_v40, %v883_v40 }
 0xd32   :  { %v1341_v48 = vpop.permute.xlu0 %1340 }
 0xd33   :  { %910 = vrot.lane.b32.xlu1 %v3396_v42, %s4057_s28  ;;  %v1343_v50 = vmul.f32 %v1341_v48, %v1338_v34 }
 0xd36   :  { %v1351_v49 = vpop.permute.xlu0 %1350 }
 0xd37   :  { %v4461_v51 = vadd.f32 %v1351_v49, %v1343_v50 }
 0xd39   :  { %3987 = vtanh.f32 %v4461_v51 }
 0xd3a   :  { %v3986_v46 = vpop.eup %3985 }
 0xd3b   :  { %1118 = vrot.lane.b32.xlu1 %v3986_v46, %s4056_s16  ;;  %v171_v46 = vadd.f32 %v4531_v45, %v4233_v61 }
 0xd46   :  { %v3988_v59 = vpop.eup %3987 }
 0xda5   :  { %v911_v53 = vpop.permute.xlu1 %910 }
 0xda6   :  { %913 = vst.msk [vmem:[#allocation7] sm:$0xf] %vm48_vm3, %v911_v53 }
 0xdad   :  { %v1119_v55 = vpop.permute.xlu1 %1118  ;;  %v3880_v56 = vld [vmem:[#allocation7] ss:$0 sps:$4 sm:$0xff]  }
 0xdae   :  { %v1121_v43 = vmul.f32 %v1119_v55, %v1100_v58  ;;  %1130 = vrot.lane.b32.xlu1 %v3880_v56, %s4056_s16 }
 0xdb0   :  { %v1122_v57 = vpack.c.bf16 %v1121_v43, %v1121_v43 }
 0xdb2   :  { %1125 = vrot.lane.b32.xlu0 %v1122_v57, %s4057_s28  ;;  %1356 = vrot.lane.b32.xlu1 %v3988_v59, %s4056_s16 }
 0xdb6   :  { %1250 = vrot.lane.b32.xlu0 %v1122_v57, %s4057_s28 }
 0xe20   :  { %v1131_v2 = vpop.permute.xlu1 %1130 }
 0xe24   :  { %v1126_v4 = vpop.permute.xlu0 %1125  ;;  %v1357_v41 = vpop.permute.xlu1 %1356 }
 0xe25   :  { %v1134_v5 = vsel %vm52_vm4, %v1126_v4, %v1131_v2  ;;  %v1359_v54 = vmul.f32 %v1357_v41, %v1338_v34 }
 0xe26   :  { %3642 = vmatmul.mubr.msk.bf16.vlgmr.msra.gmra.mxu1 %vm347_vm6, %v1134_v5 }
 0xe27   :  { %3654 = vmatpush3.bf16.msra.mxu1 %v3886_v3  ;;  %3661 = vmatprep.mubr.msk.bf16.mxu1 %vm4053_vm2, %v4052_v0  ;;  %v1360_v7 = vpack.c.bf16 %v1359_v54, %v1359_v54 }
 0xe28   :  { %v1251_v10 = vpop.permute.xlu0 %1250  ;;  %3655 = vmatprep.subr.bf16.mxu1 %v4052_v0 }
 0xe29   :  { %1253 = vst.msk [vmem:[#allocation5] sm:$0xf] %vm48_vm3, %v1251_v10  ;;  %1363 = vrot.lane.b32.xlu0 %v1360_v7, %s4057_s28 }
 0xe2b   :  { %3656 = vmatpush3.bf16.msra.mxu1 %v3887_v6 }
 0xe2c   :  { %3657 = vmatprep.subr.bf16.mxu1 %v4052_v0 }
 0xe2d   :  { %1591 = vrot.lane.b32.xlu0 %v1360_v7, %s4057_s28 }
 0xe2f   :  { %3658 = vmatpush3.bf16.msra.mxu1 %v3888_v11 }
 0xe30   :  { %v3885_v14 = vld [vmem:[#allocation5] ss:$0 sps:$4 sm:$0xff]   ;;  %3659 = vmatprep.subr.bf16.mxu1 %v4052_v0 }
 0xe31   :  { %1368 = vrot.lane.b32.xlu1 %v3885_v14, %s4056_s16 }
 0xe33   :  { %3660 = vmatpush3.bf16.msra.mxu1 %v3889_v12 }
 0xe34   :  { %3677 = vmatprep.subr.bf16.mxu1 %v4052_v0 }
 0xe35   :  { %915 = vrot.lane.b32.xlu1 %v4437_v28, %s4058_s29 }
 0xe9b   :  { %v1364_v15 = vpop.permute.xlu0 %1363 }
 0xe9f   :  { %v1592_v17 = vpop.permute.xlu0 %1591 }
 0xea0   :  { %1594 = vst.msk [vmem:[#allocation3] sm:$0xf] %vm48_vm3, %v1592_v17 }
 0xea3   :  { %v1369_v19 = vpop.permute.xlu1 %1368 }
 0xea4   :  { %v1372_v21 = vsel %vm52_vm4, %v1364_v15, %v1369_v19  ;;  %v3893_v19 = vld [vmem:[%s5033_s6 + $0x18] sm:$0xff]  }
 0xea5   :  { %3662 = vmatmul.mubr.msk.bf16.vlgmr.msra.gmra.mxu1 %vm347_vm6, %v1372_v21  ;;  %3666 = vmatpush3.bf16.msra.mxu0 %v3893_v19  ;;  %v3894_v21 = vld [vmem:[%s5033_s6 + $0x10] sm:$0xff]   ;;  %v174_v19 = vadd.f32 %v4531_v45, %v4237_v63 }
 0xea6   :  { %3678 = vmatpush3.bf16.msra.mxu1 %v3890_v18  ;;  %3681 = vmatprep.mubr.msk.bf16.mxu1 %vm4053_vm2, %v4052_v0 }
 0xea7   :  { %v916_v23 = vpop.permute.xlu1 %915  ;;  %3679 = vmatprep.subr.bf16.mxu1 %v4052_v0  ;;  %v1625_v24 = vld [vmem:[#allocation3] sm:$0xf]  ;;  %3667 = vmatprep.subr.bf16.mxu0 %v4052_v0 }
 0xea8   :  { %918 = vst.msk [vmem:[#allocation8] sm:$0xff] %vm52_vm4, %v916_v23  ;;  %v3895_v23 = vld [vmem:[%s5033_s6 + $0x8] sm:$0xff]  }
 0xea9   :  { %3668 = vmatpush3.bf16.msra.mxu0 %v3894_v21 }
 0xeaa   :  { %3680 = vmatpush3.bf16.msra.mxu1 %v3891_v22  ;;  %3669 = vmatprep.subr.bf16.mxu0 %v4052_v0 }
 0xeab   :  { %3697 = vmatprep.subr.bf16.mxu1 %v4052_v0 }
 0xead   :  { %3682 = vmatmul.mubr.msk.bf16.vlgmr.msra.gmra.mxu1 %vm52_vm4, %v1625_v24  ;;  %3670 = vmatpush3.bf16.msra.mxu0 %v3895_v23 }
 0xeae   :  { %3705 = vmatprep.mubr.msk.bf16.mxu1 %vm4053_vm2, %v4052_v0  ;;  %3671 = vmatprep.subr.bf16.mxu0 %v4052_v0 }
 0xeaf   :  { %v1210_v25 = vld [vmem:[#allocation8] sm:$0xff] }
 0xeb0   :  { %1216 = vrot.lane.b32.xlu1 %v1210_v25, %s4056_s16 }
 0xeb4   :  { %1255 = vrot.lane.b32.xlu1 %v4444_v39, %s4058_s29 }
 0xee6   :  { %v1203_v26 = vpop.f32.mrf.mxu1 }
 0xee7   :  { %v1209_v27 = vadd.f32 %v4313_v9, %v1203_v26 }
 0xee8   :  { %v3643_v28 = vpop.f32.mrf.mxu1 }
 0xee9   :  { %v1211_v16 = vmul.f32 %v1209_v27, %v4173_v20  ;;  %v3896_v28 = vld [vmem:[%s5033_s6] sm:$0xff]  }
 0xeea   :  { %v1206_v58 = vpop.f32.mrf.mxu1  ;;  %3672 = vmatpush3.bf16.msra.mxu0 %v3896_v28 }
 0xeeb   :  { %3989 = vtanh.f32 %v1211_v16  ;;  %3685 = vmatprep.subr.bf16.mxu0 %v4052_v0 }
 0xeec   :  { %v3644_v29 = vpop.f32.mrf.mxu1 }
 0xef8   :  { %v3990_v30 = vpop.eup %3989 }
 0xef9   :  { %1221 = vrot.lane.b32.xlu0 %v3990_v30, %s4056_s16  ;;  %v1213_v34 = vmul.f32 0.5, %v3990_v30 }
 0xefb   :  { %v1214_v39 = vadd.f32 0.5, %v1213_v34  ;;  %v3898_v34 = vld [vmem:[%s5031_s4 + $0x18] sm:$0xff]  }
 0xf22   :  { %v1217_v31 = vpop.permute.xlu1 %1216 }
 0xf23   :  { %v1219_v61 = vmul.f32 %v1217_v31, %v1214_v39 }
 0xf26   :  { %v1256_v32 = vpop.permute.xlu1 %1255 }
 0xf27   :  { %1258 = vst.msk [vmem:[#allocation6] sm:$0xff] %vm52_vm4, %v1256_v32 }
 0xf2e   :  { %v1448_v13 = vld [vmem:[#allocation6] sm:$0xff] }
 0xf2f   :  { %1454 = vrot.lane.b32.xlu1 %v1448_v13, %s4056_s16 }
 0xf33   :  { %1596 = vrot.lane.b32.xlu1 %v4461_v51, %s4058_s29 }
 0xf65   :  { %v1441_v35 = vpop.f32.mrf.mxu1 }
 0xf66   :  { %v1447_v36 = vadd.f32 %v4242_v1, %v1441_v35 }
 0xf67   :  { %v3663_v37 = vpop.f32.mrf.mxu1 }
 0xf68   :  { %v1449_v38 = vmul.f32 %v1447_v36, %v4173_v20 }
 0xf69   :  { %v1444_v33 = vpop.f32.mrf.mxu1 }
 0xf6a   :  { %3991 = vtanh.f32 %v1449_v38 }
 0xf6b   :  { %v1222_v40 = vpop.permute.xlu0 %1221  ;;  %v3664_v44 = vpop.f32.mrf.mxu1 }
 0xf6c   :  { %v1224_v42 = vmul.f32 %v1222_v40, %v1214_v39  ;;  %v3901_v44 = vld [vmem:[%s5031_s4] sm:$0xff]  }
 0xf6d   :  { %v1679_v1 = vpop.f32.mrf.mxu1 }
 0xf6e   :  { %1226 = vrot.lane.b32.xlu0 %v1224_v42, %s4056_s16  ;;  %v1685_v47 = vadd.f32 %v1679_v1, %v171_v46  ;;  %v3900_v42 = vld [vmem:[%s5031_s4 + $0x8] sm:$0xff]  }
 0xf6f   :  { %v3683_v48 = vpop.f32.mrf.mxu1 }
 0xf70   :  { %v1687_v49 = vmul.f32 %v1685_v47, %v4173_v20  ;;  %v3902_v48 = vld [vmem:[%s5028_s3 + $0x8] sm:$0xff]  }
 0xf71   :  { %v1682_v50 = vpop.f32.mrf.mxu1 }
 0xf72   :  { %3993 = vtanh.f32 %v1687_v49 }
 0xf73   :  { %v3684_v51 = vpop.f32.mrf.mxu1 }
 0xf74   :  { %v3903_v51 = vld [vmem:[%s5028_s3] sm:$0xff]  }
 0xf77   :  { %v3992_v52 = vpop.eup %3991 }
 0xf78   :  { %1459 = vrot.lane.b32.xlu0 %v3992_v52, %s4056_s16  ;;  %v1451_v59 = vmul.f32 0.5, %v3992_v52 }
 0xf7a   :  { %v1452_v2 = vadd.f32 0.5, %v1451_v59 }
 0xf7f   :  { %v3994_v53 = vpop.eup %3993 }
 0xf80   :  { %1697 = vrot.lane.b32.xlu1 %v3994_v53, %s4056_s16  ;;  %v1689_v41 = vmul.f32 0.5, %v3994_v53 }
 0xf82   :  { %v1690_v7 = vadd.f32 0.5, %v1689_v41 }
 0xfa1   :  { %v1455_v55 = vpop.permute.xlu1 %1454 }
 0xfa2   :  { %v1457_v11 = vmul.f32 %v1455_v55, %v1452_v2 }
 0xfa5   :  { %v1597_v56 = vpop.permute.xlu1 %1596 }
 0xfa6   :  { %1599 = vst.msk [vmem:[#allocation4] sm:$0xff] %vm52_vm4, %v1597_v56 }
 0xfad   :  { %v1686_v6 = vld [vmem:[#allocation4] sm:$0xff] }
 0xfe0   :  { %v1227_v43 = vpop.permute.xlu0 %1226 }
 0xfe1   :  { %v4540_v57 = vadd.f32 %v1227_v43, %v1219_v61 }
 0xfe3   :  { %3995 = vtanh.f32 %v4540_v57 }
 0xfea   :  { %v1460_v3 = vpop.permute.xlu0 %1459 }
 0xfeb   :  { %v1462_v4 = vmul.f32 %v1460_v3, %v1452_v2 }
 0xfed   :  { %1464 = vrot.lane.b32.xlu0 %v1462_v4, %s4056_s16 }
 0xff0   :  { %v3996_v5 = vpop.eup %3995 }
 0xff1   :  { %1232 = vrot.lane.b32.xlu0 %v3996_v5, %s4056_s16 }
 0xff2   :  { %v1698_v54 = vpop.permute.xlu1 %1697 }
 0xff3   :  { %v1700_v10 = vmul.f32 %v1698_v54, %v1690_v7 }
 0xff5   :  { %1692 = vrot.lane.b32.xlu0 %v1686_v6, %s4056_s16  ;;  %v4632_v6 = vld [vmem:[%s5032_s5] ss:$0 sm:$0xff] }
 0xff9   :  { %1702 = vrot.lane.b32.xlu0 %v1700_v10, %s4056_s16 }
0x105f   :  { %v1465_v12 = vpop.permute.xlu0 %1464 }
0x1060   :  { %v4547_v14 = vadd.f32 %v1465_v12, %v1457_v11 }
0x1062   :  { %3997 = vtanh.f32 %v4547_v14 }
0x1063   :  { %v1233_v15 = vpop.permute.xlu0 %1232 }
0x1064   :  { %v1235_v17 = vmul.f32 %v1233_v15, %v1214_v39  ;;  %v3899_v39 = vld [vmem:[%s5031_s4 + $0x10] sm:$0xff]  }
0x1066   :  { %v3399_v18 = vpack.c.bf16 %v1235_v17, %v1235_v17 }
0x1067   :  { %v1693_v24 = vpop.permute.xlu0 %1692 }
0x1068   :  { %1262 = vrot.lane.b32.xlu1 %v3399_v18, %s4057_s28  ;;  %v1695_v26 = vmul.f32 %v1693_v24, %v1690_v7 }
0x106b   :  { %v1703_v25 = vpop.permute.xlu0 %1702 }
0x106c   :  { %v4564_v27 = vadd.f32 %v1703_v25, %v1695_v26 }
0x106e   :  { %3999 = vtanh.f32 %v4564_v27 }
0x106f   :  { %v3998_v22 = vpop.eup %3997 }
0x1070   :  { %1470 = vrot.lane.b32.xlu1 %v3998_v22, %s4056_s16 }
0x107b   :  { %v4000_v32 = vpop.eup %3999 }
0x10da   :  { %v1263_v16 = vpop.permute.xlu1 %1262 }
0x10db   :  { %1265 = vst.msk [vmem:[#allocation7] sm:$0xf] %vm48_vm3, %v1263_v16 }
0x10e2   :  { %v1471_v58 = vpop.permute.xlu1 %1470  ;;  %v3892_v29 = vld [vmem:[#allocation7] ss:$0 sps:$4 sm:$0xff]  }
0x10e3   :  { %v1473_v30 = vmul.f32 %v1471_v58, %v1452_v2  ;;  %1482 = vrot.lane.b32.xlu1 %v3892_v29, %s4056_s16 }
0x10e5   :  { %v1474_v31 = vpack.c.bf16 %v1473_v30, %v1473_v30 }
0x10e7   :  { %1477 = vrot.lane.b32.xlu0 %v1474_v31, %s4057_s28  ;;  %1708 = vrot.lane.b32.xlu1 %v4000_v32, %s4056_s16 }
0x10eb   :  { %1602 = vrot.lane.b32.xlu0 %v1474_v31, %s4057_s28 }
0x1155   :  { %v1483_v13 = vpop.permute.xlu1 %1482 }
0x1159   :  { %v1478_v35 = vpop.permute.xlu0 %1477  ;;  %v1709_v37 = vpop.permute.xlu1 %1708 }
0x115a   :  { %v1486_v36 = vsel %vm52_vm4, %v1478_v35, %v1483_v13  ;;  %v1711_v38 = vmul.f32 %v1709_v37, %v1690_v7 }
0x115b   :  { %3674 = vmatmul.mubr.msk.bf16.vlgmr.msra.gmra.mxu0 %vm347_vm6, %v1486_v36 }
0x115c   :  { %3686 = vmatpush3.bf16.msra.mxu0 %v3898_v34  ;;  %3693 = vmatprep.mubr.msk.bf16.mxu0 %vm4053_vm2, %v4052_v0  ;;  %v1712_v33 = vpack.c.bf16 %v1711_v38, %v1711_v38 }
0x115d   :  { %v1603_v40 = vpop.permute.xlu0 %1602  ;;  %3687 = vmatprep.subr.bf16.mxu0 %v4052_v0 }
0x115e   :  { %1605 = vst.msk [vmem:[#allocation5] sm:$0xf] %vm48_vm3, %v1603_v40  ;;  %1715 = vrot.lane.b32.xlu0 %v1712_v33, %s4057_s28 }
0x1160   :  { %3688 = vmatpush3.bf16.msra.mxu0 %v3899_v39 }
0x1161   :  { %3689 = vmatprep.subr.bf16.mxu0 %v4052_v0 }
0x1162   :  { %1943 = vrot.lane.b32.xlu0 %v1712_v33, %s4057_s28 }
0x1164   :  { %3690 = vmatpush3.bf16.msra.mxu0 %v3900_v42 }
0x1165   :  { %v3897_v46 = vld [vmem:[#allocation5] ss:$0 sps:$4 sm:$0xff]   ;;  %3691 = vmatprep.subr.bf16.mxu0 %v4052_v0 }
0x1166   :  { %1720 = vrot.lane.b32.xlu1 %v3897_v46, %s4056_s16 }
0x1168   :  { %3692 = vmatpush3.bf16.msra.mxu0 %v3901_v44 }
0x1169   :  { %3709 = vmatprep.subr.bf16.mxu0 %v4052_v0 }
0x116a   :  { %1267 = vrot.lane.b32.xlu1 %v4540_v57, %s4058_s29 }
0x11d0   :  { %v1716_v1 = vpop.permute.xlu0 %1715 }
0x11d4   :  { %v1944_v47 = vpop.permute.xlu0 %1943 }
0x11d5   :  { %1946 = vst.msk [vmem:[#allocation3] sm:$0xf] %vm48_vm3, %v1944_v47 }
0x11d8   :  { %v1721_v49 = vpop.permute.xlu1 %1720 }
0x11d9   :  { %v1724_v50 = vsel %vm52_vm4, %v1716_v1, %v1721_v49  ;;  %v3906_v49 = vld [vmem:[%s5033_s6 + $0x10] sm:$0xff]  }
0x11da   :  { %3694 = vmatmul.mubr.msk.bf16.vlgmr.msra.gmra.mxu0 %vm347_vm6, %v1724_v50 }
0x11db   :  { %3710 = vmatpush3.bf16.msra.mxu0 %v3902_v48  ;;  %3713 = vmatprep.mubr.msk.bf16.mxu0 %vm4053_vm2, %v4052_v0  ;;  %v3905_v48 = vld [vmem:[%s5033_s6 + $0x18] sm:$0xff]  }
0x11dc   :  { %v1268_v52 = vpop.permute.xlu1 %1267  ;;  %3711 = vmatprep.subr.bf16.mxu0 %v4052_v0  ;;  %v1977_v53 = vld [vmem:[#allocation3] sm:$0xf]  ;;  %3698 = vmatpush3.bf16.msra.mxu1 %v3905_v48  ;;  %v179_v48 = vadd.f32 %v4531_v45, %v4231_v60 }
0x11dd   :  { %1270 = vst.msk [vmem:[#allocation8] sm:$0xff] %vm52_vm4, %v1268_v52  ;;  %3699 = vmatprep.subr.bf16.mxu1 %v4052_v0 }
0x11df   :  { %3712 = vmatpush3.bf16.msra.mxu0 %v3903_v51  ;;  %v3907_v51 = vld [vmem:[%s5033_s6 + $0x8] sm:$0xff]  }
0x11e0   :  { %3729 = vmatprep.subr.bf16.mxu0 %v4052_v0  ;;  %3700 = vmatpush3.bf16.msra.mxu1 %v3906_v49 }
0x11e1   :  { %3701 = vmatprep.subr.bf16.mxu1 %v4052_v0 }
0x11e2   :  { %3714 = vmatmul.mubr.msk.bf16.vlgmr.msra.gmra.mxu0 %vm52_vm4, %v1977_v53 }
0x11e3   :  { %3737 = vmatprep.mubr.msk.bf16.mxu0 %vm4053_vm2, %v4052_v0 }
0x11e4   :  { %v1562_v55 = vld [vmem:[#allocation8] sm:$0xff]  ;;  %3702 = vmatpush3.bf16.msra.mxu1 %v3907_v51 }
0x11e5   :  { %1568 = vrot.lane.b32.xlu1 %v1562_v55, %s4056_s16  ;;  %3703 = vmatprep.subr.bf16.mxu1 %v4052_v0 }
0x11e9   :  { %1607 = vrot.lane.b32.xlu1 %v4547_v14, %s4058_s29 }
0x121b   :  { %v1555_v56 = vpop.f32.mrf.mxu0 }
0x121c   :  { %v1561_v61 = vadd.f32 %v4313_v9, %v1555_v56 }
0x121d   :  { %v3675_v43 = vpop.f32.mrf.mxu0 }
0x121e   :  { %v1563_v57 = vmul.f32 %v1561_v61, %v4173_v20  ;;  %v3908_v61 = vld [vmem:[%s5033_s6] sm:$0xff]  }
0x121f   :  { %v1558_v59 = vpop.f32.mrf.mxu0  ;;  %3704 = vmatpush3.bf16.msra.mxu1 %v3908_v61 }
0x1220   :  { %4001 = vtanh.f32 %v1563_v57  ;;  %3717 = vmatprep.subr.bf16.mxu1 %v4052_v0 }
0x1221   :  { %v3676_v2 = vpop.f32.mrf.mxu0 }
0x122d   :  { %v4002_v3 = vpop.eup %4001 }
0x122e   :  { %1573 = vrot.lane.b32.xlu0 %v4002_v3, %s4056_s16  ;;  %v1565_v9 = vmul.f32 0.5, %v4002_v3 }
0x1230   :  { %v1566_v12 = vadd.f32 0.5, %v1565_v9 }
0x1257   :  { %v1569_v4 = vpop.permute.xlu1 %1568 }
0x1258   :  { %v1571_v63 = vmul.f32 %v1569_v4, %v1566_v12 }
0x125b   :  { %v1608_v5 = vpop.permute.xlu1 %1607 }
0x125c   :  { %1610 = vst.msk [vmem:[#allocation6] sm:$0xff] %vm52_vm4, %v1608_v5 }
0x1263   :  { %v1800_v41 = vld [vmem:[#allocation6] sm:$0xff] }
0x1264   :  { %1806 = vrot.lane.b32.xlu1 %v1800_v41, %s4056_s16  ;;  %v3910_v41 = vld [vmem:[%s5031_s4 + $0x18] sm:$0xff]  }
0x1268   :  { %1948 = vrot.lane.b32.xlu1 %v4564_v27, %s4058_s29 }
0x129a   :  { %v1793_v54 = vpop.f32.mrf.mxu0 }
0x129b   :  { %v1799_v7 = vadd.f32 %v4632_v6, %v1793_v54 }
0x129c   :  { %v3695_v10 = vpop.f32.mrf.mxu0 }
0x129d   :  { %v1801_v11 = vmul.f32 %v1799_v7, %v4173_v20 }
0x129e   :  { %v1796_v14 = vpop.f32.mrf.mxu0 }
0x129f   :  { %4003 = vtanh.f32 %v1801_v11  ;;  %v3911_v11 = vld [vmem:[%s5031_s4 + $0x10] sm:$0xff]  }
0x12a0   :  { %v1574_v15 = vpop.permute.xlu0 %1573  ;;  %v3696_v18 = vpop.f32.mrf.mxu0 }
0x12a1   :  { %v1576_v17 = vmul.f32 %v1574_v15, %v1566_v12  ;;  %v3912_v15 = vld [vmem:[%s5031_s4 + $0x8] sm:$0xff]  }
0x12a2   :  { %v2031_v21 = vpop.f32.mrf.mxu0 }
0x12a3   :  { %1578 = vrot.lane.b32.xlu0 %v1576_v17, %s4056_s16  ;;  %v2037_v22 = vadd.f32 %v2031_v21, %v174_v19  ;;  %v3913_v17 = vld [vmem:[%s5031_s4] sm:$0xff]  }
0x12a4   :  { %v3715_v23 = vpop.f32.mrf.mxu0 }
0x12a5   :  { %v2039_v24 = vmul.f32 %v2037_v22, %v4173_v20  ;;  %v3914_v22 = vld [vmem:[%s5028_s3 + $0x8] sm:$0xff]  }
0x12a6   :  { %v2034_v25 = vpop.f32.mrf.mxu0 }
0x12a7   :  { %4005 = vtanh.f32 %v2039_v24  ;;  %v3915_v25 = vld [vmem:[%s5028_s3] sm:$0xff]  }
0x12a8   :  { %v3716_v26 = vpop.f32.mrf.mxu0 }
0x12ac   :  { %v4004_v27 = vpop.eup %4003 }
0x12ad   :  { %1811 = vrot.lane.b32.xlu0 %v4004_v27, %s4056_s16  ;;  %v1803_v31 = vmul.f32 0.5, %v4004_v27 }
0x12af   :  { %v1804_v32 = vadd.f32 0.5, %v1803_v31 }
0x12b4   :  { %v4006_v28 = vpop.eup %4005 }
0x12b5   :  { %2049 = vrot.lane.b32.xlu1 %v4006_v28, %s4056_s16  ;;  %v2041_v36 = vmul.f32 0.5, %v4006_v28 }
0x12b7   :  { %v2042_v39 = vadd.f32 0.5, %v2041_v36 }
0x12d6   :  { %v1807_v16 = vpop.permute.xlu1 %1806 }
0x12d7   :  { %v1809_v40 = vmul.f32 %v1807_v16, %v1804_v32 }
0x12da   :  { %v1949_v58 = vpop.permute.xlu1 %1948 }
0x12db   :  { %1951 = vst.msk [vmem:[#allocation4] sm:$0xff] %vm52_vm4, %v1949_v58  ;;  %v4728_v58 = vld [vmem:[%s5034_s7] ss:$0 sm:$0xff] }
0x12e2   :  { %v2038_v38 = vld [vmem:[#allocation4] sm:$0xff] }
0x1315   :  { %v1579_v29 = vpop.permute.xlu0 %1578 }
0x1316   :  { %v4643_v30 = vadd.f32 %v1579_v29, %v1571_v63 }
0x1318   :  { %4007 = vtanh.f32 %v4643_v30 }
0x131f   :  { %v1812_v13 = vpop.permute.xlu0 %1811 }
0x1320   :  { %v1814_v34 = vmul.f32 %v1812_v13, %v1804_v32 }
0x1322   :  { %1816 = vrot.lane.b32.xlu0 %v1814_v34, %s4056_s16 }
0x1325   :  { %v4008_v35 = vpop.eup %4007 }
0x1326   :  { %1584 = vrot.lane.b32.xlu0 %v4008_v35, %s4056_s16 }
0x1327   :  { %v2050_v37 = vpop.permute.xlu1 %2049 }
0x1328   :  { %v2052_v33 = vmul.f32 %v2050_v37, %v2042_v39 }
0x132a   :  { %2044 = vrot.lane.b32.xlu0 %v2038_v38, %s4056_s16 }
0x132e   :  { %2054 = vrot.lane.b32.xlu0 %v2052_v33, %s4056_s16 }
0x1394   :  { %v1817_v42 = vpop.permute.xlu0 %1816 }
0x1395   :  { %v4650_v44 = vadd.f32 %v1817_v42, %v1809_v40 }
0x1397   :  { %4009 = vtanh.f32 %v4650_v44 }
0x1398   :  { %v1585_v46 = vpop.permute.xlu0 %1584 }
0x1399   :  { %v1587_v1 = vmul.f32 %v1585_v46, %v1566_v12 }
0x139b   :  { %v3402_v47 = vpack.c.bf16 %v1587_v1, %v1587_v1 }
0x139c   :  { %v2045_v52 = vpop.permute.xlu0 %2044 }
0x139d   :  { %1614 = vrot.lane.b32.xlu1 %v3402_v47, %s4057_s28  ;;  %v2047_v55 = vmul.f32 %v2045_v52, %v2042_v39 }
0x13a0   :  { %v2055_v53 = vpop.permute.xlu0 %2054 }
0x13a1   :  { %v4667_v56 = vadd.f32 %v2055_v53, %v2047_v55 }
0x13a3   :  { %4011 = vtanh.f32 %v4667_v56 }
0x13a4   :  { %v4010_v50 = vpop.eup %4009 }
0x13a5   :  { %1822 = vrot.lane.b32.xlu1 %v4010_v50, %s4056_s16 }
0x13b0   :  { %v4012_v4 = vpop.eup %4011 }
0x140f   :  { %v1615_v43 = vpop.permute.xlu1 %1614 }
0x1410   :  { %1617 = vst.msk [vmem:[#allocation7] sm:$0xf] %vm48_vm3, %v1615_v43 }
0x1417   :  { %v1823_v57 = vpop.permute.xlu1 %1822  ;;  %v3904_v59 = vld [vmem:[#allocation7] ss:$0 sps:$4 sm:$0xff]  }
0x1418   :  { %v1825_v2 = vmul.f32 %v1823_v57, %v1804_v32  ;;  %1834 = vrot.lane.b32.xlu1 %v3904_v59, %s4056_s16 }
0x141a   :  { %v1826_v3 = vpack.c.bf16 %v1825_v2, %v1825_v2 }
0x141c   :  { %1829 = vrot.lane.b32.xlu0 %v1826_v3, %s4057_s28  ;;  %2060 = vrot.lane.b32.xlu1 %v4012_v4, %s4056_s16 }
0x1420   :  { %1954 = vrot.lane.b32.xlu0 %v1826_v3, %s4057_s28 }
0x148a   :  { %v1835_v5 = vpop.permute.xlu1 %1834 }
0x148e   :  { %v1830_v9 = vpop.permute.xlu0 %1829  ;;  %v2061_v7 = vpop.permute.xlu1 %2060 }
0x148f   :  { %v1838_v54 = vsel %vm52_vm4, %v1830_v9, %v1835_v5  ;;  %v2063_v10 = vmul.f32 %v2061_v7, %v2042_v39 }
0x1490   :  { %3706 = vmatmul.mubr.msk.bf16.vlgmr.msra.gmra.mxu1 %vm347_vm6, %v1838_v54 }
0x1491   :  { %3718 = vmatpush3.bf16.msra.mxu1 %v3910_v41  ;;  %3725 = vmatprep.mubr.msk.bf16.mxu1 %vm4053_vm2, %v4052_v0  ;;  %v2064_v12 = vpack.c.bf16 %v2063_v10, %v2063_v10 }
0x1492   :  { %v1955_v14 = vpop.permute.xlu0 %1954  ;;  %3719 = vmatprep.subr.bf16.mxu1 %v4052_v0 }
0x1493   :  { %1957 = vst.msk [vmem:[#allocation5] sm:$0xf] %vm48_vm3, %v1955_v14  ;;  %2067 = vrot.lane.b32.xlu0 %v2064_v12, %s4057_s28 }
0x1495   :  { %3720 = vmatpush3.bf16.msra.mxu1 %v3911_v11 }
0x1496   :  { %3721 = vmatprep.subr.bf16.mxu1 %v4052_v0 }
0x1497   :  { %2295 = vrot.lane.b32.xlu0 %v2064_v12, %s4057_s28 }
0x1499   :  { %3722 = vmatpush3.bf16.msra.mxu1 %v3912_v15 }
0x149a   :  { %v3909_v18 = vld [vmem:[#allocation5] ss:$0 sps:$4 sm:$0xff]   ;;  %3723 = vmatprep.subr.bf16.mxu1 %v4052_v0 }
0x149b   :  { %2072 = vrot.lane.b32.xlu1 %v3909_v18, %s4056_s16 }
0x149d   :  { %3724 = vmatpush3.bf16.msra.mxu1 %v3913_v17 }
0x149e   :  { %3741 = vmatprep.subr.bf16.mxu1 %v4052_v0 }
0x149f   :  { %1619 = vrot.lane.b32.xlu1 %v4643_v30, %s4058_s29 }
0x1505   :  { %v2068_v19 = vpop.permute.xlu0 %2067 }
0x1509   :  { %v2296_v21 = vpop.permute.xlu0 %2295 }
0x150a   :  { %2298 = vst.msk [vmem:[#allocation3] sm:$0xf] %vm48_vm3, %v2296_v21 }
0x150d   :  { %v2073_v23 = vpop.permute.xlu1 %2072 }
0x150e   :  { %v2076_v24 = vsel %vm52_vm4, %v2068_v19, %v2073_v23  ;;  %v3918_v23 = vld [vmem:[%s5033_s6 + $0x10] sm:$0xff]  }
0x150f   :  { %3726 = vmatmul.mubr.msk.bf16.vlgmr.msra.gmra.mxu1 %vm347_vm6, %v2076_v24 }
0x1510   :  { %3742 = vmatpush3.bf16.msra.mxu1 %v3914_v22  ;;  %3745 = vmatprep.mubr.msk.bf16.mxu1 %vm4053_vm2, %v4052_v0  ;;  %v3917_v22 = vld [vmem:[%s5033_s6 + $0x18] sm:$0xff]  }
0x1511   :  { %v1620_v26 = vpop.permute.xlu1 %1619  ;;  %3743 = vmatprep.subr.bf16.mxu1 %v4052_v0  ;;  %v2329_v27 = vld [vmem:[#allocation3] sm:$0xf]  ;;  %3730 = vmatpush3.bf16.msra.mxu0 %v3917_v22 }
0x1512   :  { %1622 = vst.msk [vmem:[#allocation8] sm:$0xff] %vm52_vm4, %v1620_v26  ;;  %3731 = vmatprep.subr.bf16.mxu0 %v4052_v0 }
0x1514   :  { %3744 = vmatpush3.bf16.msra.mxu1 %v3915_v25  ;;  %v3919_v25 = vld [vmem:[%s5033_s6 + $0x8] sm:$0xff]  }
0x1515   :  { %3761 = vmatprep.subr.bf16.mxu1 %v4052_v0  ;;  %3732 = vmatpush3.bf16.msra.mxu0 %v3918_v23 }
0x1516   :  { %3733 = vmatprep.subr.bf16.mxu0 %v4052_v0 }
0x1517   :  { %3746 = vmatmul.mubr.msk.bf16.vlgmr.msra.gmra.mxu1 %vm52_vm4, %v2329_v27 }
0x1518   :  { %3769 = vmatprep.mubr.msk.bf16.mxu1 %vm4053_vm2, %v4052_v0 }
0x1519   :  { %v1914_v28 = vld [vmem:[#allocation8] sm:$0xff]  ;;  %3734 = vmatpush3.bf16.msra.mxu0 %v3919_v25 }
0x151a   :  { %1920 = vrot.lane.b32.xlu1 %v1914_v28, %s4056_s16  ;;  %3735 = vmatprep.subr.bf16.mxu0 %v4052_v0 }
0x151e   :  { %1959 = vrot.lane.b32.xlu1 %v4650_v44, %s4058_s29 }
0x1550   :  { %v1907_v16 = vpop.f32.mrf.mxu1 }
0x1551   :  { %v1913_v63 = vadd.f32 %v4728_v58, %v1907_v16 }
0x1552   :  { %v3707_v29 = vpop.f32.mrf.mxu1 }
0x1553   :  { %v1915_v30 = vmul.f32 %v1913_v63, %v4173_v20  ;;  %v3920_v63 = vld [vmem:[%s5033_s6] sm:$0xff]  }
0x1554   :  { %v1910_v31 = vpop.f32.mrf.mxu1  ;;  %3736 = vmatpush3.bf16.msra.mxu0 %v3920_v63 }
0x1555   :  { %4013 = vtanh.f32 %v1915_v30  ;;  %3749 = vmatprep.subr.bf16.mxu0 %v4052_v0 }
0x1556   :  { %v3708_v32 = vpop.f32.mrf.mxu1 }
0x1562   :  { %v4014_v13 = vpop.eup %4013 }
0x1563   :  { %1925 = vrot.lane.b32.xlu0 %v4014_v13, %s4056_s16  ;;  %v1917_v37 = vmul.f32 0.5, %v4014_v13 }
0x1565   :  { %v1918_v42 = vadd.f32 0.5, %v1917_v37 }
0x158c   :  { %v1921_v34 = vpop.permute.xlu1 %1920 }
0x158d   :  { %v1923_v60 = vmul.f32 %v1921_v34, %v1918_v42 }
0x1590   :  { %v1960_v35 = vpop.permute.xlu1 %1959 }
0x1591   :  { %1962 = vst.msk [vmem:[#allocation6] sm:$0xff] %vm52_vm4, %v1960_v35 }
0x1598   :  { %v2152_v36 = vld [vmem:[#allocation6] sm:$0xff] }
0x1599   :  { %2158 = vrot.lane.b32.xlu1 %v2152_v36, %s4056_s16  ;;  %v3922_v36 = vld [vmem:[%s5031_s4 + $0x18] sm:$0xff]  }
0x159d   :  { %2300 = vrot.lane.b32.xlu1 %v4667_v56, %s4058_s29 }
0x15cf   :  { %v2145_v38 = vpop.f32.mrf.mxu1 }
0x15d0   :  { %v2151_v39 = vadd.f32 %v4632_v6, %v2145_v38 }
0x15d1   :  { %v3727_v33 = vpop.f32.mrf.mxu1 }
0x15d2   :  { %v2153_v40 = vmul.f32 %v2151_v39, %v4173_v20 }
0x15d3   :  { %v2148_v44 = vpop.f32.mrf.mxu1 }
0x15d4   :  { %4015 = vtanh.f32 %v2153_v40  ;;  %v3923_v40 = vld [vmem:[%s5031_s4 + $0x10] sm:$0xff]  }
0x15d5   :  { %v1926_v46 = vpop.permute.xlu0 %1925  ;;  %v3728_v47 = vpop.f32.mrf.mxu1 }
0x15d6   :  { %v1928_v1 = vmul.f32 %v1926_v46, %v1918_v42  ;;  %v3924_v46 = vld [vmem:[%s5031_s4 + $0x8] sm:$0xff]  }
0x15d7   :  { %v2383_v49 = vpop.f32.mrf.mxu1 }
0x15d8   :  { %1930 = vrot.lane.b32.xlu0 %v1928_v1, %s4056_s16  ;;  %v2389_v50 = vadd.f32 %v2383_v49, %v179_v48  ;;  %v3925_v1 = vld [vmem:[%s5031_s4] sm:$0xff]  }
0x15d9   :  { %v3747_v51 = vpop.f32.mrf.mxu1 }
0x15da   :  { %v2391_v52 = vmul.f32 %v2389_v50, %v4173_v20  ;;  %v3926_v50 = vld [vmem:[%s5028_s3 + $0x8] sm:$0xff]  }
0x15db   :  { %v2386_v53 = vpop.f32.mrf.mxu1 }
0x15dc   :  { %4017 = vtanh.f32 %v2391_v52  ;;  %v3927_v53 = vld [vmem:[%s5028_s3] sm:$0xff]  }
0x15dd   :  { %v3748_v55 = vpop.f32.mrf.mxu1 }
0x15e1   :  { %v4016_v56 = vpop.eup %4015 }
0x15e2   :  { %2163 = vrot.lane.b32.xlu0 %v4016_v56, %s4056_s16  ;;  %v2155_v3 = vmul.f32 0.5, %v4016_v56 }
0x15e4   :  { %v2156_v4 = vadd.f32 0.5, %v2155_v3 }
0x15e9   :  { %v4018_v61 = vpop.eup %4017 }
0x15ea   :  { %2401 = vrot.lane.b32.xlu1 %v4018_v61, %s4056_s16  ;;  %v2393_v54 = vmul.f32 0.5, %v4018_v61 }
0x15ec   :  { %v2394_v11 = vadd.f32 0.5, %v2393_v54 }
0x160b   :  { %v2159_v43 = vpop.permute.xlu1 %2158 }
0x160c   :  { %v2161_v14 = vmul.f32 %v2159_v43, %v2156_v4 }
0x160f   :  { %v2301_v57 = vpop.permute.xlu1 %2300 }
0x1610   :  { %2303 = vst.msk [vmem:[#allocation4] sm:$0xff] %vm52_vm4, %v2301_v57 }
0x1617   :  { %v2390_v10 = vld [vmem:[#allocation4] sm:$0xff] }
0x164a   :  { %v1931_v59 = vpop.permute.xlu0 %1930 }
0x164b   :  { %v4746_v2 = vadd.f32 %v1931_v59, %v1923_v60 }
0x164d   :  { %4019 = vtanh.f32 %v4746_v2 }
0x1654   :  { %v2164_v5 = vpop.permute.xlu0 %2163 }
0x1655   :  { %v2166_v41 = vmul.f32 %v2164_v5, %v2156_v4 }
0x1657   :  { %2168 = vrot.lane.b32.xlu0 %v2166_v41, %s4056_s16 }
0x165a   :  { %v4020_v9 = vpop.eup %4019 }
0x165b   :  { %1936 = vrot.lane.b32.xlu0 %v4020_v9, %s4056_s16 }
0x165c   :  { %v2402_v7 = vpop.permute.xlu1 %2401 }
0x165d   :  { %v2404_v12 = vmul.f32 %v2402_v7, %v2394_v11 }
0x165f   :  { %2396 = vrot.lane.b32.xlu0 %v2390_v10, %s4056_s16 }
0x1663   :  { %2406 = vrot.lane.b32.xlu0 %v2404_v12, %s4056_s16 }
0x16c9   :  { %v2169_v15 = vpop.permute.xlu0 %2168 }
0x16ca   :  { %v4753_v17 = vadd.f32 %v2169_v15, %v2161_v14 }
0x16cc   :  { %4021 = vtanh.f32 %v4753_v17 }
0x16cd   :  { %v1937_v18 = vpop.permute.xlu0 %1936 }
0x16ce   :  { %v1939_v19 = vmul.f32 %v1937_v18, %v1918_v42 }
0x16d0   :  { %v3405_v21 = vpack.c.bf16 %v1939_v19, %v1939_v19 }
0x16d1   :  { %v2397_v26 = vpop.permute.xlu0 %2396 }
0x16d2   :  { %1966 = vrot.lane.b32.xlu1 %v3405_v21, %s4057_s28  ;;  %v2399_v28 = vmul.f32 %v2397_v26, %v2394_v11  ;;  %v182_v21 = vadd.f32 %v4531_v45, %v4235_v62 }
0x16d5   :  { %v2407_v27 = vpop.permute.xlu0 %2406 }
0x16d6   :  { %v4770_v16 = vadd.f32 %v2407_v27, %v2399_v28 }
0x16d8   :  { %4023 = vtanh.f32 %v4770_v16 }
0x16d9   :  { %v4022_v24 = vpop.eup %4021 }
0x16da   :  { %2174 = vrot.lane.b32.xlu1 %v4022_v24, %s4056_s16 }
0x16e5   :  { %v4024_v34 = vpop.eup %4023 }
0x1744   :  { %v1967_v29 = vpop.permute.xlu1 %1966 }
0x1745   :  { %1969 = vst.msk [vmem:[#allocation7] sm:$0xf] %vm48_vm3, %v1967_v29 }
0x174c   :  { %v2175_v30 = vpop.permute.xlu1 %2174  ;;  %v3916_v31 = vld [vmem:[#allocation7] ss:$0 sps:$4 sm:$0xff]  }
0x174d   :  { %v2177_v32 = vmul.f32 %v2175_v30, %v2156_v4  ;;  %2186 = vrot.lane.b32.xlu1 %v3916_v31, %s4056_s16 }
0x174f   :  { %v2178_v13 = vpack.c.bf16 %v2177_v32, %v2177_v32 }
0x1751   :  { %2181 = vrot.lane.b32.xlu0 %v2178_v13, %s4057_s28  ;;  %2412 = vrot.lane.b32.xlu1 %v4024_v34, %s4056_s16 }
0x1755   :  { %2306 = vrot.lane.b32.xlu0 %v2178_v13, %s4057_s28 }
0x17bf   :  { %v2187_v35 = vpop.permute.xlu1 %2186 }
0x17c3   :  { %v2182_v37 = vpop.permute.xlu0 %2181  ;;  %v2413_v39 = vpop.permute.xlu1 %2412 }
0x17c4   :  { %v2190_v38 = vsel %vm52_vm4, %v2182_v37, %v2187_v35  ;;  %v2415_v33 = vmul.f32 %v2413_v39, %v2394_v11 }
0x17c5   :  { %3738 = vmatmul.mubr.msk.bf16.vlgmr.msra.gmra.mxu0 %vm347_vm6, %v2190_v38 }
0x17c6   :  { %3750 = vmatpush3.bf16.msra.mxu0 %v3922_v36  ;;  %3757 = vmatprep.mubr.msk.bf16.mxu0 %vm4053_vm2, %v4052_v0  ;;  %v2416_v42 = vpack.c.bf16 %v2415_v33, %v2415_v33 }
0x17c7   :  { %v2307_v44 = vpop.permute.xlu0 %2306  ;;  %3751 = vmatprep.subr.bf16.mxu0 %v4052_v0 }
0x17c8   :  { %2309 = vst.msk [vmem:[#allocation5] sm:$0xf] %vm48_vm3, %v2307_v44  ;;  %2419 = vrot.lane.b32.xlu0 %v2416_v42, %s4057_s28 }
0x17ca   :  { %3752 = vmatpush3.bf16.msra.mxu0 %v3923_v40 }
0x17cb   :  { %3753 = vmatprep.subr.bf16.mxu0 %v4052_v0 }
0x17cc   :  { %2647 = vrot.lane.b32.xlu0 %v2416_v42, %s4057_s28 }
0x17ce   :  { %3754 = vmatpush3.bf16.msra.mxu0 %v3924_v46 }
0x17cf   :  { %v3921_v47 = vld [vmem:[#allocation5] ss:$0 sps:$4 sm:$0xff]   ;;  %3755 = vmatprep.subr.bf16.mxu0 %v4052_v0 }
0x17d0   :  { %2424 = vrot.lane.b32.xlu1 %v3921_v47, %s4056_s16 }
0x17d2   :  { %3756 = vmatpush3.bf16.msra.mxu0 %v3925_v1 }
0x17d3   :  { %3773 = vmatprep.subr.bf16.mxu0 %v4052_v0 }
0x17d4   :  { %1971 = vrot.lane.b32.xlu1 %v4746_v2, %s4058_s29 }
0x183a   :  { %v2420_v48 = vpop.permute.xlu0 %2419 }
0x183e   :  { %v2648_v49 = vpop.permute.xlu0 %2647 }
0x183f   :  { %2650 = vst.msk [vmem:[#allocation3] sm:$0xf] %vm48_vm3, %v2648_v49  ;;  %v3930_v49 = vld [vmem:[%s5033_s6 + $0x10] sm:$0xff]  }
0x1842   :  { %v2425_v51 = vpop.permute.xlu1 %2424 }
0x1843   :  { %v2428_v52 = vsel %vm52_vm4, %v2420_v48, %v2425_v51  ;;  %v3929_v48 = vld [vmem:[%s5033_s6 + $0x18] sm:$0xff]   ;;  %v3931_v51 = vld [vmem:[%s5033_s6 + $0x8] sm:$0xff]  }
0x1844   :  { %3758 = vmatmul.mubr.msk.bf16.vlgmr.msra.gmra.mxu0 %vm347_vm6, %v2428_v52  ;;  %3762 = vmatpush3.bf16.msra.mxu1 %v3929_v48 }
0x1845   :  { %3774 = vmatpush3.bf16.msra.mxu0 %v3926_v50  ;;  %3777 = vmatprep.mubr.msk.bf16.mxu0 %vm4053_vm2, %v4052_v0 }
0x1846   :  { %v1972_v55 = vpop.permute.xlu1 %1971  ;;  %3775 = vmatprep.subr.bf16.mxu0 %v4052_v0  ;;  %v2681_v56 = vld [vmem:[#allocation3] sm:$0xf]  ;;  %3763 = vmatprep.subr.bf16.mxu1 %v4052_v0 }
0x1847   :  { %1974 = vst.msk [vmem:[#allocation8] sm:$0xff] %vm52_vm4, %v1972_v55 }
0x1848   :  { %3764 = vmatpush3.bf16.msra.mxu1 %v3930_v49 }
0x1849   :  { %3776 = vmatpush3.bf16.msra.mxu0 %v3927_v53  ;;  %3765 = vmatprep.subr.bf16.mxu1 %v4052_v0 }
0x184a   :  { %3793 = vmatprep.subr.bf16.mxu0 %v4052_v0 }
0x184c   :  { %3778 = vmatmul.mubr.msk.bf16.vlgmr.msra.gmra.mxu0 %vm52_vm4, %v2681_v56  ;;  %3766 = vmatpush3.bf16.msra.mxu1 %v3931_v51 }
0x184d   :  { %3801 = vmatprep.mubr.msk.bf16.mxu0 %vm4053_vm2, %v4052_v0  ;;  %3767 = vmatprep.subr.bf16.mxu1 %v4052_v0 }
0x184e   :  { %v2266_v61 = vld [vmem:[#allocation8] sm:$0xff] }
0x184f   :  { %2272 = vrot.lane.b32.xlu1 %v2266_v61, %s4056_s16  ;;  %v3932_v61 = vld [vmem:[%s5033_s6] sm:$0xff]  }
0x1850   :  { %3768 = vmatpush3.bf16.msra.mxu1 %v3932_v61 }
0x1851   :  { %3781 = vmatprep.subr.bf16.mxu1 %v4052_v0 }
0x1853   :  { %2311 = vrot.lane.b32.xlu1 %v4753_v17, %s4058_s29 }
0x1885   :  { %v2259_v43 = vpop.f32.mrf.mxu0 }
0x1886   :  { %v2265_v57 = vadd.f32 %v4728_v58, %v2259_v43 }
0x1887   :  { %v3739_v60 = vpop.f32.mrf.mxu0 }
0x1888   :  { %v2267_v59 = vmul.f32 %v2265_v57, %v4173_v20 }
0x1889   :  { %v2262_v2 = vpop.f32.mrf.mxu0 }
0x188a   :  { %4025 = vtanh.f32 %v2267_v59 }
0x188b   :  { %v3740_v3 = vpop.f32.mrf.mxu0 }
0x1897   :  { %v4026_v4 = vpop.eup %4025 }
0x1898   :  { %2277 = vrot.lane.b32.xlu0 %v4026_v4, %s4056_s16  ;;  %v2269_v54 = vmul.f32 0.5, %v4026_v4 }
0x189a   :  { %v2270_v14 = vadd.f32 0.5, %v2269_v54 }
0x18c1   :  { %v2273_v5 = vpop.permute.xlu1 %2272 }
0x18c2   :  { %v2275_v62 = vmul.f32 %v2273_v5, %v2270_v14  ;;  %v3934_v5 = vld [vmem:[%s5031_s4 + $0x18] sm:$0xff]  }
0x18c5   :  { %v2312_v41 = vpop.permute.xlu1 %2311 }
0x18c6   :  { %2314 = vst.msk [vmem:[#allocation6] sm:$0xff] %vm52_vm4, %v2312_v41 }
0x18cd   :  { %v2504_v9 = vld [vmem:[#allocation6] sm:$0xff] }
0x18ce   :  { %2510 = vrot.lane.b32.xlu1 %v2504_v9, %s4056_s16 }
0x18d2   :  { %2652 = vrot.lane.b32.xlu1 %v4770_v16, %s4058_s29 }
0x1904   :  { %v2497_v7 = vpop.f32.mrf.mxu0 }
0x1905   :  { %v2503_v10 = vadd.f32 %v4632_v6, %v2497_v7 }
0x1906   :  { %v3759_v11 = vpop.f32.mrf.mxu0 }
0x1907   :  { %v2505_v12 = vmul.f32 %v2503_v10, %v4173_v20  ;;  %v3935_v10 = vld [vmem:[%s5031_s4 + $0x10] sm:$0xff]  }
0x1908   :  { %v2500_v15 = vpop.f32.mrf.mxu0 }
0x1909   :  { %4027 = vtanh.f32 %v2505_v12  ;;  %v3937_v15 = vld [vmem:[%s5031_s4] sm:$0xff]  }
0x190a   :  { %v2278_v17 = vpop.permute.xlu0 %2277  ;;  %v3760_v19 = vpop.f32.mrf.mxu0 }
0x190b   :  { %v2280_v18 = vmul.f32 %v2278_v17, %v2270_v14 }
0x190c   :  { %v2735_v22 = vpop.f32.mrf.mxu0 }
0x190d   :  { %2282 = vrot.lane.b32.xlu0 %v2280_v18, %s4056_s16  ;;  %v2741_v23 = vadd.f32 %v2735_v22, %v182_v21 }
0x190e   :  { %v3779_v24 = vpop.f32.mrf.mxu0 }
0x190f   :  { %v2743_v25 = vmul.f32 %v2741_v23, %v4173_v20 }
0x1910   :  { %v2738_v26 = vpop.f32.mrf.mxu0 }
0x1911   :  { %4029 = vtanh.f32 %v2743_v25 }
0x1912   :  { %v3780_v27 = vpop.f32.mrf.mxu0 }
0x1916   :  { %v4028_v28 = vpop.eup %4027 }
0x1917   :  { %2515 = vrot.lane.b32.xlu0 %v4028_v28, %s4056_s16  ;;  %v2507_v31 = vmul.f32 0.5, %v4028_v28 }
0x1919   :  { %v2508_v32 = vadd.f32 0.5, %v2507_v31 }
0x191e   :  { %v4030_v16 = vpop.eup %4029 }
0x191f   :  { %2753 = vrot.lane.b32.xlu1 %v4030_v16, %s4056_s16  ;;  %v2745_v36 = vmul.f32 0.5, %v4030_v16 }
0x1921   :  { %v2746_v39 = vadd.f32 0.5, %v2745_v36 }
0x1940   :  { %v2511_v63 = vpop.permute.xlu1 %2510 }
0x1941   :  { %v2513_v40 = vmul.f32 %v2511_v63, %v2508_v32 }
0x1944   :  { %v2653_v29 = vpop.permute.xlu1 %2652 }
0x1945   :  { %2655 = vst.msk [vmem:[#allocation4] sm:$0xff] %vm52_vm4, %v2653_v29 }
0x194c   :  { %v2742_v38 = vld [vmem:[#allocation4] sm:$0xff] }
0x197f   :  { %v2283_v45 = vpop.permute.xlu0 %2282 }
0x1980   :  { %v4844_v30 = vadd.f32 %v2283_v45, %v2275_v62 }
0x1982   :  { %4031 = vtanh.f32 %v4844_v30 }
0x1989   :  { %v2516_v13 = vpop.permute.xlu0 %2515 }
0x198a   :  { %v2518_v34 = vmul.f32 %v2516_v13, %v2508_v32 }
0x198c   :  { %2520 = vrot.lane.b32.xlu0 %v2518_v34, %s4056_s16 }
0x198f   :  { %v4032_v35 = vpop.eup %4031 }
0x1990   :  { %2288 = vrot.lane.b32.xlu0 %v4032_v35, %s4056_s16 }
0x1991   :  { %v2754_v37 = vpop.permute.xlu1 %2753 }
0x1992   :  { %v2756_v33 = vmul.f32 %v2754_v37, %v2746_v39 }
0x1994   :  { %2748 = vrot.lane.b32.xlu0 %v2742_v38, %s4056_s16 }
0x1998   :  { %2758 = vrot.lane.b32.xlu0 %v2756_v33, %s4056_s16 }
0x19fe   :  { %v2521_v42 = vpop.permute.xlu0 %2520 }
0x19ff   :  { %v4851_v44 = vadd.f32 %v2521_v42, %v2513_v40 }
0x1a01   :  { %4033 = vtanh.f32 %v4851_v44 }
0x1a02   :  { %v2289_v46 = vpop.permute.xlu0 %2288 }
0x1a03   :  { %v2291_v1 = vmul.f32 %v2289_v46, %v2270_v14  ;;  %v3936_v14 = vld [vmem:[%s5031_s4 + $0x8] sm:$0xff]  }
0x1a05   :  { %v3408_v47 = vpack.c.bf16 %v2291_v1, %v2291_v1 }
0x1a06   :  { %v2749_v52 = vpop.permute.xlu0 %2748 }
0x1a07   :  { %2318 = vrot.lane.b32.xlu1 %v3408_v47, %s4057_s28  ;;  %v2751_v55 = vmul.f32 %v2749_v52, %v2746_v39 }
0x1a0a   :  { %v2759_v53 = vpop.permute.xlu0 %2758 }
0x1a0b   :  { %v4868_v56 = vadd.f32 %v2759_v53, %v2751_v55 }
0x1a0d   :  { %4035 = vtanh.f32 %v4868_v56 }
0x1a0e   :  { %v4034_v50 = vpop.eup %4033 }
0x1a0f   :  { %2526 = vrot.lane.b32.xlu1 %v4034_v50, %s4056_s16 }
0x1a1a   :  { %v4036_v3 = vpop.eup %4035 }
0x1a79   :  { %v2319_v43 = vpop.permute.xlu1 %2318 }
0x1a7a   :  { %2321 = vst.msk [vmem:[#allocation7] sm:$0xf] %vm48_vm3, %v2319_v43  ;;  %v3939_v43 = vld [vmem:[%s5033_s6 + $0x18] sm:$0xff]  }
0x1a7b   :  { %3794 = vmatpush3.bf16.msra.mxu0 %v3939_v43 }
0x1a7c   :  { %3795 = vmatprep.subr.bf16.mxu0 %v4052_v0 }
0x1a81   :  { %v2527_v57 = vpop.permute.xlu1 %2526  ;;  %v3928_v60 = vld [vmem:[#allocation7] ss:$0 sps:$4 sm:$0xff]  }
0x1a82   :  { %v2529_v59 = vmul.f32 %v2527_v57, %v2508_v32  ;;  %2538 = vrot.lane.b32.xlu1 %v3928_v60, %s4056_s16  ;;  %v3940_v57 = vld [vmem:[%s5033_s6 + $0x10] sm:$0xff]  }
0x1a83   :  { %3796 = vmatpush3.bf16.msra.mxu0 %v3940_v57 }
0x1a84   :  { %v2530_v2 = vpack.c.bf16 %v2529_v59, %v2529_v59  ;;  %v3941_v59 = vld [vmem:[%s5033_s6 + $0x8] sm:$0xff]   ;;  %3797 = vmatprep.subr.bf16.mxu0 %v4052_v0 }
0x1a86   :  { %2533 = vrot.lane.b32.xlu0 %v2530_v2, %s4057_s28  ;;  %2764 = vrot.lane.b32.xlu1 %v4036_v3, %s4056_s16 }
0x1a87   :  { %3798 = vmatpush3.bf16.msra.mxu0 %v3941_v59 }
0x1a88   :  { %3799 = vmatprep.subr.bf16.mxu0 %v4052_v0 }
0x1a8a   :  { %2658 = vrot.lane.b32.xlu0 %v2530_v2, %s4057_s28  ;;  %v3942_v2 = vld [vmem:[%s5033_s6] sm:$0xff]  }
0x1a8b   :  { %3800 = vmatpush3.bf16.msra.mxu0 %v3942_v2 }
0x1a8c   :  { %3813 = vmatprep.subr.bf16.mxu0 %v4052_v0 }
0x1af4   :  { %v2539_v4 = vpop.permute.xlu1 %2538 }
0x1af8   :  { %v2534_v41 = vpop.permute.xlu0 %2533  ;;  %v2765_v54 = vpop.permute.xlu1 %2764 }
0x1af9   :  { %v2542_v9 = vsel %vm52_vm4, %v2534_v41, %v2539_v4  ;;  %v2767_v7 = vmul.f32 %v2765_v54, %v2746_v39 }
0x1afa   :  { %3770 = vmatmul.mubr.msk.bf16.vlgmr.msra.gmra.mxu1 %vm347_vm6, %v2542_v9 }
0x1afb   :  { %3782 = vmatpush3.bf16.msra.mxu1 %v3934_v5  ;;  %3789 = vmatprep.mubr.msk.bf16.mxu1 %vm4053_vm2, %v4052_v0  ;;  %v4890_v11 = vpack.c.bf16 %v2767_v7, %v2767_v7 }
0x1afc   :  { %v2659_v12 = vpop.permute.xlu0 %2658  ;;  %3783 = vmatprep.subr.bf16.mxu1 %v4052_v0 }
0x1afd   :  { %2661 = vst.msk [vmem:[#allocation5] sm:$0xf] %vm48_vm3, %v2659_v12  ;;  %2771 = vrot.lane.b32.xlu0 %v4890_v11, %s4057_s28 }
0x1aff   :  { %3784 = vmatpush3.bf16.msra.mxu1 %v3935_v10 }
0x1b00   :  { %3785 = vmatprep.subr.bf16.mxu1 %v4052_v0 }
0x1b01   :  { %2323 = vrot.lane.b32.xlu0 %v4844_v30, %s4058_s29 }
0x1b03   :  { %3786 = vmatpush3.bf16.msra.mxu1 %v3936_v14 }
0x1b04   :  { %v3933_v17 = vld [vmem:[#allocation5] ss:$0 sps:$4 sm:$0xff]   ;;  %3787 = vmatprep.subr.bf16.mxu1 %v4052_v0 }
0x1b05   :  { %2776 = vrot.lane.b32.xlu1 %v3933_v17, %s4056_s16 }
0x1b07   :  { %3788 = vmatpush3.bf16.msra.mxu1 %v3937_v15 }
0x1b08   :  { %3805 = vmatprep.subr.bf16.mxu1 %v4052_v0 }
0x1b6f   :  { %v2772_v18 = vpop.permute.xlu0 %2771 }
0x1b73   :  { %v2324_v19 = vpop.permute.xlu0 %2323 }
0x1b74   :  { %2326 = vst.msk [vmem:[#allocation8] sm:$0xff] %vm52_vm4, %v2324_v19 }
0x1b77   :  { %v2777_v21 = vpop.permute.xlu1 %2776 }
0x1b78   :  { %v2780_v22 = vsel %vm52_vm4, %v2772_v18, %v2777_v21 }
0x1b79   :  { %3790 = vmatmul.mubr.msk.bf16.vlgmr.msra.gmra.mxu1 %vm347_vm6, %v2780_v22 }
0x1b7a   :  { %3809 = vmatprep.mubr.msk.bf16.mxu1 %vm4053_vm2, %v4052_v0 }
0x1b7b   :  { %v2618_v23 = vld [vmem:[#allocation8] sm:$0xff] }
0x1b7c   :  { %2624 = vrot.lane.b32.xlu0 %v2618_v23, %s4056_s16 }
0x1b80   :  { %2663 = vrot.lane.b32.xlu0 %v4851_v44, %s4058_s29 }
0x1bba   :  { %v2611_v24 = vpop.f32.mrf.mxu1 }
0x1bbb   :  { %v2617_v25 = vadd.f32 %v4728_v58, %v2611_v24 }
0x1bbc   :  { %v3771_v26 = vpop.f32.mrf.mxu1 }
0x1bbd   :  { %v2619_v27 = vmul.f32 %v2617_v25, %v4173_v20 }
0x1bbe   :  { %v2614_v28 = vpop.f32.mrf.mxu1 }
0x1bbf   :  { %4037 = vtanh.f32 %v2619_v27 }
0x1bc0   :  { %v3772_v16 = vpop.f32.mrf.mxu1 }
0x1bcc   :  { %v4038_v63 = vpop.eup %4037 }
0x1bcd   :  { %2629 = vrot.lane.b32.xlu1 %v4038_v63, %s4056_s16  ;;  %v2621_v30 = vmul.f32 0.5, %v4038_v63 }
0x1bcf   :  { %v2622_v35 = vadd.f32 0.5, %v2621_v30 }
0x1bee   :  { %v2625_v29 = vpop.permute.xlu0 %2624 }
0x1bef   :  { %v2627_v40 = vmul.f32 %v2625_v29, %v2622_v35 }
0x1bf2   :  { %v2664_v62 = vpop.permute.xlu0 %2663 }
0x1bf3   :  { %2666 = vst.msk [vmem:[#allocation6] sm:$0xff] %vm52_vm4, %v2664_v62  ;;  %v3944_v62 = vld [vmem:[%s5035_s8] sm:$0xff]  }
0x1bfa   :  { %v2856_v45 = vld [vmem:[#allocation6] sm:$0xff] }
0x1bfb   :  { %2862 = vrot.lane.b32.xlu0 %v2856_v45, %s4056_s16 }
0x1c39   :  { %v2849_v31 = vpop.f32.mrf.mxu1 }
0x1c3a   :  { %v2855_v32 = vadd.f32 %v4632_v6, %v2849_v31 }
0x1c3b   :  { %v3791_v13 = vpop.f32.mrf.mxu1 }
0x1c3c   :  { %v2857_v34 = vmul.f32 %v2855_v32, %v4173_v20  ;;  %v3946_v13 = vld [vmem:[%s5036_s10 + $0x30] sm:$0xff]  }
0x1c3d   :  { %v2852_v36 = vpop.f32.mrf.mxu1 }
0x1c3e   :  { %4039 = vtanh.f32 %v2857_v34 }
0x1c3f   :  { %v2630_v37 = vpop.permute.xlu1 %2629  ;;  %v3792_v39 = vpop.f32.mrf.mxu1 }
0x1c40   :  { %v2632_v38 = vmul.f32 %v2630_v37, %v2622_v35  ;;  %v3948_v37 = vld [vmem:[%s5036_s10 + $0x20] sm:$0xff]  }
0x1c42   :  { %2634 = vrot.lane.b32.xlu1 %v2632_v38, %s4056_s16  ;;  %v3950_v38 = vld [vmem:[%s5036_s10 + $0x10] sm:$0xff]  }
0x1c4b   :  { %v4040_v33 = vpop.eup %4039 }
0x1c4c   :  { %2867 = vrot.lane.b32.xlu1 %v4040_v33, %s4056_s16  ;;  %v2859_v46 = vmul.f32 0.5, %v4040_v33 }
0x1c4e   :  { %v2860_v6 = vadd.f32 0.5, %v2859_v46  ;;  %v3951_v46 = vld [vmem:[%s5036_s10 + $0x8] sm:$0xff]  }
0x1c6d   :  { %v2863_v49 = vpop.permute.xlu0 %2862 }
0x1c6e   :  { %v2865_v50 = vmul.f32 %v2863_v49, %v2860_v6 }
0x1cb4   :  { %v2635_v42 = vpop.permute.xlu1 %2634 }
0x1cb5   :  { %v2637_v44 = vadd.f32 %v2635_v42, %v2627_v40 }
0x1cb7   :  { %4041 = vtanh.f32 %v2637_v44 }
0x1cbe   :  { %v2868_v1 = vpop.permute.xlu1 %2867 }
0x1cbf   :  { %v2870_v47 = vmul.f32 %v2868_v1, %v2860_v6  ;;  %v17_v1 = vstv %s5037_s11 }
0x1cc0   :  { %18 = vst [vmem:[#allocation9] sm:$0x1] %v17_v1 }
0x1cc1   :  { %2872 = vrot.lane.b32.xlu1 %v2870_v47, %s4056_s16 }
0x1cc4   :  { %v4042_v48 = vpop.eup %4041 }
0x1cc5   :  { %2640 = vrot.lane.b32.xlu0 %v4042_v48, %s4056_s16 }
0x1d33   :  { %v2873_v51 = vpop.permute.xlu1 %2872 }
0x1d34   :  { %v4927_v52 = vadd.f32 %v2873_v51, %v2865_v50 }
0x1d36   :  { %4043 = vtanh.f32 %v4927_v52 }
0x1d37   :  { %v2641_v53 = vpop.permute.xlu0 %2640 }
0x1d38   :  { %v2643_v55 = vmul.f32 %v2641_v53, %v2622_v35  ;;  %v3947_v35 = vld [vmem:[%s5036_s10 + $0x28] sm:$0xff]   ;;  %v3382_v53 = vld [vmem:[#allocation9] ss:$0 sm:$0xff] }
0x1d3a   :  { %v3411_v61 = vpack.c.bf16 %v2643_v55, %v2643_v55 }
0x1d3c   :  { %2670 = vrot.lane.b32.xlu1 %v3411_v61, %s4057_s28 }
0x1d43   :  { %v4044_v60 = vpop.eup %4043 }
0x1d44   :  { %2878 = vrot.lane.b32.xlu0 %v4044_v60, %s4056_s16 }
0x1dae   :  { %v2671_v3 = vpop.permute.xlu1 %2670 }
0x1daf   :  { %2673 = vst.msk [vmem:[#allocation7] sm:$0xf] %vm48_vm3, %v2671_v3 }
0x1db6   :  { %v3938_v4 = vld [vmem:[#allocation7] ss:$0 sps:$4 sm:$0xff]   ;;  %v2879_v5 = vpop.permute.xlu0 %2878 }
0x1db7   :  { %v2881_v41 = vmul.f32 %v2879_v5, %v2860_v6  ;;  %2890 = vrot.lane.b32.xlu0 %v3938_v4, %s4056_s16  ;;  %v3952_v6 = vld [vmem:[%s5036_s10] sm:$0xff]  }
0x1db9   :  { %v2882_v9 = vpack.c.bf16 %v2881_v41, %v2881_v41 }
0x1dbb   :  { %2885 = vrot.lane.b32.xlu1 %v2882_v9, %s4057_s28 }
0x1dbf   :  { %2675 = vrot.lane.b32.xlu1 %v2637_v44, %s4058_s29 }
0x1e29   :  { %v2891_v54 = vpop.permute.xlu0 %2890 }
0x1e2d   :  { %v2886_v7 = vpop.permute.xlu1 %2885 }
0x1e2e   :  { %v2894_v10 = vsel %vm52_vm4, %v2886_v7, %v2891_v54 }
0x1e2f   :  { %3802 = vmatmul.mubr.msk.bf16.vlgmr.msra.gmra.mxu0 %vm347_vm6, %v2894_v10 }
0x1e30   :  { %3829 = vmatprep.mubr.msk.bf16.mxu0 %vm4053_vm2, %v4052_v0 }
0x1e31   :  { %v2676_v12 = vpop.permute.xlu1 %2675 }
0x1e32   :  { %2678 = vst.msk [vmem:[#allocation8] sm:$0xff] %vm52_vm4, %v2676_v12 }
0x1e39   :  { %v2970_v14 = vld [vmem:[#allocation8] sm:$0xff] }
0x1e3a   :  { %2976 = vrot.lane.b32.xlu1 %v2970_v14, %s4056_s16 }
0x1eac   :  { %v2977_v28 = vpop.permute.xlu1 %2976 }
0x1eef   :  { %v2963_v15 = vpop.f32.mrf.mxu0 }
0x1ef0   :  { %v2969_v17 = vadd.f32 %v4728_v58, %v2963_v15 }
0x1ef1   :  { %v3803_v18 = vpop.f32.mrf.mxu0 }
0x1ef2   :  { %v2971_v19 = vmul.f32 %v2969_v17, %v4173_v20  ;;  %v3943_v20 = vld [vmem:[%s5035_s8 + $0x8] sm:$0xff]  }
0x1ef3   :  { %v2966_v21 = vpop.f32.mrf.mxu0  ;;  %3806 = vmatpush3.bf16.msra.mxu1 %v3943_v20 }
0x1ef4   :  { %4045 = vtanh.f32 %v2971_v19  ;;  %3807 = vmatprep.subr.bf16.mxu1 %v4052_v0 }
0x1ef5   :  { %v3804_v22 = vpop.f32.mrf.mxu0 }
0x1ef7   :  { %3808 = vmatpush3.bf16.msra.mxu1 %v3944_v62 }
0x1f01   :  { %v4046_v23 = vpop.eup %4045 }
0x1f02   :  { %2981 = vrot.lane.b32.xlu0 %v4046_v23, %s4056_s16  ;;  %v2973_v24 = vmul.f32 0.5, %v4046_v23 }
0x1f04   :  { %v2974_v25 = vadd.f32 0.5, %v2973_v24 }
0x1f06   :  { %v2979_v16 = vmul.f32 %v2977_v28, %v2974_v25 }
0x1f74   :  { %v2982_v26 = vpop.permute.xlu0 %2981 }
0x1f75   :  { %v2984_v27 = vmul.f32 %v2982_v26, %v2974_v25 }
0x1f77   :  { %2986 = vrot.lane.b32.xlu0 %v2984_v27, %s4056_s16 }
0x1fe9   :  { %v2987_v63 = vpop.permute.xlu0 %2986 }
0x1fea   :  { %v2989_v29 = vadd.f32 %v2987_v63, %v2979_v16 }
0x1fec   :  { %4047 = vtanh.f32 %v2989_v29 }
0x1ff9   :  { %v4048_v58 = vpop.eup %4047 }
0x1ffa   :  { %2992 = vrot.lane.b32.xlu1 %v4048_v58, %s4056_s16 }
0x1ffe   :  { %2999 = vrot.lane.b32.xlu1 %v4890_v11, %s4057_s28  ;;  %v3945_v11 = vld [vmem:[%s5036_s10 + $0x38] sm:$0xff]  }
0x1fff   :  { %3814 = vmatpush3.bf16.msra.mxu0 %v3945_v11 }
0x2000   :  { %3815 = vmatprep.subr.bf16.mxu0 %v4052_v0 }
0x2002   :  { %3010 = vrot.lane.b32.xlu1 %v2882_v9, %s4057_s28 }
0x2003   :  { %3816 = vmatpush3.bf16.msra.mxu0 %v3946_v13 }
0x2004   :  { %3817 = vmatprep.subr.bf16.mxu0 %v4052_v0 }
0x2006   :  { %3027 = vrot.lane.b32.xlu1 %v2989_v29, %s4058_s29 }
0x2007   :  { %3818 = vmatpush3.bf16.msra.mxu0 %v3947_v35 }
0x2008   :  { %3819 = vmatprep.subr.bf16.mxu0 %v4052_v0 }
0x200b   :  { %3820 = vmatpush3.bf16.msra.mxu0 %v3948_v37 }
0x200c   :  { %3821 = vmatprep.subr.bf16.mxu0 %v4052_v0 }
0x206c   :  { %v2993_v45 = vpop.permute.xlu1 %2992 }
0x206d   :  { %v2995_v30 = vmul.f32 %v2993_v45, %v2974_v25 }
0x206f   :  { %v3414_v31 = vpack.c.bf16 %v2995_v30, %v2995_v30 }
0x2070   :  { %v3000_v32 = vpop.permute.xlu1 %2999 }
0x2071   :  { %3002 = vst.msk [vmem:[#allocation3] sm:$0xf] %vm48_vm3, %v3000_v32  ;;  %3022 = vrot.lane.b32.xlu0 %v3414_v31, %s4057_s28 }
0x2074   :  { %v3011_v34 = vpop.permute.xlu1 %3010 }
0x2075   :  { %3013 = vst.msk [vmem:[#allocation5] sm:$0xf] %vm48_vm3, %v3011_v34  ;;  %3004 = vrot.lane.b32.xlu0 %v4868_v56, %s4058_s29  ;;  %v3949_v56 = vld [vmem:[%s5036_s10 + $0x18] sm:$0xff]  }
0x2076   :  { %3822 = vmatpush3.bf16.msra.mxu0 %v3949_v56 }
0x2077   :  { %3823 = vmatprep.subr.bf16.mxu0 %v4052_v0 }
0x2078   :  { %v3028_v36 = vpop.permute.xlu1 %3027 }
0x2079   :  { %3030 = vst.msk [vmem:[#allocation8] sm:$0xff] %vm52_vm4, %v3028_v36  ;;  %3015 = vrot.lane.b32.xlu0 %v4927_v52, %s4058_s29 }
0x207a   :  { %3824 = vmatpush3.bf16.msra.mxu0 %v3950_v38 }
0x207b   :  { %3825 = vmatprep.subr.bf16.mxu0 %v4052_v0 }
0x207e   :  { %3826 = vmatpush3.bf16.msra.mxu0 %v3951_v46 }
0x207f   :  { %3827 = vmatprep.subr.bf16.mxu0 %v4052_v0 }
0x2082   :  { %3828 = vmatpush3.bf16.msra.mxu0 %v3952_v6 }
0x20e3   :  { %v3023_v39 = vpop.permute.xlu0 %3022 }
0x20e4   :  { %3025 = vst.msk [vmem:[#allocation7] sm:$0xf] %vm48_vm3, %v3023_v39 }
0x20e7   :  { %v3005_v33 = vpop.permute.xlu0 %3004 }
0x20e8   :  { %3007 = vst.msk [vmem:[#allocation4] sm:$0xff] %vm52_vm4, %v3005_v33 }
0x20eb   :  { %v3016_v40 = vpop.permute.xlu0 %3015  ;;  %v3034_v42 = vld [vmem:[#allocation7] sm:$0xf] }
0x20ec   :  { %3018 = vst.msk [vmem:[#allocation6] sm:$0xff] %vm52_vm4, %v3016_v40  ;;  %v3035_v44 = vmax.bf16 %v4054_v8, %v3034_v42  ;;  %v3378_v8 = vld [vmem:[%s5038_s9] ss:$0 sm:$0xff] }
0x20ee   :  { %3810 = vmatmul.mubr.msk.bf16.vlgmr.msra.gmra.mxu1 %vm52_vm4, %v3035_v44 }
0x21ae   :  { %v3096_v47 = vpop.f32.mrf.mxu1 }
0x21af   :  { %v3097_v48 = vadd.f32 %v3378_v8, %v3096_v47 }
0x21b0   :  { %v3811_v49 = vpop.f32.mrf.mxu1 }
0x21b1   :  { %v3102_v50 = vmax.f32 %v3097_v48, 0.0 }
0x21b2   :  { %v3099_v51 = vpop.f32.mrf.mxu1 }
0x21b3   :  { %v3103_v0 = vpack.c.bf16 %v3102_v50, %v3102_v50 }
0x21b4   :  { %v3812_v52 = vpop.f32.mrf.mxu1 }
0x21b5   :  { %3830 = vmatmul.mubr.bf16.vlgmr.msra.gmra.mxu0 %v3103_v0 }
0x2275   :  { %v3209_v55 = vpop.f32.mrf.mxu0 }
0x2276   :  { %v3210_v61 = vadd.f32 %v3382_v53, %v3209_v55 }
0x2277   :  { %v3831_v43 = vpop.f32.mrf.mxu0 }
0x2278   :  { %3216 = vst.msk [vmem:[%s5039_s12] sm:$0xff] %vm3215_vm7, %v3210_v61 }
0x2279   :  { %v3212_v57 = vpop.f32.mrf.mxu0 }
0x227b   :  { %v3832_v60 = vpop.f32.mrf.mxu0 }

</bundles_post_ra>
